<compile_context>
chip_gen: v7x
topology: tpu7x:2x2x1
jax: 0.10.0
libtpu: 0.0.40
codegen_flags: <defaults>
</compile_context>

<pallas_src>
import functools

import jax
import jax.numpy as jnp
from jax import lax
from jax.experimental import pallas as pl
from jax.experimental.pallas import tpu as pltpu

G_CH_1X = 48
G_CH_2X = 64
IN_CHANNEL = G_CH_1X
AUX_FEATURE_NUM = G_CH_1X + 3 + 2        # 53
OFFSET_NUM = 2
GROUP_NUM = 16
MAX_RESIDUE_MAGNITUDE = 40.0
LRELU_SLOPE = 0.1
CIN_PAD = 64                             # aux channels zero-padded 53 -> 64
C3 = 3 * GROUP_NUM * OFFSET_NUM          # 96
K_IM2COL = 9 * CIN_PAD                   # 576 (== 9 * G_CH_2X, shared scratch)
FUSION_PACK = 8                          # pixels packed per fusion matmul row
VMEM_LIMIT_BYTES = 48 * 1024 * 1024      # safe on v5e/v6e, below v7x physical
BAND_VMEM_BUDGET = 28 * 1024 * 1024      # target working set per band


def _cdiv(a, b):
    return -(-a // b)


def _round_up(a, b):
    return _cdiv(a, b) * b


# ---------------------------------------------------------------------------
# Pallas kernel 1: fused conv_offset stack (3 convs + 2 leaky-relus), row bands
# ---------------------------------------------------------------------------
def _conv_offset_kernel(a_ref, w1_ref, b1_ref, w2_ref, b2_ref, w3_ref, b3_ref,
                        o_ref, pad_ref, col_ref, *, band_rows, H2, W2):
    """One (batch, row-band) grid step.

    a_ref  : (band_rows+5, W2+1, 256) bf16   space-to-depth padded aux band
    w*_ref : (576, Cout) bf16 ; b*_ref : (1, Cout) f32
    o_ref  : (band_rows, W2, 96) f32
    pad_ref: (band_rows+4, W2+2, 64) bf16    zero-bordered intermediate feature
    col_ref: ((band_rows+4)*W2, 576) bf16    shared im2col scratch (row-sliced)
    """
    TH = band_rows
    C2 = G_CH_2X
    H1B, H2B = TH + 4, TH + 2                    # conv1 / conv2 band heights
    M1, M2, M3 = H1B * W2, H2B * W2, TH * W2
    t = pl.program_id(1)

    def leaky(v):
        return jnp.where(v >= 0, v, LRELU_SLOPE * v)

    def store_im2col(taps, rows):
        # Four 128-lane-aligned paired stores + one 64-wide tail store.
        for k in range(4):
            col_ref[0:rows, 128 * k:128 * (k + 1)] = jnp.concatenate(
                [taps[2 * k], taps[2 * k + 1]], axis=-1)
        col_ref[0:rows, 512:576] = taps[8]

    def conv(rows, w_ref, b_ref):
        return jnp.dot(col_ref[0:rows, :], w_ref[...],
                       preferred_element_type=jnp.float32) + b_ref[...]

    def zero_outside_image(feat, height, first_row):
        # Rows outside [0, H2) are the NEXT conv's zero padding -> force to 0.
        r = first_row + lax.broadcasted_iota(jnp.int32, (height, 1, 1), 0)
        return jnp.where((r >= 0) & (r < H2), feat, 0.0)

    # ---- conv1: 3x3 stride-2; taps are contiguous slices of the S2D band ----
    taps = []
    for dy in range(3):
        for dx in range(3):
            sub = (dy % 2) * 2 + (dx % 2)                # (row, col) parity
            taps.append(a_ref[dy // 2:dy // 2 + H1B,
                              dx // 2:dx // 2 + W2,
                              64 * sub:64 * (sub + 1)].reshape(M1, 64))
    store_im2col(taps, M1)
    f1 = leaky(conv(M1, w1_ref, b1_ref)).reshape(H1B, W2, C2)
    f1 = zero_outside_image(f1, H1B, t * TH - 2)

    # ---- conv2: 3x3 stride-1 -------------------------------------------------
    zcol = jnp.zeros((H1B, 1, C2), jnp.bfloat16)
    pad_ref[:, 0:1, :] = zcol                            # zero border columns
    pad_ref[:, W2 + 1:W2 + 2, :] = zcol
    pad_ref[:, 1:W2 + 1, :] = f1.astype(jnp.bfloat16)
    taps = [pad_ref[dy:dy + H2B, dx:dx + W2, :].reshape(M2, C2)
            for dy in range(3) for dx in range(3)]
    store_im2col(taps, M2)
    f2 = leaky(conv(M2, w2_ref, b2_ref)).reshape(H2B, W2, C2)
    f2 = zero_outside_image(f2, H2B, t * TH - 1)

    # ---- conv3: 3x3 stride-1 -------------------------------------------------
    pad_ref[0:H2B, 1:W2 + 1, :] = f2.astype(jnp.bfloat16)
    taps = [pad_ref[dy:dy + TH, dx:dx + W2, :].reshape(M3, C2)
            for dy in range(3) for dx in range(3)]
    store_im2col(taps, M3)
    f3 = conv(M3, w3_ref, b3_ref)
    # TODO(synk): the 2x bilinear upsample + sigmoid/tanh epilogue could also be
    #             fused here (EUP is idle); kept in plain JAX to preserve the
    #             reference op order (upsample BEFORE nonlinearities).
    o_ref[...] = f3.reshape(TH, W2, C3).astype(o_ref.dtype)


def _band_vmem_bytes(th, W2):
    band = 2 * (th + 5) * (W2 + 1) * 4 * CIN_PAD * 2     # double-buffered input
    col = (th + 4) * W2 * K_IM2COL * 2
    pad = (th + 4) * (W2 + 2) * G_CH_2X * 2
    out = 2 * th * W2 * C3 * 4                           # double-buffered output
    return band + col + pad + out


def _pick_band_rows(H2, W2, budget=BAND_VMEM_BUDGET):
    th = min(32, H2)
    while th > 1 and _band_vmem_bytes(th, W2) > budget:
        th //= 2
    return max(th, 1)


def conv_offset_pallas(params, aux, *, band_rows=None):
    """Fused conv_offset stack.  aux: (B, H, W, 53) -> (B, H//2, W//2, 96)."""
    B, H, W, Ca = aux.shape
    assert H % 2 == 0 and W % 2 == 0
    H2, W2 = H // 2, W // 2
    TH = band_rows if band_rows is not None else _pick_band_rows(H2, W2)
    TH = max(1, min(TH, H2))
    nb = _cdiv(H2, TH)
    HB = TH + 5                          # S2D rows per band (incl. 3x3 halo)
    W2p = W2 + 1

    # Pad (channels 53->64, 1 px left/right, 5 rows top / halo rows bottom) and
    # space-to-depth pack so every in-kernel conv1 tap is a contiguous slice.
    rtot = 2 * nb * TH + 10
    auxp = jnp.pad(aux, ((0, 0), (5, rtot - 5 - H), (1, 1),
                         (0, CIN_PAD - Ca))).astype(jnp.bfloat16)
    s2d = (auxp.reshape(B, rtot // 2, 2, W2p, 2, CIN_PAD)
           .transpose(0, 1, 3, 2, 4, 5)
           .reshape(B, rtot // 2, W2p, 4 * CIN_PAD))
    # Overlapping row bands (5-row halo) materialized once: ~1.3-1.6x aux bytes
    # in HBM instead of the 9x-expanded im2col of the previous version.
    bands = jnp.stack([s2d[:, t * TH:t * TH + HB] for t in range(nb)], axis=1)

    kernel = functools.partial(_conv_offset_kernel, band_rows=TH, H2=H2, W2=W2)
    out = pl.pallas_call(
        kernel,
        out_shape=jax.ShapeDtypeStruct((B, nb * TH, W2, C3), jnp.float32),
        grid_spec=pltpu.PrefetchScalarGridSpec(
            num_scalar_prefetch=0,
            grid=(B, nb),
            in_specs=[
                pl.BlockSpec((None, None, HB, W2p, 4 * CIN_PAD),
                             lambda b, t: (b, t, 0, 0, 0)),
                pl.BlockSpec((K_IM2COL, G_CH_2X), lambda b, t: (0, 0)),
                pl.BlockSpec((1, G_CH_2X), lambda b, t: (0, 0)),
                pl.BlockSpec((K_IM2COL, G_CH_2X), lambda b, t: (0, 0)),
                pl.BlockSpec((1, G_CH_2X), lambda b, t: (0, 0)),
                pl.BlockSpec((K_IM2COL, C3), lambda b, t: (0, 0)),
                pl.BlockSpec((1, C3), lambda b, t: (0, 0)),
            ],
            out_specs=pl.BlockSpec((None, TH, W2, C3),
                                   lambda b, t: (b, t, 0, 0)),
            scratch_shapes=[
                pltpu.VMEM((TH + 4, W2 + 2, G_CH_2X), jnp.bfloat16),
                pltpu.VMEM(((TH + 4) * W2, K_IM2COL), jnp.bfloat16),
            ],
        ),
        compiler_params=pltpu.CompilerParams(
            dimension_semantics=("parallel", "parallel"),
            vmem_limit_bytes=VMEM_LIMIT_BYTES),
    )(bands, params["w1r"], params["b1"], params["w2r"], params["b2"],
      params["w3r"], params["b3"])
    return out[:, :H2]


# ---------------------------------------------------------------------------
# Pallas kernel 2: grouped 1x1 fusion conv, 8-pixel-packed block-diag matmul
# ---------------------------------------------------------------------------
def _fusion_kernel(x_ref, w_ref, b_ref, o_ref):
    acc = jnp.dot(x_ref[...], w_ref[...], preferred_element_type=jnp.float32)
    o_ref[...] = (acc + b_ref[...]).astype(o_ref.dtype)


def fusion_grouped_1x1_pallas(x_flat, w8, b8, *, tile_rows=1024):
    """Grouped 1x1 conv as one packed matmul: (M, 96) bf16 -> (M, 48) f32.

    8 pixels share one matmul row ((M/8, 768) x (768, 384)) so every output
    store is lane-dense (384 = 3*128); tiled over M with a parallel grid.
    """
    M, cin = x_flat.shape
    P = FUSION_PACK
    k_in, n_out = P * cin, w8.shape[-1]
    rows = _cdiv(M, P)
    tile = min(tile_rows, _round_up(rows, 8))
    rows_pad = _round_up(rows, tile)
    m_pad = rows_pad * P
    if m_pad != M:
        x_flat = jnp.pad(x_flat, ((0, m_pad - M), (0, 0)))
    xp = x_flat.reshape(rows_pad, k_in)
    out = pl.pallas_call(
        _fusion_kernel,
        out_shape=jax.ShapeDtypeStruct((rows_pad, n_out), jnp.float32),
        grid_spec=pltpu.PrefetchScalarGridSpec(
            num_scalar_prefetch=0,
            grid=(rows_pad // tile,),
            in_specs=[
                pl.BlockSpec((tile, k_in), lambda i: (i, 0)),
                pl.BlockSpec((k_in, n_out), lambda i: (0, 0)),
                pl.BlockSpec((1, n_out), lambda i: (0, 0)),
            ],
            out_specs=pl.BlockSpec((tile, n_out), lambda i: (i, 0)),
        ),
        compiler_params=pltpu.CompilerParams(
            dimension_semantics=("parallel",)),
    )(xp, w8, b8)
    return out.reshape(m_pad, n_out // P)[:M]


# ---------------------------------------------------------------------------
# Plain-JAX glue (data movement / elementwise / gather)
# ---------------------------------------------------------------------------
def _upsample2x_axis(u, axis):
    n = u.shape[axis]
    idx_l = jnp.clip(jnp.arange(n) - 1, 0, n - 1)
    idx_r = jnp.clip(jnp.arange(n) + 1, 0, n - 1)
    left = jnp.take(u, idx_l, axis=axis)
    right = jnp.take(u, idx_r, axis=axis)
    even = 0.75 * u + 0.25 * left
    odd = 0.75 * u + 0.25 * right
    out = jnp.stack([even, odd], axis=axis + 1)
    shp = list(u.shape)
    shp[axis] = 2 * n
    return out.reshape(shp)


def bilinear_upsample_2x_nhwc(x):
    """F.interpolate(scale=2, mode='bilinear', align_corners=False), NHWC."""
    return _upsample2x_axis(_upsample2x_axis(x, 1), 2)


def flow_warp(feature, flow):
    """Bilinear backward warp, border padding, align_corners=True (DCVC).

    feature: (N, H, W, C); flow[..., 0]=dx (horizontal), flow[..., 1]=dy.
    """
    # TODO(synk): data-dependent bilinear gather stays in plain JAX; a Pallas
    #             version would need a manual DMA / one-hot-matmul gather.
    N, H, W, C = feature.shape
    gx = jnp.arange(W, dtype=jnp.float32).reshape(1, 1, W)
    gy = jnp.arange(H, dtype=jnp.float32).reshape(1, H, 1)
    sx = jnp.clip(gx + flow[..., 0], 0.0, W - 1.0)
    sy = jnp.clip(gy + flow[..., 1], 0.0, H - 1.0)
    x0 = jnp.floor(sx)
    y0 = jnp.floor(sy)
    wx = (sx - x0)[..., None]
    wy = (sy - y0)[..., None]
    x0i = x0.astype(jnp.int32)
    y0i = y0.astype(jnp.int32)
    x1i = jnp.minimum(x0i + 1, W - 1)
    y1i = jnp.minimum(y0i + 1, H - 1)

    feat_flat = feature.reshape(N, H * W, C)

    def gather(yy, xx):
        idx = (yy * W + xx).reshape(N, H * W, 1)
        g = jnp.take_along_axis(feat_flat,
                                jnp.broadcast_to(idx, feat_flat.shape), axis=1)
        return g.reshape(N, H, W, C)

    v00 = gather(y0i, x0i)
    v01 = gather(y0i, x1i)
    v10 = gather(y1i, x0i)
    v11 = gather(y1i, x1i)
    return ((1 - wy) * ((1 - wx) * v00 + wx * v01)
            + wy * ((1 - wx) * v10 + wx * v11))


# ---------------------------------------------------------------------------
# Parameters (deterministic synthetic init; shapes from the module __init__)
# ---------------------------------------------------------------------------
def init_params(key):
    ks = jax.random.split(key, 8)
    cin_g = IN_CHANNEL * OFFSET_NUM // GROUP_NUM        # 6
    return {
        "w1": jax.random.normal(ks[0], (3, 3, AUX_FEATURE_NUM, G_CH_2X), jnp.float32) * 0.05,
        "b1": jax.random.normal(ks[1], (G_CH_2X,), jnp.float32) * 0.02,
        "w2": jax.random.normal(ks[2], (3, 3, G_CH_2X, G_CH_2X), jnp.float32) * 0.05,
        "b2": jax.random.normal(ks[3], (G_CH_2X,), jnp.float32) * 0.02,
        "w3": jax.random.normal(ks[4], (3, 3, G_CH_2X, C3), jnp.float32) * 0.05,
        "b3": jax.random.normal(ks[5], (C3,), jnp.float32) * 0.02,
        "wf": jax.random.normal(ks[6], (IN_CHANNEL, cin_g), jnp.float32) * 0.1,
        "bf": jax.random.normal(ks[7], (IN_CHANNEL,), jnp.float32) * 0.02,
    }


def _grouped_1x1_to_dense(wg, groups):
    """(Cout, Cin_per_group) grouped 1x1 weight -> block-diagonal (Cin, Cout)."""
    cout, cin_g = wg.shape
    cout_g = cout // groups
    dense = jnp.zeros((cin_g * groups, cout), wg.dtype)
    for g in range(groups):
        blk = wg[g * cout_g:(g + 1) * cout_g, :].T          # (cin_g, cout_g)
        dense = dense.at[g * cin_g:(g + 1) * cin_g,
                         g * cout_g:(g + 1) * cout_g].set(blk)
    return dense


def prepare_params(p):
    """Pack weights into kernel-ready layout (bf16 matmul operands, f32 biases)."""
    w1 = jnp.pad(p["w1"], ((0, 0), (0, 0), (0, CIN_PAD - AUX_FEATURE_NUM), (0, 0)))
    dense = _grouped_1x1_to_dense(p["wf"], GROUP_NUM)            # (96, 48)
    w8 = jnp.kron(jnp.eye(FUSION_PACK, dtype=dense.dtype), dense)  # (768, 384)
    b8 = jnp.tile(p["bf"].reshape(1, -1), (1, FUSION_PACK))       # (1, 384)
    return {
        "w1r": w1.reshape(K_IM2COL, -1).astype(jnp.bfloat16),
        "w2r": p["w2"].reshape(K_IM2COL, -1).astype(jnp.bfloat16),
        "w3r": p["w3"].reshape(K_IM2COL, -1).astype(jnp.bfloat16),
        "b1": p["b1"].reshape(1, -1),
        "b2": p["b2"].reshape(1, -1),
        "b3": p["b3"].reshape(1, -1),
        "wf8": w8.astype(jnp.bfloat16),
        "bf8": b8.astype(jnp.float32),
    }


# ---------------------------------------------------------------------------
# OffsetDiversity forward (NHWC)
# ---------------------------------------------------------------------------
def offset_diversity_forward(params, x, aux_feature, flow, *, band_rows=None):
    """x: (B,H,W,48), aux_feature: (B,H,W,53), flow: (B,H,W,2) -> (B,H,W,48)."""
    B, H, W, C = x.shape
    GO = GROUP_NUM * OFFSET_NUM                     # 32
    cg = C // GROUP_NUM                             # 3

    # conv_offset (fused, banded Pallas kernel) + bilinear 2x upsample
    out = conv_offset_pallas(params, aux_feature, band_rows=band_rows)
    out = bilinear_upsample_2x_nhwc(out)            # (B, H, W, 96)

    # chunk -> o1|o2|mask ; sigmoid / tanh / flow add
    mask = jax.nn.sigmoid(out[..., 2 * GO:])                        # (B,H,W,32)
    offset = (MAX_RESIDUE_MAGNITUDE * jnp.tanh(out[..., :2 * GO])
              + jnp.tile(flow, (1, 1, 1, GO)))                      # (B,H,W,64)

    # NCHW views reproduced in NHWC (exactly matches the reference .view/.repeat)
    offset_i = (offset.reshape(B, H, W, GO, 2)
                .transpose(0, 3, 1, 2, 4).reshape(B * GO, H, W, 2))
    mask_i = (mask.reshape(B, H, W, GO)
              .transpose(0, 3, 1, 2).reshape(B * GO, H, W, 1))
    xg = (x.reshape(B, H, W, GROUP_NUM, cg)
          .transpose(0, 3, 1, 2, 4).reshape(B * GROUP_NUM, H, W, cg))
    xg = jnp.tile(xg, (OFFSET_NUM, 1, 1, 1))                        # (B*32,H,W,3)

    # fold mask multiply + bf16 cast before the layout transposes
    warped = (flow_warp(xg, offset_i) * mask_i).astype(jnp.bfloat16)
    fused_in = (warped.reshape(B, GO, H, W, cg)
                .transpose(0, 2, 3, 1, 4).reshape(B * H * W, GO * cg))

    # grouped 1x1 fusion conv (packed block-diagonal Pallas matmul)
    y = fusion_grouped_1x1_pallas(fused_in, params["wf8"], params["bf8"])
    return y.reshape(B, H, W, C)


# ---------------------------------------------------------------------------
# Plain-JAX reference of the conv_offset stack (for the in-script sanity check)
# ---------------------------------------------------------------------------
def _conv_offset_ref(raw, aux):
    def conv(x, w, b, stride):
        y = lax.conv_general_dilated(
            x, w, (stride, stride), ((1, 1), (1, 1)),
            dimension_numbers=("NHWC", "HWIO", "NHWC"))
        return y + b
    a = conv(aux, raw["w1"], raw["b1"], 2)
    a = jnp.where(a >= 0, a, LRELU_SLOPE * a)
    a = conv(a, raw["w2"], raw["b2"], 1)
    a = jnp.where(a >= 0, a, LRELU_SLOPE * a)
    return conv(a, raw["w3"], raw["b3"], 1)


# ---------------------------------------------------------------------------
if __name__ == "__main__":
    root = jax.random.PRNGKey(0)
    kp, kx, ka, kf, km = jax.random.split(root, 5)

    B, H, W = 2, 16, 16
    raw = init_params(kp)
    params = prepare_params(raw)
    x = jax.random.normal(kx, (B, H, W, IN_CHANNEL), jnp.float32)
    aux = jax.random.normal(ka, (B, H, W, AUX_FEATURE_NUM), jnp.float32)
    flow = jax.random.normal(kf, (B, H, W, 2), jnp.float32) * 2.0

    # --- check 1: banded fused conv stack vs plain-JAX convs (bf16 tolerance).
    #     band_rows=3 exercises halo rows, multiple bands and a ragged last band.
    co = jax.block_until_ready(conv_offset_pallas(params, aux, band_rows=3))
    co_ref = _conv_offset_ref(raw, aux)
    tol = 0.05 * float(jnp.max(jnp.abs(co_ref))) + 0.05
    err = float(jnp.max(jnp.abs(co - co_ref)))
    assert co.shape == co_ref.shape and err < tol, (err, tol)

    # --- check 2: packed grouped-1x1 fusion kernel vs dense f32 matmul.
    xt = jax.random.normal(km, (1000, IN_CHANNEL * OFFSET_NUM), jnp.float32)
    dense = _grouped_1x1_to_dense(raw["wf"], GROUP_NUM)
    fu = jax.block_until_ready(
        fusion_grouped_1x1_pallas(xt.astype(jnp.bfloat16),
                                  params["wf8"], params["bf8"]))
    fu_ref = xt @ dense + raw["bf"].reshape(1, -1)
    tol2 = 0.05 * float(jnp.max(jnp.abs(fu_ref))) + 0.02
    err2 = float(jnp.max(jnp.abs(fu - fu_ref)))
    assert fu.shape == fu_ref.shape and err2 < tol2, (err2, tol2)

    # --- full forward pass.
    fwd = jax.jit(functools.partial(offset_diversity_forward, band_rows=3))
    out = jax.block_until_ready(fwd(params, x, aux, flow))
    assert out.shape == (B, H, W, IN_CHANNEL), out.shape
    assert bool(jnp.all(jnp.isfinite(out)))
    print("KERNEL_OK")
</pallas_src>

<mosaic_0001>
module attributes {stable_mosaic.version = 11 : i64} {
  func.func @_conv_offset_kernel(%arg0: i32, %arg1: i32, %arg2: memref<1x1x8x9x256xbf16, #tpu.memory_space<vmem>>, %arg3: memref<576x64xbf16, #tpu.memory_space<vmem>>, %arg4: memref<1x64xf32, #tpu.memory_space<vmem>>, %arg5: memref<576x64xbf16, #tpu.memory_space<vmem>>, %arg6: memref<1x64xf32, #tpu.memory_space<vmem>>, %arg7: memref<576x96xbf16, #tpu.memory_space<vmem>>, %arg8: memref<1x96xf32, #tpu.memory_space<vmem>>, %arg9: memref<1x3x8x96xf32, #tpu.memory_space<vmem>>, %arg10: memref<7x10x64xbf16, #tpu.memory_space<vmem>>, %arg11: memref<56x576xbf16, #tpu.memory_space<vmem>>) attributes {dimension_semantics = [#tpu.dimension_semantics<parallel>, #tpu.dimension_semantics<parallel>], iteration_bounds = array<i64: 2, 3>, scalar_prefetch = 0 : i64, scratch_operands = 2 : i64, tpu.core_type = #tpu.core_type<tc>, window_params = [{transform_indices = @transform_0, window_bounds = array<i64: 1, 1, 8, 9, 256>}, {pipeline_mode = #tpu.pipeline_mode<synchronous>, transform_indices = @transform_1, window_bounds = array<i64: 576, 64>}, {pipeline_mode = #tpu.pipeline_mode<synchronous>, transform_indices = @transform_2, window_bounds = array<i64: 1, 64>}, {pipeline_mode = #tpu.pipeline_mode<synchronous>, transform_indices = @transform_3, window_bounds = array<i64: 576, 64>}, {pipeline_mode = #tpu.pipeline_mode<synchronous>, transform_indices = @transform_4, window_bounds = array<i64: 1, 64>}, {pipeline_mode = #tpu.pipeline_mode<synchronous>, transform_indices = @transform_5, window_bounds = array<i64: 576, 96>}, {pipeline_mode = #tpu.pipeline_mode<synchronous>, transform_indices = @transform_6, window_bounds = array<i64: 1, 96>}, {transform_indices = @transform_7, window_bounds = array<i64: 1, 3, 8, 96>}]} {
    %c0 = arith.constant 0 : index
    %c0_0 = arith.constant 0 : index
    %c0_1 = arith.constant 0 : index
    %c0_2 = arith.constant 0 : index
    %c0_3 = arith.constant 0 : index
    %0 = vector.load %arg2[%c0, %c0_0, %c0_1, %c0_2, %c0_3] : memref<1x1x8x9x256xbf16, #tpu.memory_space<vmem>>, vector<1x1x7x8x64xbf16>
    %1 = vector.shape_cast %0 : vector<1x1x7x8x64xbf16> to vector<7x8x64xbf16>
    %2 = vector.shape_cast %1 : vector<7x8x64xbf16> to vector<56x64xbf16>
    %c0_4 = arith.constant 0 : index
    %c0_5 = arith.constant 0 : index
    %c0_6 = arith.constant 0 : index
    %c0_7 = arith.constant 0 : index
    %c64 = arith.constant 64 : index
    %3 = vector.load %arg2[%c0_4, %c0_5, %c0_6, %c0_7, %c64] : memref<1x1x8x9x256xbf16, #tpu.memory_space<vmem>>, vector<1x1x7x8x64xbf16>
    %4 = vector.shape_cast %3 : vector<1x1x7x8x64xbf16> to vector<7x8x64xbf16>
    %5 = vector.shape_cast %4 : vector<7x8x64xbf16> to vector<56x64xbf16>
    %c0_8 = arith.constant 0 : index
    %c0_9 = arith.constant 0 : index
    %c0_10 = arith.constant 0 : index
    %c1 = arith.constant 1 : index
    %c0_11 = arith.constant 0 : index
    %6 = vector.load %arg2[%c0_8, %c0_9, %c0_10, %c1, %c0_11] : memref<1x1x8x9x256xbf16, #tpu.memory_space<vmem>>, vector<1x1x7x8x64xbf16>
    %7 = vector.shape_cast %6 : vector<1x1x7x8x64xbf16> to vector<7x8x64xbf16>
    %8 = vector.shape_cast %7 : vector<7x8x64xbf16> to vector<56x64xbf16>
    %c0_12 = arith.constant 0 : index
    %c0_13 = arith.constant 0 : index
    %c0_14 = arith.constant 0 : index
    %c0_15 = arith.constant 0 : index
    %c128 = arith.constant 128 : index
    %9 = vector.load %arg2[%c0_12, %c0_13, %c0_14, %c0_15, %c128] : memref<1x1x8x9x256xbf16, #tpu.memory_space<vmem>>, vector<1x1x7x8x64xbf16>
    %10 = vector.shape_cast %9 : vector<1x1x7x8x64xbf16> to vector<7x8x64xbf16>
    %11 = vector.shape_cast %10 : vector<7x8x64xbf16> to vector<56x64xbf16>
    %c0_16 = arith.constant 0 : index
    %c0_17 = arith.constant 0 : index
    %c0_18 = arith.constant 0 : index
    %c0_19 = arith.constant 0 : index
    %c192 = arith.constant 192 : index
    %12 = vector.load %arg2[%c0_16, %c0_17, %c0_18, %c0_19, %c192] : memref<1x1x8x9x256xbf16, #tpu.memory_space<vmem>>, vector<1x1x7x8x64xbf16>
    %13 = vector.shape_cast %12 : vector<1x1x7x8x64xbf16> to vector<7x8x64xbf16>
    %14 = vector.shape_cast %13 : vector<7x8x64xbf16> to vector<56x64xbf16>
    %c0_20 = arith.constant 0 : index
    %c0_21 = arith.constant 0 : index
    %c0_22 = arith.constant 0 : index
    %c1_23 = arith.constant 1 : index
    %c128_24 = arith.constant 128 : index
    %15 = vector.load %arg2[%c0_20, %c0_21, %c0_22, %c1_23, %c128_24] : memref<1x1x8x9x256xbf16, #tpu.memory_space<vmem>>, vector<1x1x7x8x64xbf16>
    %16 = vector.shape_cast %15 : vector<1x1x7x8x64xbf16> to vector<7x8x64xbf16>
    %17 = vector.shape_cast %16 : vector<7x8x64xbf16> to vector<56x64xbf16>
    %c0_25 = arith.constant 0 : index
    %c0_26 = arith.constant 0 : index
    %c1_27 = arith.constant 1 : index
    %c0_28 = arith.constant 0 : index
    %c0_29 = arith.constant 0 : index
    %18 = vector.load %arg2[%c0_25, %c0_26, %c1_27, %c0_28, %c0_29] : memref<1x1x8x9x256xbf16, #tpu.memory_space<vmem>>, vector<1x1x7x8x64xbf16>
    %19 = vector.shape_cast %18 : vector<1x1x7x8x64xbf16> to vector<7x8x64xbf16>
    %20 = vector.shape_cast %19 : vector<7x8x64xbf16> to vector<56x64xbf16>
    %c0_30 = arith.constant 0 : index
    %c0_31 = arith.constant 0 : index
    %c1_32 = arith.constant 1 : index
    %c0_33 = arith.constant 0 : index
    %c64_34 = arith.constant 64 : index
    %21 = vector.load %arg2[%c0_30, %c0_31, %c1_32, %c0_33, %c64_34] : memref<1x1x8x9x256xbf16, #tpu.memory_space<vmem>>, vector<1x1x7x8x64xbf16>
    %22 = vector.shape_cast %21 : vector<1x1x7x8x64xbf16> to vector<7x8x64xbf16>
    %23 = vector.shape_cast %22 : vector<7x8x64xbf16> to vector<56x64xbf16>
    %c0_35 = arith.constant 0 : index
    %c0_36 = arith.constant 0 : index
    %c1_37 = arith.constant 1 : index
    %c1_38 = arith.constant 1 : index
    %c0_39 = arith.constant 0 : index
    %24 = vector.load %arg2[%c0_35, %c0_36, %c1_37, %c1_38, %c0_39] : memref<1x1x8x9x256xbf16, #tpu.memory_space<vmem>>, vector<1x1x7x8x64xbf16>
    %25 = vector.shape_cast %24 : vector<1x1x7x8x64xbf16> to vector<7x8x64xbf16>
    %26 = vector.shape_cast %25 : vector<7x8x64xbf16> to vector<56x64xbf16>
    %27 = tpu.concatenate %2, %5 in 1 : vector<56x64xbf16>, vector<56x64xbf16> -> vector<56x128xbf16>
    %c0_40 = arith.constant 0 : index
    %c0_41 = arith.constant 0 : index
    %28 = vector.load %arg11[%c0_40, %c0_41] : memref<56x576xbf16, #tpu.memory_space<vmem>>, vector<56x128xbf16>
    tpu.vector_store %arg11[%c0_40, %c0_41], %27 {strides = array<i32>} : memref<56x576xbf16, #tpu.memory_space<vmem>>, vector<56x128xbf16>,
    %29 = tpu.concatenate %8, %11 in 1 : vector<56x64xbf16>, vector<56x64xbf16> -> vector<56x128xbf16>
    %c0_42 = arith.constant 0 : index
    %c128_43 = arith.constant 128 : index
    %30 = vector.load %arg11[%c0_42, %c128_43] : memref<56x576xbf16, #tpu.memory_space<vmem>>, vector<56x128xbf16>
    tpu.vector_store %arg11[%c0_42, %c128_43], %29 {strides = array<i32>} : memref<56x576xbf16, #tpu.memory_space<vmem>>, vector<56x128xbf16>,
    %31 = tpu.concatenate %14, %17 in 1 : vector<56x64xbf16>, vector<56x64xbf16> -> vector<56x128xbf16>
    %c0_44 = arith.constant 0 : index
    %c256 = arith.constant 256 : index
    %32 = vector.load %arg11[%c0_44, %c256] : memref<56x576xbf16, #tpu.memory_space<vmem>>, vector<56x128xbf16>
    tpu.vector_store %arg11[%c0_44, %c256], %31 {strides = array<i32>} : memref<56x576xbf16, #tpu.memory_space<vmem>>, vector<56x128xbf16>,
    %33 = tpu.concatenate %20, %23 in 1 : vector<56x64xbf16>, vector<56x64xbf16> -> vector<56x128xbf16>
    %c0_45 = arith.constant 0 : index
    %c384 = arith.constant 384 : index
    %34 = vector.load %arg11[%c0_45, %c384] : memref<56x576xbf16, #tpu.memory_space<vmem>>, vector<56x128xbf16>
    tpu.vector_store %arg11[%c0_45, %c384], %33 {strides = array<i32>} : memref<56x576xbf16, #tpu.memory_space<vmem>>, vector<56x128xbf16>,
    %c0_46 = arith.constant 0 : index
    %c512 = arith.constant 512 : index
    %35 = vector.load %arg11[%c0_46, %c512] : memref<56x576xbf16, #tpu.memory_space<vmem>>, vector<56x64xbf16>
    tpu.vector_store %arg11[%c0_46, %c512], %26 {strides = array<i32>} : memref<56x576xbf16, #tpu.memory_space<vmem>>, vector<56x64xbf16>,
    %c0_47 = arith.constant 0 : index
    %c0_48 = arith.constant 0 : index
    %36 = vector.load %arg11[%c0_47, %c0_48] : memref<56x576xbf16, #tpu.memory_space<vmem>>, vector<56x576xbf16>
    %c0_49 = arith.constant 0 : index
    %c0_50 = arith.constant 0 : index
    %37 = vector.load %arg3[%c0_49, %c0_50] : memref<576x64xbf16, #tpu.memory_space<vmem>>, vector<576x64xbf16>
    %cst = arith.constant dense<0.000000e+00> : vector<56x64xf32>
    %38 = tpu.matmul %36, %37, %cst {dimension_numbers = #tpu.dot_dimension_numbers<[1], [0], [0], [1], [0, 0, 1, 1], [], []>} : vector<56x576xbf16>, vector<576x64xbf16>, vector<56x64xf32> -> vector<56x64xf32>
    %c0_51 = arith.constant 0 : index
    %c0_52 = arith.constant 0 : index
    %39 = vector.load %arg4[%c0_51, %c0_52] : memref<1x64xf32, #tpu.memory_space<vmem>>, vector<1x64xf32>
    %40 = vector.broadcast %39 : vector<1x64xf32> to vector<56x64xf32>
    %41 = arith.addf %38, %40 : vector<56x64xf32>
    %cst_53 = arith.constant 0.000000e+00 : f32
    %42 = vector.broadcast %cst_53 : f32 to vector<56x64xf32>
    %43 = arith.cmpf oge, %41, %42 : vector<56x64xf32>
    %cst_54 = arith.constant 1.000000e-01 : f32
    %44 = vector.broadcast %cst_54 : f32 to vector<56x64xf32>
    %45 = arith.mulf %44, %41 : vector<56x64xf32>
    %46 = arith.select %43, %41, %45 : vector<56x64xi1>, vector<56x64xf32>
    %47 = vector.shape_cast %46 : vector<56x64xf32> to vector<7x8x64xf32>
    %c3_i32 = arith.constant 3 : i32
    %48 = arith.muli %arg1, %c3_i32 : i32
    %c2_i32 = arith.constant 2 : i32
    %49 = arith.subi %48, %c2_i32 : i32
    %50 = tpu.iota {dimensions = array<i32: 0>} : vector<7x1x1xi32>
    %51 = vector.broadcast %49 : i32 to vector<7x1x1xi32>
    %52 = arith.addi %51, %50 : vector<7x1x1xi32>
    %c0_i32 = arith.constant 0 : i32
    %53 = vector.broadcast %c0_i32 : i32 to vector<7x1x1xi32>
    %54 = arith.cmpi sge, %52, %53 : vector<7x1x1xi32>
    %c8_i32 = arith.constant 8 : i32
    %55 = vector.broadcast %c8_i32 : i32 to vector<7x1x1xi32>
    %56 = arith.cmpi slt, %52, %55 : vector<7x1x1xi32>
    %57 = arith.andi %54, %56 : vector<7x1x1xi1>
    %cst_55 = arith.constant 0.000000e+00 : f32
    %58 = vector.shape_cast %57 : vector<7x1x1xi1> to vector<7x1x1xi1>
    %59 = vector.broadcast %58 : vector<7x1x1xi1> to vector<7x8x64xi1>
    %60 = vector.broadcast %cst_55 : f32 to vector<7x8x64xf32>
    %61 = arith.select %59, %47, %60 : vector<7x8x64xi1>, vector<7x8x64xf32>
    %cst_56 = arith.constant 0.000000e+00 : bf16
    %62 = vector.broadcast %cst_56 : bf16 to vector<7x1x64xbf16>
    %c0_57 = arith.constant 0 : index
    %c0_58 = arith.constant 0 : index
    %c0_59 = arith.constant 0 : index
    %63 = vector.load %arg10[%c0_57, %c0_58, %c0_59] : memref<7x10x64xbf16, #tpu.memory_space<vmem>>, vector<7x1x64xbf16>
    tpu.vector_store %arg10[%c0_57, %c0_58, %c0_59], %62 {strides = array<i32>} : memref<7x10x64xbf16, #tpu.memory_space<vmem>>, vector<7x1x64xbf16>,
    %c0_60 = arith.constant 0 : index
    %c9 = arith.constant 9 : index
    %c0_61 = arith.constant 0 : index
    %64 = vector.load %arg10[%c0_60, %c9, %c0_61] : memref<7x10x64xbf16, #tpu.memory_space<vmem>>, vector<7x1x64xbf16>
    tpu.vector_store %arg10[%c0_60, %c9, %c0_61], %62 {strides = array<i32>} : memref<7x10x64xbf16, #tpu.memory_space<vmem>>, vector<7x1x64xbf16>,
    %65 = arith.truncf %61 : vector<7x8x64xf32> to vector<7x8x64xbf16>
    %c0_62 = arith.constant 0 : index
    %c1_63 = arith.constant 1 : index
    %c0_64 = arith.constant 0 : index
    %66 = vector.load %arg10[%c0_62, %c1_63, %c0_64] : memref<7x10x64xbf16, #tpu.memory_space<vmem>>, vector<7x8x64xbf16>
    tpu.vector_store %arg10[%c0_62, %c1_63, %c0_64], %65 {strides = array<i32>} : memref<7x10x64xbf16, #tpu.memory_space<vmem>>, vector<7x8x64xbf16>,
    %c0_65 = arith.constant 0 : index
    %c0_66 = arith.constant 0 : index
    %c0_67 = arith.constant 0 : index
    %67 = vector.load %arg10[%c0_65, %c0_66, %c0_67] : memref<7x10x64xbf16, #tpu.memory_space<vmem>>, vector<5x8x64xbf16>
    %68 = vector.shape_cast %67 : vector<5x8x64xbf16> to vector<40x64xbf16>
    %c0_68 = arith.constant 0 : index
    %c1_69 = arith.constant 1 : index
    %c0_70 = arith.constant 0 : index
    %69 = vector.load %arg10[%c0_68, %c1_69, %c0_70] : memref<7x10x64xbf16, #tpu.memory_space<vmem>>, vector<5x8x64xbf16>
    %70 = vector.shape_cast %69 : vector<5x8x64xbf16> to vector<40x64xbf16>
    %c0_71 = arith.constant 0 : index
    %c2 = arith.constant 2 : index
    %c0_72 = arith.constant 0 : index
    %71 = vector.load %arg10[%c0_71, %c2, %c0_72] : memref<7x10x64xbf16, #tpu.memory_space<vmem>>, vector<5x8x64xbf16>
    %72 = vector.shape_cast %71 : vector<5x8x64xbf16> to vector<40x64xbf16>
    %c1_73 = arith.constant 1 : index
    %c0_74 = arith.constant 0 : index
    %c0_75 = arith.constant 0 : index
    %73 = vector.load %arg10[%c1_73, %c0_74, %c0_75] : memref<7x10x64xbf16, #tpu.memory_space<vmem>>, vector<5x8x64xbf16>
    %74 = vector.shape_cast %73 : vector<5x8x64xbf16> to vector<40x64xbf16>
    %c1_76 = arith.constant 1 : index
    %c1_77 = arith.constant 1 : index
    %c0_78 = arith.constant 0 : index
    %75 = vector.load %arg10[%c1_76, %c1_77, %c0_78] : memref<7x10x64xbf16, #tpu.memory_space<vmem>>, vector<5x8x64xbf16>
    %76 = vector.shape_cast %75 : vector<5x8x64xbf16> to vector<40x64xbf16>
    %c1_79 = arith.constant 1 : index
    %c2_80 = arith.constant 2 : index
    %c0_81 = arith.constant 0 : index
    %77 = vector.load %arg10[%c1_79, %c2_80, %c0_81] : memref<7x10x64xbf16, #tpu.memory_space<vmem>>, vector<5x8x64xbf16>
    %78 = vector.shape_cast %77 : vector<5x8x64xbf16> to vector<40x64xbf16>
    %c2_82 = arith.constant 2 : index
    %c0_83 = arith.constant 0 : index
    %c0_84 = arith.constant 0 : index
    %79 = vector.load %arg10[%c2_82, %c0_83, %c0_84] : memref<7x10x64xbf16, #tpu.memory_space<vmem>>, vector<5x8x64xbf16>
    %80 = vector.shape_cast %79 : vector<5x8x64xbf16> to vector<40x64xbf16>
    %c2_85 = arith.constant 2 : index
    %c1_86 = arith.constant 1 : index
    %c0_87 = arith.constant 0 : index
    %81 = vector.load %arg10[%c2_85, %c1_86, %c0_87] : memref<7x10x64xbf16, #tpu.memory_space<vmem>>, vector<5x8x64xbf16>
    %82 = vector.shape_cast %81 : vector<5x8x64xbf16> to vector<40x64xbf16>
    %c2_88 = arith.constant 2 : index
    %c2_89 = arith.constant 2 : index
    %c0_90 = arith.constant 0 : index
    %83 = vector.load %arg10[%c2_88, %c2_89, %c0_90] : memref<7x10x64xbf16, #tpu.memory_space<vmem>>, vector<5x8x64xbf16>
    %84 = vector.shape_cast %83 : vector<5x8x64xbf16> to vector<40x64xbf16>
    %85 = tpu.concatenate %68, %70 in 1 : vector<40x64xbf16>, vector<40x64xbf16> -> vector<40x128xbf16>
    %c0_91 = arith.constant 0 : index
    %c0_92 = arith.constant 0 : index
    %86 = vector.load %arg11[%c0_91, %c0_92] : memref<56x576xbf16, #tpu.memory_space<vmem>>, vector<40x128xbf16>
    tpu.vector_store %arg11[%c0_91, %c0_92], %85 {strides = array<i32>} : memref<56x576xbf16, #tpu.memory_space<vmem>>, vector<40x128xbf16>,
    %87 = tpu.concatenate %72, %74 in 1 : vector<40x64xbf16>, vector<40x64xbf16> -> vector<40x128xbf16>
    %c0_93 = arith.constant 0 : index
    %c128_94 = arith.constant 128 : index
    %88 = vector.load %arg11[%c0_93, %c128_94] : memref<56x576xbf16, #tpu.memory_space<vmem>>, vector<40x128xbf16>
    tpu.vector_store %arg11[%c0_93, %c128_94], %87 {strides = array<i32>} : memref<56x576xbf16, #tpu.memory_space<vmem>>, vector<40x128xbf16>,
    %89 = tpu.concatenate %76, %78 in 1 : vector<40x64xbf16>, vector<40x64xbf16> -> vector<40x128xbf16>
    %c0_95 = arith.constant 0 : index
    %c256_96 = arith.constant 256 : index
    %90 = vector.load %arg11[%c0_95, %c256_96] : memref<56x576xbf16, #tpu.memory_space<vmem>>, vector<40x128xbf16>
    tpu.vector_store %arg11[%c0_95, %c256_96], %89 {strides = array<i32>} : memref<56x576xbf16, #tpu.memory_space<vmem>>, vector<40x128xbf16>,
    %91 = tpu.concatenate %80, %82 in 1 : vector<40x64xbf16>, vector<40x64xbf16> -> vector<40x128xbf16>
    %c0_97 = arith.constant 0 : index
    %c384_98 = arith.constant 384 : index
    %92 = vector.load %arg11[%c0_97, %c384_98] : memref<56x576xbf16, #tpu.memory_space<vmem>>, vector<40x128xbf16>
    tpu.vector_store %arg11[%c0_97, %c384_98], %91 {strides = array<i32>} : memref<56x576xbf16, #tpu.memory_space<vmem>>, vector<40x128xbf16>,
    %c0_99 = arith.constant 0 : index
    %c512_100 = arith.constant 512 : index
    %93 = vector.load %arg11[%c0_99, %c512_100] : memref<56x576xbf16, #tpu.memory_space<vmem>>, vector<40x64xbf16>
    tpu.vector_store %arg11[%c0_99, %c512_100], %84 {strides = array<i32>} : memref<56x576xbf16, #tpu.memory_space<vmem>>, vector<40x64xbf16>,
    %c0_101 = arith.constant 0 : index
    %c0_102 = arith.constant 0 : index
    %94 = vector.load %arg11[%c0_101, %c0_102] : memref<56x576xbf16, #tpu.memory_space<vmem>>, vector<40x576xbf16>
    %c0_103 = arith.constant 0 : index
    %c0_104 = arith.constant 0 : index
    %95 = vector.load %arg5[%c0_103, %c0_104] : memref<576x64xbf16, #tpu.memory_space<vmem>>, vector<576x64xbf16>
    %cst_105 = arith.constant dense<0.000000e+00> : vector<40x64xf32>
    %96 = tpu.matmul %94, %95, %cst_105 {dimension_numbers = #tpu.dot_dimension_numbers<[1], [0], [0], [1], [0, 0, 1, 1], [], []>} : vector<40x576xbf16>, vector<576x64xbf16>, vector<40x64xf32> -> vector<40x64xf32>
    %c0_106 = arith.constant 0 : index
    %c0_107 = arith.constant 0 : index
    %97 = vector.load %arg6[%c0_106, %c0_107] : memref<1x64xf32, #tpu.memory_space<vmem>>, vector<1x64xf32>
    %98 = vector.broadcast %97 : vector<1x64xf32> to vector<40x64xf32>
    %99 = arith.addf %96, %98 : vector<40x64xf32>
    %cst_108 = arith.constant 0.000000e+00 : f32
    %100 = vector.broadcast %cst_108 : f32 to vector<40x64xf32>
    %101 = arith.cmpf oge, %99, %100 : vector<40x64xf32>
    %cst_109 = arith.constant 1.000000e-01 : f32
    %102 = vector.broadcast %cst_109 : f32 to vector<40x64xf32>
    %103 = arith.mulf %102, %99 : vector<40x64xf32>
    %104 = arith.select %101, %99, %103 : vector<40x64xi1>, vector<40x64xf32>
    %105 = vector.shape_cast %104 : vector<40x64xf32> to vector<5x8x64xf32>
    %c3_i32_110 = arith.constant 3 : i32
    %106 = arith.muli %arg1, %c3_i32_110 : i32
    %c1_i32 = arith.constant 1 : i32
    %107 = arith.subi %106, %c1_i32 : i32
    %108 = tpu.iota {dimensions = array<i32: 0>} : vector<5x1x1xi32>
    %109 = vector.broadcast %107 : i32 to vector<5x1x1xi32>
    %110 = arith.addi %109, %108 : vector<5x1x1xi32>
    %c0_i32_111 = arith.constant 0 : i32
    %111 = vector.broadcast %c0_i32_111 : i32 to vector<5x1x1xi32>
    %112 = arith.cmpi sge, %110, %111 : vector<5x1x1xi32>
    %c8_i32_112 = arith.constant 8 : i32
    %113 = vector.broadcast %c8_i32_112 : i32 to vector<5x1x1xi32>
    %114 = arith.cmpi slt, %110, %113 : vector<5x1x1xi32>
    %115 = arith.andi %112, %114 : vector<5x1x1xi1>
    %cst_113 = arith.constant 0.000000e+00 : f32
    %116 = vector.shape_cast %115 : vector<5x1x1xi1> to vector<5x1x1xi1>
    %117 = vector.broadcast %116 : vector<5x1x1xi1> to vector<5x8x64xi1>
    %118 = vector.broadcast %cst_113 : f32 to vector<5x8x64xf32>
    %119 = arith.select %117, %105, %118 : vector<5x8x64xi1>, vector<5x8x64xf32>
    %120 = arith.truncf %119 : vector<5x8x64xf32> to vector<5x8x64xbf16>
    %c0_114 = arith.constant 0 : index
    %c1_115 = arith.constant 1 : index
    %c0_116 = arith.constant 0 : index
    %121 = vector.load %arg10[%c0_114, %c1_115, %c0_116] : memref<7x10x64xbf16, #tpu.memory_space<vmem>>, vector<5x8x64xbf16>
    tpu.vector_store %arg10[%c0_114, %c1_115, %c0_116], %120 {strides = array<i32>} : memref<7x10x64xbf16, #tpu.memory_space<vmem>>, vector<5x8x64xbf16>,
    %c0_117 = arith.constant 0 : index
    %c0_118 = arith.constant 0 : index
    %c0_119 = arith.constant 0 : index
    %122 = vector.load %arg10[%c0_117, %c0_118, %c0_119] : memref<7x10x64xbf16, #tpu.memory_space<vmem>>, vector<3x8x64xbf16>
    %123 = vector.shape_cast %122 : vector<3x8x64xbf16> to vector<24x64xbf16>
    %c0_120 = arith.constant 0 : index
    %c1_121 = arith.constant 1 : index
    %c0_122 = arith.constant 0 : index
    %124 = vector.load %arg10[%c0_120, %c1_121, %c0_122] : memref<7x10x64xbf16, #tpu.memory_space<vmem>>, vector<3x8x64xbf16>
    %125 = vector.shape_cast %124 : vector<3x8x64xbf16> to vector<24x64xbf16>
    %c0_123 = arith.constant 0 : index
    %c2_124 = arith.constant 2 : index
    %c0_125 = arith.constant 0 : index
    %126 = vector.load %arg10[%c0_123, %c2_124, %c0_125] : memref<7x10x64xbf16, #tpu.memory_space<vmem>>, vector<3x8x64xbf16>
    %127 = vector.shape_cast %126 : vector<3x8x64xbf16> to vector<24x64xbf16>
    %c1_126 = arith.constant 1 : index
    %c0_127 = arith.constant 0 : index
    %c0_128 = arith.constant 0 : index
    %128 = vector.load %arg10[%c1_126, %c0_127, %c0_128] : memref<7x10x64xbf16, #tpu.memory_space<vmem>>, vector<3x8x64xbf16>
    %129 = vector.shape_cast %128 : vector<3x8x64xbf16> to vector<24x64xbf16>
    %c1_129 = arith.constant 1 : index
    %c1_130 = arith.constant 1 : index
    %c0_131 = arith.constant 0 : index
    %130 = vector.load %arg10[%c1_129, %c1_130, %c0_131] : memref<7x10x64xbf16, #tpu.memory_space<vmem>>, vector<3x8x64xbf16>
    %131 = vector.shape_cast %130 : vector<3x8x64xbf16> to vector<24x64xbf16>
    %c1_132 = arith.constant 1 : index
    %c2_133 = arith.constant 2 : index
    %c0_134 = arith.constant 0 : index
    %132 = vector.load %arg10[%c1_132, %c2_133, %c0_134] : memref<7x10x64xbf16, #tpu.memory_space<vmem>>, vector<3x8x64xbf16>
    %133 = vector.shape_cast %132 : vector<3x8x64xbf16> to vector<24x64xbf16>
    %c2_135 = arith.constant 2 : index
    %c0_136 = arith.constant 0 : index
    %c0_137 = arith.constant 0 : index
    %134 = vector.load %arg10[%c2_135, %c0_136, %c0_137] : memref<7x10x64xbf16, #tpu.memory_space<vmem>>, vector<3x8x64xbf16>
    %135 = vector.shape_cast %134 : vector<3x8x64xbf16> to vector<24x64xbf16>
    %c2_138 = arith.constant 2 : index
    %c1_139 = arith.constant 1 : index
    %c0_140 = arith.constant 0 : index
    %136 = vector.load %arg10[%c2_138, %c1_139, %c0_140] : memref<7x10x64xbf16, #tpu.memory_space<vmem>>, vector<3x8x64xbf16>
    %137 = vector.shape_cast %136 : vector<3x8x64xbf16> to vector<24x64xbf16>
    %c2_141 = arith.constant 2 : index
    %c2_142 = arith.constant 2 : index
    %c0_143 = arith.constant 0 : index
    %138 = vector.load %arg10[%c2_141, %c2_142, %c0_143] : memref<7x10x64xbf16, #tpu.memory_space<vmem>>, vector<3x8x64xbf16>
    %139 = vector.shape_cast %138 : vector<3x8x64xbf16> to vector<24x64xbf16>
    %140 = tpu.concatenate %123, %125 in 1 : vector<24x64xbf16>, vector<24x64xbf16> -> vector<24x128xbf16>
    %c0_144 = arith.constant 0 : index
    %c0_145 = arith.constant 0 : index
    %141 = vector.load %arg11[%c0_144, %c0_145] : memref<56x576xbf16, #tpu.memory_space<vmem>>, vector<24x128xbf16>
    tpu.vector_store %arg11[%c0_144, %c0_145], %140 {strides = array<i32>} : memref<56x576xbf16, #tpu.memory_space<vmem>>, vector<24x128xbf16>,
    %142 = tpu.concatenate %127, %129 in 1 : vector<24x64xbf16>, vector<24x64xbf16> -> vector<24x128xbf16>
    %c0_146 = arith.constant 0 : index
    %c128_147 = arith.constant 128 : index
    %143 = vector.load %arg11[%c0_146, %c128_147] : memref<56x576xbf16, #tpu.memory_space<vmem>>, vector<24x128xbf16>
    tpu.vector_store %arg11[%c0_146, %c128_147], %142 {strides = array<i32>} : memref<56x576xbf16, #tpu.memory_space<vmem>>, vector<24x128xbf16>,
    %144 = tpu.concatenate %131, %133 in 1 : vector<24x64xbf16>, vector<24x64xbf16> -> vector<24x128xbf16>
    %c0_148 = arith.constant 0 : index
    %c256_149 = arith.constant 256 : index
    %145 = vector.load %arg11[%c0_148, %c256_149] : memref<56x576xbf16, #tpu.memory_space<vmem>>, vector<24x128xbf16>
    tpu.vector_store %arg11[%c0_148, %c256_149], %144 {strides = array<i32>} : memref<56x576xbf16, #tpu.memory_space<vmem>>, vector<24x128xbf16>,
    %146 = tpu.concatenate %135, %137 in 1 : vector<24x64xbf16>, vector<24x64xbf16> -> vector<24x128xbf16>
    %c0_150 = arith.constant 0 : index
    %c384_151 = arith.constant 384 : index
    %147 = vector.load %arg11[%c0_150, %c384_151] : memref<56x576xbf16, #tpu.memory_space<vmem>>, vector<24x128xbf16>
    tpu.vector_store %arg11[%c0_150, %c384_151], %146 {strides = array<i32>} : memref<56x576xbf16, #tpu.memory_space<vmem>>, vector<24x128xbf16>,
    %c0_152 = arith.constant 0 : index
    %c512_153 = arith.constant 512 : index
    %148 = vector.load %arg11[%c0_152, %c512_153] : memref<56x576xbf16, #tpu.memory_space<vmem>>, vector<24x64xbf16>
    tpu.vector_store %arg11[%c0_152, %c512_153], %139 {strides = array<i32>} : memref<56x576xbf16, #tpu.memory_space<vmem>>, vector<24x64xbf16>,
    %c0_154 = arith.constant 0 : index
    %c0_155 = arith.constant 0 : index
    %149 = vector.load %arg11[%c0_154, %c0_155] : memref<56x576xbf16, #tpu.memory_space<vmem>>, vector<24x576xbf16>
    %c0_156 = arith.constant 0 : index
    %c0_157 = arith.constant 0 : index
    %150 = vector.load %arg7[%c0_156, %c0_157] : memref<576x96xbf16, #tpu.memory_space<vmem>>, vector<576x96xbf16>
    %cst_158 = arith.constant dense<0.000000e+00> : vector<24x96xf32>
    %151 = tpu.matmul %149, %150, %cst_158 {dimension_numbers = #tpu.dot_dimension_numbers<[1], [0], [0], [1], [0, 0, 1, 1], [], []>} : vector<24x576xbf16>, vector<576x96xbf16>, vector<24x96xf32> -> vector<24x96xf32>
    %c0_159 = arith.constant 0 : index
    %c0_160 = arith.constant 0 : index
    %152 = vector.load %arg8[%c0_159, %c0_160] : memref<1x96xf32, #tpu.memory_space<vmem>>, vector<1x96xf32>
    %153 = vector.broadcast %152 : vector<1x96xf32> to vector<24x96xf32>
    %154 = arith.addf %151, %153 : vector<24x96xf32>
    %155 = vector.shape_cast %154 : vector<24x96xf32> to vector<3x8x96xf32>
    %c0_161 = arith.constant 0 : index
    %c0_162 = arith.constant 0 : index
    %c0_163 = arith.constant 0 : index
    %c0_164 = arith.constant 0 : index
    %156 = vector.load %arg9[%c0_161, %c0_162, %c0_163, %c0_164] : memref<1x3x8x96xf32, #tpu.memory_space<vmem>>, vector<1x3x8x96xf32>
    %157 = vector.shape_cast %156 : vector<1x3x8x96xf32> to vector<3x8x96xf32>
    %158 = vector.shape_cast %155 : vector<3x8x96xf32> to vector<1x3x8x96xf32>
    tpu.vector_store %arg9[%c0_161, %c0_162, %c0_163, %c0_164], %158 {strides = array<i32>} : memref<1x3x8x96xf32, #tpu.memory_space<vmem>>, vector<1x3x8x96xf32>,
    return
  }
  func.func @transform_0(%arg0: i32, %arg1: i32) -> (i32, i32, i32, i32, i32) {
    %c0_i32 = arith.constant 0 : i32
    %c0_i32_0 = arith.constant 0 : i32
    %c0_i32_1 = arith.constant 0 : i32
    %c0_i32_2 = arith.constant 0 : i32
    return %arg0, %arg1, %c0_i32, %c0_i32_0, %c0_i32_1 : i32, i32, i32, i32, i32
  }
  func.func @transform_1(%arg0: i32, %arg1: i32) -> (i32, i32) {
    %c0_i32 = arith.constant 0 : i32
    %c0_i32_0 = arith.constant 0 : i32
    %c0_i32_1 = arith.constant 0 : i32
    return %c0_i32, %c0_i32_0 : i32, i32
  }
  func.func @transform_2(%arg0: i32, %arg1: i32) -> (i32, i32) {
    %c0_i32 = arith.constant 0 : i32
    %c0_i32_0 = arith.constant 0 : i32
    %c0_i32_1 = arith.constant 0 : i32
    return %c0_i32, %c0_i32_0 : i32, i32
  }
  func.func @transform_3(%arg0: i32, %arg1: i32) -> (i32, i32) {
    %c0_i32 = arith.constant 0 : i32
    %c0_i32_0 = arith.constant 0 : i32
    %c0_i32_1 = arith.constant 0 : i32
    return %c0_i32, %c0_i32_0 : i32, i32
  }
  func.func @transform_4(%arg0: i32, %arg1: i32) -> (i32, i32) {
    %c0_i32 = arith.constant 0 : i32
    %c0_i32_0 = arith.constant 0 : i32
    %c0_i32_1 = arith.constant 0 : i32
    return %c0_i32, %c0_i32_0 : i32, i32
  }
  func.func @transform_5(%arg0: i32, %arg1: i32) -> (i32, i32) {
    %c0_i32 = arith.constant 0 : i32
    %c0_i32_0 = arith.constant 0 : i32
    %c0_i32_1 = arith.constant 0 : i32
    return %c0_i32, %c0_i32_0 : i32, i32
  }
  func.func @transform_6(%arg0: i32, %arg1: i32) -> (i32, i32) {
    %c0_i32 = arith.constant 0 : i32
    %c0_i32_0 = arith.constant 0 : i32
    %c0_i32_1 = arith.constant 0 : i32
    return %c0_i32, %c0_i32_0 : i32, i32
  }
  func.func @transform_7(%arg0: i32, %arg1: i32) -> (i32, i32, i32, i32) {
    %c0_i32 = arith.constant 0 : i32
    %c0_i32_0 = arith.constant 0 : i32
    %c0_i32_1 = arith.constant 0 : i32
    return %arg0, %arg1, %c0_i32, %c0_i32_0 : i32, i32, i32, i32
  }
}

</mosaic_0001>

<bundles_post_ra>
// kernel: tpu_custom_call.1
= control target key start
LH: loop header
LB: loop body
LE: loop exit
PB: predicated region body
PF: predicated region fallthrough
CT: control target
= control target key end

     0   :  { %12 = vsyncpa [#allocation5], 0  ;;  %s6285_s0 = inlined_call_operand.vmem [shape: bf16[2,3,8,9,256], index: 0, kind: input, shape index: {}]   ;;  %s6286_s1 = inlined_call_operand.vmem [shape: bf16[576,64], index: 1, kind: input, shape index: {}]   ;;  %s6287_s2 = inlined_call_operand.vmem [shape: f32[1,64], index: 2, kind: input, shape index: {}]   ;;  %s6288_s3 = inlined_call_operand.vmem [shape: bf16[576,64], index: 3, kind: input, shape index: {}]   ;;  %s6289_s4 = inlined_call_operand.vmem [shape: f32[1,64], index: 4, kind: input, shape index: {}]   ;;  %s6290_s5 = inlined_call_operand.vmem [shape: bf16[576,96], index: 5, kind: input, shape index: {}]   ;;  %s6291_s6 = inlined_call_operand.vmem [shape: f32[1,96], index: 6, kind: input, shape index: {}]   ;;  %s6292_s7 = inlined_call_operand.hbm [shape: f32[2,9,8,96], index: 7, kind: output, shape index: {}]  }
   0x1   :  { %14 = vsyncpa [#allocation5 + $0x1], 0  ;;  %s5093_s24 = smov 0   ;;  %s5095_s25 = smov 0  }
   0x2   :  { %s5097_s26 = smov 0   ;;  %s5099_s27 = smov 0  }
   0x3   :  { %s5101_s28 = smov 0   ;;  %s5103_s29 = smov 0  }
   0x4   :  { %s5105_s30 = smov 0   ;;  %s5107_s8 = smov 0  }
   0x5 LB: > { %6300 = sst [smem:[#allocation7_spill]] %s5037_s29  ;;  %s4039_s9 = sadd.s32 4294967295, %s5045_s8   ;;  %s5045_s8 = sphi %s5107_s8, %s20_s8   ;;  %s5041_s30 = sphi %s5105_s30, %s6368_s30   ;;  %s5037_s29 = sphi %s5103_s29, %s6367_s29   ;;  %s5033_s28 = sphi %s5101_s28, %s6366_s28   ;;  %s5029_s27 = sphi %s5099_s27, %s6365_s27   ;;  %s5025_s26 = sphi %s5097_s26, %s6371_s26   ;;  %s5021_s25 = sphi %s5095_s25, %s6370_s25   ;;  %s5017_s24 = sphi %s5093_s24, %s6369_s24  }
   0x6   : > { %6301 = sst [smem:[#allocation8_spill]] %s5041_s30  ;;  %s4040_s10 = sadd.s32 4294967294, %s5045_s8  }
   0x7   : > { %s29_s11 = sadd.s32 1, %s5037_s29  ;;  %s32_s12 = sadd.s32 1, %s5041_s30 }
   0x8   : > { %p30_p0 = scmp.ge.s32.totalorder %s29_s11, 3  ;;  %p205_p1 = scmp.ne.s32.totalorder %s5025_s26, %s5021_s25 }
   0x9   : > { %p206_p2 = scmp.eq.s32.totalorder %s4039_s9, 5  ;;  %p211_p5 = scmp.ne.s32.totalorder %s5021_s25, %s5017_s24 }
   0xa   : > { %s6373_s11 = smov (%p30_p0, %s29_s11), 0  ;;  %s6375_s12 = smov (!%p30_p0, %s32_s12), %s5041_s30 }
   0xb   : > { %6302 = sst [smem:[#allocation9_spill]] %s6373_s11  ;;  %s191_s13 = ssub.s32 %s5037_s29, %s6373_s11 }
   0xc   : > { %p5144_p3 = por %p206_p2, %p205_p1  ;;  %p34_p4 = scmp.ge.s32.totalorder %s6375_s12, 2 }
   0xd   : > { %p212_p6 = scmp.eq.s32.totalorder %s4040_s10, 5  ;;  %p4043_p7 = scmp.ge.s32.totalorder %s5045_s8, 1 }
   0xe   : > { %s6377_s12 = smov (%p34_p4, %s6375_s12), 0  ;;  %p260_p9 = scmp.lt.s32.totalorder %s5045_s8, 7 }
   0xf   : > { %6304 = sst [smem:[#allocation10_spill]] %s6377_s12  ;;  %p5153_p8 = por %p212_p6, %p211_p5 }
  0x10   : > { %s190_s16 = ssub.s32 %s5041_s30, %s6377_s12  ;;  %s195_s17 = sadd.s32 1, %s5025_s26 }
  0x11   : > { %s192_s18 = sor.u32 %s191_s13, %s190_s16  ;;  %p261_p10 = pnand %p4043_p7, %p260_p9 }
  0x12   : > { %p193_p11 = scmp.eq.s32.totalorder %s192_s18, 0  ;;  %p296_p12 = scmp.lt.s32.totalorder (!%p261_p10), %s5033_s28, 1  ;;  %v4768_v0 = vld [vmem:[%s6286_s1 + $0x40] sm:$0xff] (!%p261_p10)   ;;  %v4770_v2 = vld [vmem:[%s6286_s1 + $0x48] sm:$0xff] (!%p261_p10)   ;;  %v4772_v4 = vld [vmem:[%s6286_s1 + $0x50] sm:$0xff] (!%p261_p10)   ;;  %vm6298_vm3 = vcmask (!%p261_p10), 519168  }
  0x13   : > { %264 = sbr.rel (%p261_p10) target bundleno = 1236 (0x4d4), region = 48  ;;  %p298_p13 = scmp.lt.s32.totalorder (!%p261_p10), %s5029_s27, 2  ;;  %v4769_v1 = vld [vmem:[%s6286_s1] sm:$0xff] (!%p261_p10)   ;;  %4412 = vmatprep.subr.bf16.mxu0 (!%p261_p10), %v4768_v0  ;;  %v4771_v3 = vld [vmem:[%s6286_s1 + $0x8] sm:$0xff] (!%p261_p10)   ;;  %v4773_v5 = vld [vmem:[%s6286_s1 + $0x10] sm:$0xff] (!%p261_p10)   ;;  %vm6297_vm4 = vcmask (!%p261_p10), 523264  }
  0x14   : > { %s5162_s19 = scalar_select %p193_p11, %s5025_s26, %s195_s17  }
  0x15   : > { %4413 = vmatpush3.bf16.msra.mxu0 (!%p261_p10), %v4769_v1  ;;  %v4774_v6 = vld [vmem:[%s6286_s1 + $0xc0] sm:$0xff] (!%p261_p10)   ;;  %vm321_vm0 = vsmask.f32 (!%p261_p10), 3328  ;;  %vm322_vm1 = vsmask.f32 (!%p261_p10), 7440  ;;  %v4776_v21 = vld [vmem:[%s6286_s1 + $0x58] sm:$0xff] (!%p261_p10)  }
  0x16   : > { %6306 = sst [smem:[#allocation11_spill]] %s5162_s19  ;;  %4414 = vmatprep.subr.bf16.mxu0 (!%p261_p10), %v4770_v2  ;;  %4452 = vmatprep.subr.bf16.mxu1 (!%p261_p10), %v4774_v6  ;;  %v4775_v15 = vld [vmem:[%s6286_s1 + $0x80] sm:$0xff] (!%p261_p10)   ;;  %s5047_s19 = smov (!%p261_p10), 64   ;;  %v4777_v37 = vld [vmem:[%s6286_s1 + $0x18] sm:$0xff] (!%p261_p10)   ;;  %v4778_v44 = vld [vmem:[%s6286_s1 + $0xc8] sm:$0xff] (!%p261_p10)   ;;  %vm1595_vm5 = vcmask (!%p261_p10), 516096  }
  0x17   : > { %4453 = vmatpush3.bf16.msra.mxu1 (!%p261_p10), %v4775_v15  ;;  %v4779_v55 = vld [vmem:[%s6286_s1 + $0x88] sm:$0xff] (!%p261_p10)   ;;  %v4780_v61 = vld [vmem:[%s6286_s1 + $0x60] sm:$0xff] (!%p261_p10)   ;;  %vm5232_vm2 = vmor (!%p261_p10), %vm321_vm0, %vm322_vm1  ;;  %vm1596_vm6 = vsmask.f32 (!%p261_p10), 256  ;;  %vm6299_vm8 = vsmask.f32 (!%p261_p10), 7938 }
  0x18   : > { %4454 = vmatprep.subr.bf16.mxu1 (!%p261_p10), %v4778_v44  ;;  %vm5415_vm7 = vmand (!%p261_p10), %vm1595_vm5, %vm1596_vm6  ;;  %s293_s11 = sand.u32 (!%p261_p10), 1, %s5021_s25   ;;  %s5050_s16 = smov (!%p261_p10), [#allocation4]  }
  0x19   : > { %4415 = vmatpush3.bf16.msra.mxu0 (!%p261_p10), %v4771_v3  ;;  %vm5422_vm9 = vmand (!%p261_p10), %vm1595_vm5, %vm6299_vm8  ;;  %s4685_s12 = smul.u32 (!%p261_p10), 24, %s293_s11  ;;  %s6233_s10 = scalar_lea.sflag (!%p261_p10), [#allocation5], %s293_s11 }
  0x1a   : > { %s297_s20 = scalar_select %p296_p12, %s5033_s28, 1  ;;  %4416 = vmatprep.subr.bf16.mxu0 %v4772_v4 }
  0x1b   : > { %s299_s23 = scalar_select %p298_p13, %s5029_s27, 2  ;;  %4455 = vmatpush3.bf16.msra.mxu1 %v4779_v55 }
  0x1c   : > { %s4686_s13 = smul.u32 96, %s297_s20  ;;  %s4955_s17 = sshll.u32 %s5050_s16, 4  ;;  %s4956_s17 = int_to_ptr.vmem [resolvable:$false] %s4955_s17 }
  0x1d   : > { %s4044_s18 = sshll.u32 %s299_s23, 5  ;;  %4417 = vmatpush3.bf16.msra.mxu0 %v4773_v5 }
  0x1e   : > { %s302_s30 = sadd.s32 %s4686_s13, %s4044_s18  ;;  %4418 = vmatprep.subr.bf16.mxu0 %v4776_v21  ;;  %s5477_s18 = smul.u32 3, %s5029_s27 }
  0x1f   : > { %s4045_s9 = sshll.u32 %s302_s30, 2  ;;  %s4687_s13 = smul.u32 9, %s5033_s28 }
  0x20   : > { %s5189_s23 = scalar_lea.vmem %s6285_s0, %s4045_s9  ;;  %s4169_s21 = sadd.s32 4294967294, %s5477_s18 }
  0x21   : > { %v422_v7 = vld [vmem:[%s5189_s23 + $0x4] sm:$0xf]  ;;  %v423_v8 = vld [vmem:[%s5189_s23 + $0x14] sm:$0xf]  ;;  %v431_v36 = vld [vmem:[%s5189_s23 + $0x2c] sm:$0x1]  ;;  %4419 = vmatpush3.bf16.msra.mxu0 %v4777_v37 }
  0x22   : > { %v426_v9 = vld [vmem:[%s5189_s23 + $0x44] sm:$0xf]  ;;  %v451_v10 = vshrl.u32 %v423_v8, 16  ;;  %v454_v11 = vshll.u32 %v423_v8, 16  ;;  %v4075_v12 = vcombine.low %v422_v7, %v423_v8  ;;  %v437_v13 = vshrl.u32 %v422_v7, 16  ;;  %4420 = vmatprep.subr.bf16.mxu0 %v4780_v61  ;;  %s4291_s27 = sadd.s32 4294967295, %s5477_s18 }
  0x23   : > { %v427_v14 = vld [vmem:[%s5189_s23 + $0x54] sm:$0xf]  ;;  %v440_v16 = vshll.u32 %v422_v7, 16  ;;  %v428_v20 = vld [vmem:[%s5189_s23 + $0x64] sm:$0xf]  ;;  %v493_v25 = vshrl.u32 %v426_v9, 16 }
  0x24   : > { %v507_v17 = vshrl.u32 %v427_v14, 16  ;;  %v510_v18 = vshll.u32 %v427_v14, 16  ;;  %v4077_v19 = vcombine.low %v426_v9, %v427_v14  ;;  %v453_v22 = vrot.slane %v451_v10, 4  ;;  %738 = vrot.lane.b32.xlu0 %v4075_v12, %s5047_s19  ;;  %v424_v26 = vld [vmem:[%s5189_s23 + $0x24] sm:$0xf] }
  0x25   : > { %v456_v23 = vrot.slane %v454_v11, 5  ;;  %v439_v24 = vrot.slane %v437_v13, 4  ;;  %v442_v27 = vrot.slane %v440_v16, 5  ;;  %v496_v30 = vshll.u32 %v426_v9, 16  ;;  %v425_v31 = vld [vmem:[%s5189_s23 + $0x34] sm:$0xf] }
  0x26   : > { %v509_v28 = vrot.slane %v507_v17, 4  ;;  %v512_v29 = vrot.slane %v510_v18, 5  ;;  %742 = vrot.lane.b32.xlu1 %v4077_v19, %s5047_s19  ;;  %v495_v33 = vrot.slane %v493_v25, 4  ;;  %v521_v34 = vshrl.u32 %v428_v20, 16  ;;  %v432_v42 = vld [vmem:[%s5189_s23 + $0x3c] sm:$0x1] }
  0x27   : > { %v457_v32 = vor.u32 %v456_v23, %v453_v22  ;;  %v524_v35 = vshll.u32 %v428_v20, 16  ;;  %v443_v38 = vor.u32 %v442_v27, %v439_v24  ;;  %v498_v40 = vrot.slane %v496_v30, 5  ;;  %v429_v43 = vld [vmem:[%s5189_s23 + $0xc] sm:$0x1]  ;;  %v430_v49 = vld [vmem:[%s5189_s23 + $0x1c] sm:$0x1] }
  0x28   : > { %v513_v39 = vor.u32 %v512_v29, %v509_v28  ;;  %v4078_v41 = vcombine.low %v428_v20, %v428_v20  ;;  %v523_v46 = vrot.slane %v521_v34, 4  ;;  %v465_v48 = vshrl.u32 %v424_v26, 16  ;;  %v433_v54 = vld [vmem:[%s5189_s23 + $0x4c] sm:$0x1]  ;;  %v434_v60 = vld [vmem:[%s5189_s23 + $0x5c] sm:$0x1] }
  0x29   : > { %v458_v45 = vrot.slane %v457_v32, 4  ;;  %v526_v47 = vrot.slane %v524_v35, 5  ;;  %v444_v50 = vrot.slane %v443_v38, 4  ;;  %v499_v52 = vor.u32 %v498_v40, %v495_v33  ;;  %v435_v2 = vld [vmem:[%s5189_s23 + $0x6c] sm:$0x1]  ;;  %v4781_v12 = vld [vmem:[%s6286_s1 + $0x20] sm:$0xff]  }
  0x2a   : > { %v514_v51 = vrot.slane %v513_v39, 4  ;;  %744 = vrot.lane.b32.xlu1 %v4078_v41, %s5047_s19  ;;  %v468_v53 = vshll.u32 %v424_v26, 16  ;;  %v467_v56 = vrot.slane %v465_v48, 4  ;;  %v479_v57 = vshrl.u32 %v425_v31, 16  ;;  %v4782_v17 = vld [vmem:[%s6286_s1 + $0xd0] sm:$0xff]   ;;  %4421 = vmatpush3.bf16.msra.mxu0 %v4781_v12  ;;  %v4789_v35 = vld [vmem:[%s6286_s1 + $0x28] sm:$0xff]  }
  0x2b   : > { %v482_v58 = vshll.u32 %v425_v31, 16  ;;  %v4076_v59 = vcombine.low %v424_v26, %v425_v31  ;;  %v500_v62 = vrot.slane %v499_v52, 4  ;;  %v474_v0 = vshll.u32 %v431_v36, 16  ;;  %v4785_v22 = vld [vmem:[%s6286_s1 + $0x90] sm:$0xff]   ;;  %4456 = vmatprep.subr.bf16.mxu1 %v4782_v17  ;;  %v4788_v31 = vld [vmem:[%s6286_s1 + $0x68] sm:$0xff]  }
  0x2c   : > { %v470_v63 = vrot.slane %v468_v53, 5  ;;  %v488_v1 = vshll.u32 %v432_v42, 16  ;;  %v481_v3 = vrot.slane %v479_v57, 4  ;;  %v446_v5 = vshll.u32 %v429_v43, 16  ;;  %4457 = vmatpush3.bf16.msra.mxu1 %v4785_v22  ;;  %4422 = vmatprep.subr.bf16.mxu0 %v4788_v31  ;;  %v307_v39 = vld [vmem:[%s5189_s23] sm:$0xf] }
  0x2d   : > { %v484_v4 = vrot.slane %v482_v58, 5  ;;  %740 = vrot.lane.b32.xlu0 %v4076_v59, %s5047_s19  ;;  %v460_v6 = vshll.u32 %v430_v49, 16  ;;  %v476_v9 = vrot.slane %v474_v0, 5  ;;  %v502_v11 = vshll.u32 %v433_v54, 16  ;;  %v308_v40 = vld [vmem:[%s5189_s23 + $0x10] sm:$0xf] }
  0x2e   : > { %v471_v8 = vor.u32 %v470_v63, %v467_v56  ;;  %v490_v10 = vrot.slane %v488_v1, 5  ;;  %v448_v14 = vrot.slane %v446_v5, 5  ;;  %v516_v16 = vshll.u32 %v434_v60, 16  ;;  %4423 = vmatpush3.bf16.msra.mxu0 %v4789_v35  ;;  %v314_v42 = vld [vmem:[%s5189_s23 + $0x8] sm:$0x1] }
  0x2f   : > { %v485_v13 = vor.u32 %v484_v4, %v481_v3  ;;  %v462_v15 = vrot.slane %v460_v6, 5  ;;  %v504_v19 = vrot.slane %v502_v11, 5  ;;  %v527_v20 = vor.u32 %v526_v47, %v523_v46  ;;  %v315_v43 = vld [vmem:[%s5189_s23 + $0x18] sm:$0x1]  ;;  %v311_v54 = vld [vmem:[%s5189_s23 + $0x40] sm:$0xf] }
  0x30   : > { %v472_v18 = vrot.slane %v471_v8, 4  ;;  %v530_v21 = vshll.u32 %v435_v2, 16  ;;  %v449_v24 = vsel %vm5232_vm2, %v444_v50, %v448_v14  ;;  %v518_v26 = vrot.slane %v516_v16, 5  ;;  %v312_v59 = vld [vmem:[%s5189_s23 + $0x50] sm:$0xf]  ;;  %v4790_v6 = vld [vmem:[%s6286_s1 + $0xd8] sm:$0xff]  }
  0x31   : > { %v486_v23 = vrot.slane %v485_v13, 4  ;;  %v463_v25 = vsel %vm5232_vm2, %v458_v45, %v462_v15  ;;  %v505_v29 = vsel %vm5232_vm2, %v500_v62, %v504_v19  ;;  %v528_v30 = vrot.slane %v527_v20, 4  ;;  %v318_v61 = vld [vmem:[%s5189_s23 + $0x48] sm:$0x1]  ;;  %v319_v62 = vld [vmem:[%s5189_s23 + $0x58] sm:$0x1]  ;;  %4458 = vmatprep.subr.bf16.mxu1 %v4790_v6 }
  0x32   : > { %v477_v27 = vsel %vm5232_vm2, %v472_v18, %v476_v9  ;;  %v4086_v28 = vcombine.low %v449_v24, %v463_v25  ;;  %v519_v33 = vsel %vm5232_vm2, %v514_v51, %v518_v26  ;;  %v532_v34 = vrot.slane %v530_v21, 5  ;;  %v4791_v20 = vld [vmem:[%s6286_s1 + $0x98] sm:$0xff]   ;;  %v313_v25 = vld [vmem:[%s5189_s23 + $0x60] sm:$0xf]  ;;  %v320_v26 = vld [vmem:[%s5189_s23 + $0x68] sm:$0x1] }
  0x33   : > { %v491_v32 = vsel %vm5232_vm2, %v486_v23, %v490_v10  ;;  %v4088_v37 = vcombine.low %v505_v29, %v519_v33  ;;  %v325_v44 = vshrl.u32 %v307_v39, 16  ;;  %v328_v45 = vshll.u32 %v307_v39, 16  ;;  %4459 = vmatpush3.bf16.msra.mxu1 %v4791_v20  ;;  %v310_v35 = vld [vmem:[%s5189_s23 + $0x30] sm:$0xf] }
  0x34   : > { %v4087_v36 = vcombine.low %v477_v27, %v491_v32  ;;  %801 = vrot.lane.b32.xlu0 %v4086_v28, %s5047_s19  ;;  %v533_v38 = vsel %vm5232_vm2, %v528_v30, %v532_v34  ;;  %v4386_v46 = vcombine.low %v307_v39, %v307_v39  ;;  %v334_v47 = vshll.u32 %v314_v42, 16  ;;  %v4795_v27 = vld [vmem:[%s6286_s1 + $0x70] sm:$0xff]   ;;  %v309_v32 = vld [vmem:[%s5189_s23 + $0x20] sm:$0xf] }
  0x35   : > { %v4089_v41 = vcombine.low %v533_v38, %v533_v38  ;;  %v339_v48 = vshrl.u32 %v308_v40, 16  ;;  %v342_v49 = vshll.u32 %v308_v40, 16  ;;  %v348_v50 = vshll.u32 %v315_v43, 16  ;;  %4424 = vmatprep.subr.bf16.mxu0 %v4795_v27  ;;  %v4796_v43 = vld [vmem:[%s6286_s1 + $0x30] sm:$0xff]  }
  0x36   : > { %803 = vrot.lane.b32.xlu1 %v4087_v36, %s5047_s19  ;;  %v327_v51 = vrot.slane %v325_v44, 4  ;;  %v330_v52 = vrot.slane %v328_v45, 5  ;;  %v4387_v53 = vcombine.low %v308_v40, %v308_v40  ;;  %702 = vst [vmem:[#allocation3] sm:$0xf] %v4386_v46  ;;  %v336_v55 = vrot.slane %v334_v47, 5  ;;  %4425 = vmatpush3.bf16.msra.mxu0 %v4796_v43 }
  0x37   : > { %v341_v56 = vrot.slane %v339_v48, 4  ;;  %v344_v57 = vrot.slane %v342_v49, 5  ;;  %v350_v58 = vrot.slane %v348_v50, 5  ;;  %v381_v63 = vshrl.u32 %v311_v54, 16  ;;  %v316_v36 = vld [vmem:[%s5189_s23 + $0x28] sm:$0x1] }
  0x38   : > { %805 = vrot.lane.b32.xlu0 %v4088_v37, %s5047_s19  ;;  %v331_v60 = vor.u32 %v330_v52, %v327_v51  ;;  %703 = vst [vmem:[#allocation3 + $0x14] sm:$0xf] %v4387_v53  ;;  %v384_v0 = vshll.u32 %v311_v54, 16  ;;  %v4390_v1 = vcombine.low %v311_v54, %v311_v54  ;;  %v390_v3 = vshll.u32 %v318_v61, 16  ;;  %v317_v37 = vld [vmem:[%s5189_s23 + $0x38] sm:$0x1] }
  0x39   : > { %v345_v2 = vor.u32 %v344_v57, %v341_v56  ;;  %v395_v4 = vshrl.u32 %v312_v59, 16  ;;  %v398_v5 = vshll.u32 %v312_v59, 16  ;;  %v383_v9 = vrot.slane %v381_v63, 4  ;;  %v4797_v48 = vld [vmem:[%s6286_s1 + $0xe0] sm:$0xff]  }
  0x3a   : > { %807 = vrot.lane.b32.xlu1 %v4089_v41, %s5047_s19  ;;  %v332_v8 = vrot.slane %v331_v60, 4  ;;  %v386_v10 = vrot.slane %v384_v0, 5  ;;  %v404_v11 = vshll.u32 %v319_v62, 16  ;;  %706 = vst [vmem:[#allocation3 + $0x50] sm:$0xf] %v4390_v1  ;;  %v392_v13 = vrot.slane %v390_v3, 5  ;;  %4460 = vmatprep.subr.bf16.mxu1 %v4797_v48 }
  0x3b   : > { %v346_v12 = vrot.slane %v345_v2, 4  ;;  %v397_v14 = vrot.slane %v395_v4, 4  ;;  %v400_v15 = vrot.slane %v398_v5, 5  ;;  %v4391_v19 = vcombine.low %v312_v59, %v312_v59  ;;  %v4798_v53 = vld [vmem:[%s6286_s1 + $0xa0] sm:$0xff]   ;;  %v4800_v3 = vld [vmem:[%s6286_s1 + $0x38] sm:$0xff]   ;;  %v4801_v5 = vld [vmem:[%s6286_s1 + $0xe8] sm:$0xff]  }
  0x3c   : > { %v337_v16 = vsel %vm5232_vm2, %v332_v8, %v336_v55  ;;  %v387_v17 = vor.u32 %v386_v10, %v383_v9  ;;  %v406_v18 = vrot.slane %v404_v11, 5  ;;  %v409_v29 = vshrl.u32 %v313_v25, 16  ;;  %4461 = vmatpush3.bf16.msra.mxu1 %v4798_v53  ;;  %v4802_v8 = vld [vmem:[%s6286_s1 + $0xa8] sm:$0xff]   ;;  %v5336_v10 = vld [vmem:[%s6286_s1 + $0x100] sm:$0xff]  }
  0x3d   : > { %v351_v21 = vsel %vm5232_vm2, %v346_v12, %v350_v58  ;;  %v401_v22 = vor.u32 %v400_v15, %v397_v14  ;;  %707 = vst [vmem:[#allocation3 + $0x64] sm:$0xf] %v4391_v19  ;;  %v412_v30 = vshll.u32 %v313_v25, 16  ;;  %v418_v31 = vshll.u32 %v320_v26, 16  ;;  %v4799_v58 = vld [vmem:[%s6286_s1 + $0x78] sm:$0xff]   ;;  %4462 = vmatprep.subr.bf16.mxu1 %v4801_v5  ;;  %v4807_v12 = vld [vmem:[%s6286_s1 + $0xf0] sm:$0xff]  }
  0x3e   : > { %v5287_v23 = vcombine.low %v337_v16, %v351_v21  ;;  %v388_v24 = vrot.slane %v387_v17, 4  ;;  %v4392_v34 = vcombine.low %v313_v25, %v313_v25  ;;  %v4388_v38 = vcombine.low %v309_v32, %v309_v32  ;;  %4426 = vmatprep.subr.bf16.mxu0 %v4799_v58  ;;  %v4809_v14 = vld [vmem:[%s6286_s1 + $0xf8] sm:$0xff]   ;;  %v4046_v16 = vld [vmem:[%s5189_s23 + $0x10] sm:$0xf]  ;;  %v4047_v17 = vld [vmem:[%s5189_s23 + $0x20] sm:$0xf] }
  0x3f   : > { %v402_v28 = vrot.slane %v401_v22, 4  ;;  %v411_v40 = vrot.slane %v409_v29, 4  ;;  %v414_v41 = vrot.slane %v412_v30, 5  ;;  %v420_v42 = vrot.slane %v418_v31, 5  ;;  %4427 = vmatpush3.bf16.msra.mxu0 %v4800_v3  ;;  %v4810_v15 = vld [vmem:[%s6286_s1 + $0xb8] sm:$0xff]  }
  0x40   : > { %v393_v33 = vsel %vm5232_vm2, %v388_v24, %v392_v13  ;;  %708 = vst [vmem:[#allocation3 + $0x78] sm:$0xf] %v4392_v34  ;;  %v353_v45 = vshrl.u32 %v309_v32, 16  ;;  %v356_v46 = vshll.u32 %v309_v32, 16  ;;  %v362_v47 = vshll.u32 %v316_v36, 16  ;;  %4463 = vmatpush3.bf16.msra.mxu1 %v4802_v8  ;;  %4637 = vmatprep.subr.bf16.mxu0 %v5336_v10  ;;  %v4808_v13 = vld [vmem:[%s6286_s1 + $0xb0] sm:$0xff]  }
  0x41   : > { %v407_v39 = vsel %vm5232_vm2, %v402_v28, %v406_v18  ;;  %704 = vst [vmem:[#allocation3 + $0x28] sm:$0xf] %v4388_v38  ;;  %v415_v49 = vor.u32 %v414_v41, %v411_v40  ;;  %v367_v50 = vshrl.u32 %v310_v35, 16  ;;  %v370_v51 = vshll.u32 %v310_v35, 16  ;;  %4464 = vmatprep.subr.bf16.mxu1 %v4807_v12  ;;  %v4048_v21 = vld [vmem:[%s5189_s23 + $0x30] sm:$0xf] }
  0x42   : > { %v5305_v44 = vcombine.low %v393_v33, %v407_v39  ;;  %v376_v52 = vshll.u32 %v317_v37, 16  ;;  %v355_v54 = vrot.slane %v353_v45, 4  ;;  %v358_v55 = vrot.slane %v356_v46, 5  ;;  %v4049_v26 = vld [vmem:[%s5189_s23 + $0x40] sm:$0xf] }
  0x43   : > { %v364_v56 = vrot.slane %v362_v47, 5  ;;  %v4389_v57 = vcombine.low %v310_v35, %v310_v35  ;;  %v416_v59 = vrot.slane %v415_v49, 4  ;;  %v369_v60 = vrot.slane %v367_v50, 4  ;;  %v4050_v40 = vld [vmem:[%s5189_s23 + $0x50] sm:$0xf] }
  0x44   : > { %v372_v61 = vrot.slane %v370_v51, 5  ;;  %v378_v62 = vrot.slane %v376_v52, 5  ;;  %v359_v63 = vor.u32 %v358_v55, %v355_v54  ;;  %4465 = vmatpush3.bf16.msra.mxu1 %v4808_v13  ;;  %v550_v18 = vshrl.u32 %v4046_v16, 16  ;;  %v4051_v41 = vld [vmem:[%s5189_s23 + $0x60] sm:$0xf] }
  0x45   : > { %705 = vst [vmem:[#allocation3 + $0x3c] sm:$0xf] %v4389_v57  ;;  %v5318_v0 = vsel %vm5232_vm2, %v416_v59, %v420_v42  ;;  %4466 = vmatprep.subr.bf16.mxu1 %v4809_v14  ;;  %v553_v19 = vshll.u32 %v4046_v16, 16  ;;  %v4393_v20 = vcombine.low %v4046_v16, %v4046_v16  ;;  %v564_v22 = vshrl.u32 %v4047_v17, 16  ;;  %v4052_v51 = vld [vmem:[%s5189_s23 + $0x70] sm:$0xf] }
  0x46   : > { %v373_v1 = vor.u32 %v372_v61, %v369_v60  ;;  %v360_v2 = vrot.slane %v359_v63, 4  ;;  %v567_v24 = vshll.u32 %v4047_v17, 16  ;;  %v4394_v25 = vcombine.low %v4047_v17, %v4047_v17  ;;  %v4054_v61 = vld [vmem:[%s5189_s23 + $0x28] sm:$0x1]  ;;  %v4055_v3 = vld [vmem:[%s5189_s23 + $0x38] sm:$0x1] }
  0x47   : > { %v578_v27 = vshrl.u32 %v4048_v21, 16  ;;  %v552_v28 = vrot.slane %v550_v18, 4  ;;  %v555_v29 = vrot.slane %v553_v19, 5  ;;  %896 = vst [vmem:[#allocation3 + $0xc] sm:$0xf] %v4393_v20  ;;  %v581_v30 = vshll.u32 %v4048_v21, 16 }
  0x48   : > { %v374_v4 = vrot.slane %v373_v1, 4  ;;  %v365_v6 = vsel %vm5232_vm2, %v360_v2, %v364_v56  ;;  %v592_v31 = vshrl.u32 %v4049_v26, 16  ;;  %4467 = vmatpush3.bf16.msra.mxu1 %v4810_v15  ;;  %v566_v32 = vrot.slane %v564_v22, 4  ;;  %897 = vst [vmem:[#allocation3 + $0x20] sm:$0xf] %v4394_v25 }
  0x49   : > { %v569_v33 = vrot.slane %v567_v24, 5  ;;  %v580_v34 = vrot.slane %v578_v27, 4  ;;  %v595_v35 = vshll.u32 %v4049_v26, 16  ;;  %v583_v36 = vrot.slane %v581_v30, 5  ;;  %v4053_v56 = vld [vmem:[%s5189_s23 + $0x18] sm:$0x1] }
  0x4a   : > { %v379_v9 = vsel %vm5232_vm2, %v374_v4, %v378_v62  ;;  %v594_v37 = vrot.slane %v592_v31, 4  ;;  %v4395_v38 = vcombine.low %v4048_v21, %v4048_v21  ;;  %v4396_v39 = vcombine.low %v4049_v26, %v4049_v26  ;;  %v4056_v4 = vld [vmem:[%s5189_s23 + $0x48] sm:$0x1]  ;;  %v4057_v12 = vld [vmem:[%s5189_s23 + $0x58] sm:$0x1] }
  0x4b   : > { %v5338_v11 = vcombine.low %v365_v6, %v379_v9  ;;  %v597_v42 = vrot.slane %v595_v35, 5  ;;  %v606_v43 = vshrl.u32 %v4050_v40, 16  ;;  %v609_v45 = vshll.u32 %v4050_v40, 16  ;;  %v4058_v13 = vld [vmem:[%s5189_s23 + $0x68] sm:$0x1] }
  0x4c   : > { %v620_v46 = vshrl.u32 %v4051_v41, 16  ;;  %v584_v47 = vor.u32 %v583_v36, %v580_v34  ;;  %898 = vst [vmem:[#allocation3 + $0x34] sm:$0xf] %v4395_v38  ;;  %899 = vst [vmem:[#allocation3 + $0x48] sm:$0xf] %v4396_v39  ;;  %v623_v48 = vshll.u32 %v4051_v41, 16  ;;  %v4397_v49 = vcombine.low %v4050_v40, %v4050_v40 }
  0x4d   : > { %v4398_v50 = vcombine.low %v4051_v41, %v4051_v41  ;;  %v598_v52 = vor.u32 %v597_v42, %v594_v37  ;;  %v608_v53 = vrot.slane %v606_v43, 4  ;;  %v611_v54 = vrot.slane %v609_v45, 5  ;;  %v4059_v18 = vld [vmem:[%s5189_s23 + $0x78] sm:$0x1]  ;;  %s4957_s23 = scalar_lea.vmem %s4956_s17, 768 }
  0x4e   : > { %v622_v55 = vrot.slane %v620_v46, 4  ;;  %v585_v57 = vrot.slane %v584_v47, 4  ;;  %v625_v58 = vrot.slane %v623_v48, 5  ;;  %900 = vst [vmem:[#allocation3 + $0x5c] sm:$0xf] %v4397_v49  ;;  %v634_v59 = vshrl.u32 %v4052_v51, 16 }
  0x4f   : > { %901 = vst [vmem:[#allocation3 + $0x70] sm:$0xf] %v4398_v50  ;;  %v637_v60 = vshll.u32 %v4052_v51, 16  ;;  %v599_v62 = vrot.slane %v598_v52, 4  ;;  %v4399_v63 = vcombine.low %v4052_v51, %v4052_v51  ;;  %v556_v1 = vor.u32 %v555_v29, %v552_v28 }
  0x50   : > { %v559_v2 = vshll.u32 %v4053_v56, 16  ;;  %v626_v5 = vor.u32 %v625_v58, %v622_v55  ;;  %v636_v6 = vrot.slane %v634_v59, 4  ;;  %v570_v9 = vor.u32 %v569_v33, %v566_v32  ;;  %v4806_v59 = vld [vmem:[#allocation3] ss:$20 sps:$4 sm:$0xff]  }
  0x51   : > { %v639_v8 = vrot.slane %v637_v60, 5  ;;  %902 = vst [vmem:[#allocation3 + $0x84] sm:$0xf] %v4399_v63  ;;  %v557_v14 = vrot.slane %v556_v1, 4  ;;  %v573_v16 = vshll.u32 %v4054_v61, 16  ;;  %v587_v17 = vshll.u32 %v4055_v3, 16 }
  0x52   : > { %v561_v15 = vrot.slane %v559_v2, 5  ;;  %v627_v19 = vrot.slane %v626_v5, 4  ;;  %v571_v21 = vrot.slane %v570_v9, 4  ;;  %v601_v22 = vshll.u32 %v4056_v4, 16  ;;  %v4814_v9 = vld [vmem:[#allocation3 + $0x28] ss:$20 sps:$4 sm:$0xff]  }
  0x53   : > { %v640_v20 = vor.u32 %v639_v8, %v636_v6  ;;  %v575_v25 = vrot.slane %v573_v16, 5  ;;  %v589_v26 = vrot.slane %v587_v17, 5  ;;  %v612_v27 = vor.u32 %v611_v54, %v608_v53 }
  0x54   : > { %v562_v24 = vsel %vm5232_vm2, %v557_v14, %v561_v15  ;;  %v603_v29 = vrot.slane %v601_v22, 5  ;;  %v615_v30 = vshll.u32 %v4057_v12, 16  ;;  %v629_v31 = vshll.u32 %v4058_v13, 16  ;;  %v4834_v12 = vld [vmem:[%s6286_s1 + $0x118] sm:$0xff]  }
  0x55   : > { %v641_v28 = vrot.slane %v640_v20, 4  ;;  %904 = vst.msk [vmem:[#allocation3 + $0x10] sm:$0xf] %vm6298_vm3, %v562_v24  ;;  %v576_v32 = vsel %vm5232_vm2, %v571_v21, %v575_v25  ;;  %v590_v33 = vsel %vm5232_vm2, %v585_v57, %v589_v26  ;;  %v613_v34 = vrot.slane %v612_v27, 4  ;;  %v4817_v20 = vld [vmem:[#allocation3 + $0xc] ss:$20 sps:$4 sm:$0xff]  }
  0x56   : > { %v643_v35 = vshll.u32 %v4059_v18, 16  ;;  %905 = vst.msk [vmem:[#allocation3 + $0x24] sm:$0xf] %vm6298_vm3, %v576_v32  ;;  %v604_v36 = vsel %vm5232_vm2, %v599_v62, %v603_v29  ;;  %906 = vst.msk [vmem:[#allocation3 + $0x38] sm:$0xf] %vm6298_vm3, %v590_v33  ;;  %v617_v37 = vrot.slane %v615_v30, 5  ;;  %v4074_v50 = vcombine.low %v5318_v0, %v5318_v0  ;;  %1427 = vmatprep.mubr.bf16.mxu1 %v4817_v20 }
  0x57   : > { %v631_v38 = vrot.slane %v629_v31, 5  ;;  %907 = vst.msk [vmem:[#allocation3 + $0x4c] sm:$0xf] %vm6298_vm3, %v604_v36  ;;  %v4813_v0 = vld [vmem:[%s6286_s1 + $0x108] sm:$0xff]   ;;  %v1604_v36 = vld [vmem:[#allocation2 + $0x10] sm:$0x1] }
  0x58   : > { %v645_v39 = vrot.slane %v643_v35, 5  ;;  %v618_v40 = vsel %vm5232_vm2, %v613_v34, %v617_v37  ;;  %v4822_v24 = vld [vmem:[#allocation3 + $0x34] ss:$20 sps:$4 sm:$0xff]  }
  0x59   : > { %v632_v41 = vsel %vm5232_vm2, %v627_v19, %v631_v38  ;;  %908 = vst.msk [vmem:[#allocation3 + $0x60] sm:$0xf] %vm6298_vm3, %v618_v40  ;;  %v4827_v19 = vld [vmem:[#allocation3 + $0x50] ss:$20 sps:$4 sm:$0xff]   ;;  %v1627_v38 = vld [vmem:[#allocation2 + $0x14] sm:$0x1] }
  0x5a   : > { %909 = vst.msk [vmem:[#allocation3 + $0x74] sm:$0xf] %vm6298_vm3, %v632_v41  ;;  %v646_v42 = vsel %vm5232_vm2, %v641_v28, %v645_v39  ;;  %v4831_v28 = vld [vmem:[#allocation3 + $0x5c] ss:$20 sps:$4 sm:$0xff]   ;;  %v1605_v39 = vsel %vm5415_vm7, 0, %v1604_v36  ;;  %v1628_v41 = vsel %vm5422_vm9, 0, %v1627_v38 }
  0x5b   : > { %910 = vst.msk [vmem:[#allocation3 + $0x88] sm:$0xf] %vm6298_vm3, %v646_v42  ;;  %1606 = vst [vmem:[#allocation2 + $0x10] sm:$0x1] %v1605_v39  ;;  %v1598_v42 = vld [vmem:[#allocation2] sm:$0x1] }
  0x5c   : > { %1629 = vst [vmem:[#allocation2 + $0x14] sm:$0x1] %v1628_v41  ;;  %v5473_v20 = vld [vmem:[%s6287_s2] ss:$0 sm:$0xff] }
  0x5d   : > { %v4839_v27 = vld [vmem:[#allocation3 + $0x10] ss:$20 sps:$4 sm:$0xff]  }
  0x5e   : > { %v4840_v30 = vld [vmem:[#allocation3 + $0x38] ss:$20 sps:$4 sm:$0xff]  }
  0x61   : > { %v4841_v32 = vld [vmem:[#allocation3 + $0x60] ss:$20 sps:$4 sm:$0xff]  }
  0x62   : > { %v4842_v34 = vld [vmem:[#allocation3 + $0x88] ss:$0 sps:$4 sm:$0xff]  }
  0x96   : > { %v739_v43 = vpop.permute.xlu0 %738 }
  0x97   : > { %v748_v45 = vsel %vm6297_vm4, %v5287_v23, %v739_v43 }
  0x98   : > { %v743_v46 = vpop.permute.xlu1 %742  ;;  %v4079_v47 = vcombine.low %v748_v45, %v748_v45  ;;  %v4080_v48 = vcombine.high %v748_v45, %v748_v45  ;;  %v1599_v45 = vsel %vm5415_vm7, 0, %v1598_v42  ;;  %v1546_v42 = vstv %s4169_s21  ;;  %s3951_s21 = sadd.s32 %s4687_s13, %s5477_s18 }
  0x99   : > { %v754_v49 = vsel %vm6297_vm4, %v5305_v44, %v743_v46  ;;  %1600 = vst [vmem:[#allocation2] sm:$0x1] %v1599_v45  ;;  %vm1553_vm12 = vcmp.ge.s32.totalorder %v1546_v42, 0  ;;  %vm1560_vm13 = vcmp.lt.s32.totalorder %v1546_v42, 8  ;;  %s4383_s9 = sshll.u32 %s3951_s21, 7 }
  0x9a   : > { %v4083_v51 = vcombine.low %v754_v49, %v754_v49  ;;  %v4084_v52 = vcombine.high %v754_v49, %v754_v49  ;;  %783 = vst [vmem:[#allocation3 + $0x4] sm:$0xf] %v4079_v47  ;;  %784 = vst [vmem:[#allocation3 + $0x18] sm:$0xf] %v4080_v48  ;;  %v1607_v47 = vld [vmem:[#allocation2 + $0x18] sm:$0x1] }
  0x9b   : > { %v1608_v48 = vsel %vm5415_vm7, 0, %v1607_v47  ;;  %v1630_v49 = vld [vmem:[#allocation2 + $0x1c] sm:$0x1] }
  0x9c   : > { %787 = vst [vmem:[#allocation3 + $0x54] sm:$0xf] %v4083_v51  ;;  %788 = vst [vmem:[#allocation3 + $0x68] sm:$0xf] %v4084_v52  ;;  %v745_v53 = vpop.permute.xlu1 %744  ;;  %v1601_v51 = vld [vmem:[#allocation2 + $0x8] sm:$0x1] }
  0x9d   : > { %v757_v54 = vsel %vm6297_vm4, %v4074_v50, %v745_v53  ;;  %1609 = vst [vmem:[#allocation2 + $0x18] sm:$0x1] %v1608_v48  ;;  %v1631_v50 = vsel %vm5422_vm9, 0, %v1630_v49  ;;  %v1624_v52 = vld [vmem:[#allocation2 + $0xc] sm:$0x1] }
  0x9e   : > { %v4085_v55 = vcombine.low %v757_v54, %v757_v54  ;;  %1632 = vst [vmem:[#allocation2 + $0x1c] sm:$0x1] %v1631_v50  ;;  %v1625_v54 = vsel %vm5422_vm9, 0, %v1624_v52 }
  0x9f   : > { %v741_v23 = vpop.permute.xlu0 %740  ;;  %1626 = vst [vmem:[#allocation2 + $0xc] sm:$0x1] %v1625_v54 }
  0xa0   : > { %789 = vst [vmem:[#allocation3 + $0x7c] sm:$0xf] %v4085_v55  ;;  %v751_v56 = vsel %vm6297_vm4, %v5338_v11, %v741_v23  ;;  %v4826_v11 = vld [vmem:[%s6286_s1 + $0x110] sm:$0xff]  }
  0xa1   : > { %v4081_v57 = vcombine.low %v751_v56, %v751_v56  ;;  %v4082_v44 = vcombine.high %v751_v56, %v751_v56  ;;  %v4803_v58 = vld [vmem:[#allocation3 + $0x4] ss:$20 sps:$4 sm:$0xff]  }
  0xa2   : > { %1363 = vmatprep.mubr.bf16.mxu0 %v4803_v58  ;;  %v1616_v55 = vld [vmem:[#allocation2 + $0x30] sm:$0x1] }
  0xa3   : > { %785 = vst [vmem:[#allocation3 + $0x2c] sm:$0xf] %v4081_v57  ;;  %786 = vst [vmem:[#allocation3 + $0x40] sm:$0xf] %v4082_v44  ;;  %1364 = vmatmul.mubr.bf16.vlgmr.msra.gmra.mrb[0].mxu0 %v4806_v59  ;;  %v4824_v3 = vld [vmem:[#allocation3 + $0x54] ss:$20 sps:$4 sm:$0xff]  }
  0xa4   : > { %4638 = vmatpush3.bf16.msra.mxu0 %v5336_v10  ;;  %v1617_v56 = vsel %vm5415_vm7, 0, %v1616_v55  ;;  %v1610_v44 = vld [vmem:[#allocation2 + $0x20] sm:$0x1]  ;;  %v1548_v55 = vadd.s32 2, %v1546_v42 }
  0xa5   : > { %4639 = vmatprep.subr.bf16.mxu0 %v4813_v0  ;;  %1618 = vst [vmem:[#allocation2 + $0x30] sm:$0x1] %v1617_v56  ;;  %v1611_v58 = vsel %vm5415_vm7, 0, %v1610_v44  ;;  %v1547_v56 = vadd.s32 1, %v1546_v42 }
  0xa6   : > { %v802_v60 = vpop.permute.xlu0 %801  ;;  %1612 = vst [vmem:[#allocation2 + $0x20] sm:$0x1] %v1611_v58  ;;  %vm1555_vm10 = vcmp.ge.s32.totalorder %v1548_v55, 0  ;;  %vm1562_vm11 = vcmp.lt.s32.totalorder %v1548_v55, 8 }
  0xa7   : > { %v810_v61 = vsel %vm6297_vm4, %v739_v43, %v802_v60  ;;  %v929_v18 = vld [vmem:[#allocation3 + $0x78] sm:$0xff]  ;;  %v1621_v43 = vld [vmem:[#allocation2 + $0x4] sm:$0x1]  ;;  %v1613_v60 = vld [vmem:[#allocation2 + $0x28] sm:$0x1]  ;;  %vm1554_vm0 = vcmp.ge.s32.totalorder %v1547_v56, 0 }
  0xa8   : > { %v804_v62 = vpop.permute.xlu1 %803  ;;  %v4090_v63 = vcombine.low %v810_v61, %v810_v61  ;;  %v4091_v1 = vcombine.high %v810_v61, %v810_v61  ;;  %4640 = vmatpush3.bf16.msra.mxu0 %v4813_v0  ;;  %v4125_v22 = vcombine.high %v929_v18, %v929_v18  ;;  %v4124_v25 = vcombine.low %v929_v18, %v929_v18  ;;  %v1633_v0 = vld [vmem:[#allocation2 + $0x24] sm:$0x1]  ;;  %vm1569_vm6 = vmand %vm1555_vm10, %vm1562_vm11 }
  0xa9   : > { %v812_v2 = vsel %vm6297_vm4, %v741_v23, %v804_v62  ;;  %4641 = vmatprep.subr.bf16.mxu0 %v4826_v11  ;;  %v1639_v23 = vld [vmem:[#allocation2 + $0x34] sm:$0x1]  ;;  %v1634_v59 = vsel %vm5422_vm9, 0, %v1633_v0  ;;  %v1614_v61 = vsel %vm5415_vm7, 0, %v1613_v60  ;;  %vm1561_vm1 = vcmp.lt.s32.totalorder %v1547_v56, 8 }
  0xaa   : > { %v4092_v4 = vcombine.low %v812_v2, %v812_v2  ;;  %v4093_v5 = vcombine.high %v812_v2, %v812_v2  ;;  %842 = vst [vmem:[#allocation3 + $0x8] sm:$0xf] %v4090_v63  ;;  %843 = vst [vmem:[#allocation3 + $0x1c] sm:$0xf] %v4091_v1  ;;  %v806_v6 = vpop.permute.xlu0 %805  ;;  %v4811_v8 = vld [vmem:[#allocation3 + $0x2c] ss:$20 sps:$4 sm:$0xff]  }
  0xab   : > { %v814_v10 = vsel %vm6297_vm4, %v743_v46, %v806_v6  ;;  %1371 = vmatprep.mubr.bf16.mxu0 %v4811_v8  ;;  %v1622_v46 = vsel %vm5422_vm9, 0, %v1621_v43  ;;  %v1640_v57 = vsel %vm5422_vm9, 0, %v1639_v23  ;;  %1635 = vst [vmem:[#allocation2 + $0x24] sm:$0x1] %v1634_v59  ;;  %1615 = vst [vmem:[#allocation2 + $0x28] sm:$0x1] %v1614_v61 }
  0xac   : > { %844 = vst [vmem:[#allocation3 + $0x30] sm:$0xf] %v4092_v4  ;;  %845 = vst [vmem:[#allocation3 + $0x44] sm:$0xf] %v4093_v5  ;;  %v4094_v13 = vcombine.low %v814_v10, %v814_v10  ;;  %v4095_v14 = vcombine.high %v814_v10, %v814_v10  ;;  %v808_v15 = vpop.permute.xlu1 %807  ;;  %1372 = vmatmul.mubr.bf16.gmra.mrb[4].mxu0 %v4814_v9  ;;  %v4846_v63 = vld [vmem:[%s6288_s3 + $0x40] sm:$0xff]   ;;  %v4848_v2 = vld [vmem:[%s6288_s3 + $0x48] sm:$0xff]  }
  0xad   : > { %v816_v16 = vsel %vm6297_vm4, %v745_v53, %v808_v15  ;;  %1379 = vmatprep.mubr.bf16.mxu0 %v4824_v3  ;;  %4642 = vmatpush3.bf16.msra.mxu0 %v4826_v11  ;;  %1623 = vst [vmem:[#allocation2 + $0x4] sm:$0x1] %v1622_v46  ;;  %v1602_v53 = vsel %vm5415_vm7, 0, %v1601_v51  ;;  %1641 = vst [vmem:[#allocation2 + $0x34] sm:$0x1] %v1640_v57  ;;  %v4847_v1 = vld [vmem:[%s6288_s3] sm:$0xff]  }
  0xae   : > { %846 = vst [vmem:[#allocation3 + $0x58] sm:$0xf] %v4094_v13  ;;  %847 = vst [vmem:[#allocation3 + $0x6c] sm:$0xf] %v4095_v14  ;;  %v4096_v17 = vcombine.low %v816_v16, %v816_v16  ;;  %4643 = vmatprep.subr.bf16.mxu0 %v4834_v12  ;;  %v1636_v11 = vld [vmem:[#allocation2 + $0x2c] sm:$0x1]  ;;  %4500 = vmatprep.subr.bf16.mxu1 %v4846_v63 }
  0xaf   : > { %1603 = vst [vmem:[#allocation2 + $0x8] sm:$0x1] %v1602_v53  ;;  %v1637_v62 = vsel %vm5422_vm9, 0, %v1636_v11  ;;  %v4849_v3 = vld [vmem:[%s6288_s3 + $0x8] sm:$0xff]   ;;  %v4850_v4 = vld [vmem:[%s6288_s3 + $0x50] sm:$0xff]   ;;  %v1549_v23 = vadd.s32 3, %v1546_v42 }
  0xb0   : > { %848 = vst [vmem:[#allocation3 + $0x80] sm:$0xf] %v4096_v17  ;;  %1638 = vst [vmem:[#allocation2 + $0x2c] sm:$0x1] %v1637_v62  ;;  %v4851_v5 = vld [vmem:[%s6288_s3 + $0x10] sm:$0xff]   ;;  %v5483_v59 = vadd.s32 4, %v1546_v42 }
  0xb1   : > { %v4819_v21 = vld [vmem:[#allocation3 + $0x8] ss:$20 sps:$4 sm:$0xff]   ;;  %4644 = vmatpush3.bf16.msra.mxu0 %v4834_v12  ;;  %vm1556_vm14 = vcmp.ge.s32.totalorder %v1549_v23, 0  ;;  %vm1563_vm15 = vcmp.lt.s32.totalorder %v1549_v23, 8  ;;  %v5485_v63 = vadd.s32 6, %v1546_v42 }
  0xb2   : > { %1428 = vmatmul.mubr.bf16.vlgmr.msra.gmra.mrb[0].mxu1 %v4819_v21  ;;  %vm1557_vm3 = vcmp.ge.s32.totalorder %v5483_v59, 0  ;;  %vm5502_vm10 = vmand %vm1556_vm14, %vm1563_vm15  ;;  %vm1564_vm15 = vcmp.lt.s32.totalorder %v5483_v59, 8 }
  0xb3   : > { %1435 = vmatprep.mubr.bf16.mxu1 %v4822_v24  ;;  %v4828_v26 = vld [vmem:[#allocation3 + $0x30] ss:$20 sps:$4 sm:$0xff]   ;;  %4501 = vmatpush3.bf16.msra.mxu1 %v4847_v1  ;;  %vm5514_vm14 = vmand %vm1554_vm0, %vm1561_vm1  ;;  %vm6319_vm0 = vsmask.f32 7938  ;;  %vm6320_vm1 = vcmask 519168  }
  0xb4   : > { %1380 = vmatmul.mubr.bf16.gmra.mrb[8].mxu0 %v4827_v19  ;;  %4502 = vmatprep.subr.bf16.mxu1 %v4848_v2 }
  0xb5   : > { %1387 = vmatprep.mubr.bf16.mxu0 %v4125_v22  ;;  %v4836_v31 = vld [vmem:[#allocation3 + $0x58] ss:$20 sps:$4 sm:$0xff]  }
  0xb7   : > { %v930_v29 = vld [vmem:[#allocation3 + $0x80] sm:$0xff]  ;;  %4503 = vmatpush3.bf16.msra.mxu1 %v4849_v3 }
  0xb8   : > { %v4127_v33 = vcombine.high %v930_v29, %v930_v29  ;;  %v4126_v35 = vcombine.low %v930_v29, %v930_v29  ;;  %4504 = vmatprep.subr.bf16.mxu1 %v4850_v4 }
  0xba   : > { %1436 = vmatmul.mubr.bf16.gmra.mrb[4].mxu1 %v4828_v26 }
  0xbb   : > { %1443 = vmatprep.mubr.bf16.mxu1 %v4831_v28  ;;  %4505 = vmatpush3.bf16.msra.mxu1 %v4851_v5 }
  0xbc   : > { %1388 = vmatmul.mubr.bf16.gmra.mrb[12].mxu0 %v4124_v25 }
  0xbd   : > { %4645 = vmatprep.mubr.msk.bf16.mxu0 %vm6297_vm4, %v4839_v27 }
  0xc2   : > { %1444 = vmatmul.mubr.bf16.gmra.mrb[8].mxu1 %v4836_v31 }
  0xc3   : > { %1451 = vmatprep.mubr.bf16.mxu1 %v4127_v33 }
  0xc4   : > { %4646 = vmatmul.mubr.msk.bf16.vlgmr.msra.gmra.mrb[16].mxu0 %vm6297_vm4, %v4840_v30 }
  0xc5   : > { %4649 = vmatprep.mubr.msk.bf16.mxu0 %vm6297_vm4, %v4841_v32 }
  0xca   : > { %1452 = vmatmul.mubr.bf16.gmra.mrb[12].mxu1 %v4126_v35 }
  0xcc   : > { %4650 = vmatmul.mubr.msk.bf16.gmra.mrb[20].mxu0 %vm6297_vm4, %v4842_v34  ;;  %vm5495_vm4 = vmand %vm1553_vm12, %vm1560_vm13  ;;  %vm1559_vm12 = vcmp.ge.s32.totalorder %v5485_v63, 0  ;;  %vm1566_vm13 = vcmp.lt.s32.totalorder %v5485_v63, 8 }
 0x176   : > { %v4428_v6 = vpop.f32.mrb[0].mxu0 }
 0x177   : > { %v4429_v8 = vpop.f32.mrb[1].mxu0 }
 0x178   : > { %v4430_v10 = vadd.f32 %v4429_v8, %v4428_v6  ;;  %v4431_v9 = vpop.f32.mrb[2].mxu0  ;;  %v5489_v6 = vadd.s32 5, %v1546_v42 }
 0x179   : > { %v4432_v12 = vpop.f32.mrb[3].mxu0 }
 0x17a   : > { %v4433_v13 = vadd.f32 %v4432_v12, %v4431_v9  ;;  %v1366_v25 = vadd.f32 %v4430_v10, %v5473_v20 }
 0x17c   : > { %v1369_v32 = vadd.f32 %v4433_v13, %v5473_v20 }
 0x17f   : > { %v4434_v14 = vpop.f32.mrb[4].mxu0 }
 0x180   : > { %v4435_v15 = vpop.f32.mrb[5].mxu0 }
 0x181   : > { %v4436_v16 = vadd.f32 %v4435_v15, %v4434_v14  ;;  %v4437_v17 = vpop.f32.mrb[6].mxu0 }
 0x182   : > { %v4438_v18 = vpop.f32.mrb[7].mxu0 }
 0x183   : > { %v4439_v19 = vadd.f32 %v4438_v18, %v4437_v17  ;;  %v1374_v43 = vadd.f32 %v4436_v16, %v5473_v20 }
 0x185   : > { %v4468_v21 = vpop.f32.mrb[0].mxu1  ;;  %v1377_v51 = vadd.f32 %v4439_v19, %v5473_v20 }
 0x186   : > { %v4469_v22 = vpop.f32.mrb[1].mxu1 }
 0x187   : > { %v4440_v24 = vpop.f32.mrb[8].mxu0  ;;  %v4470_v26 = vadd.f32 %v4469_v22, %v4468_v21  ;;  %v4471_v27 = vpop.f32.mrb[2].mxu1 }
 0x188   : > { %v4441_v28 = vpop.f32.mrb[9].mxu0  ;;  %v4472_v29 = vpop.f32.mrb[3].mxu1 }
 0x189   : > { %v4442_v30 = vadd.f32 %v4441_v28, %v4440_v24  ;;  %v4443_v31 = vpop.f32.mrb[10].mxu0  ;;  %v4473_v33 = vadd.f32 %v4472_v29, %v4471_v27  ;;  %v1430_v35 = vadd.f32 %v4470_v26, %v1366_v25 }
 0x18a   : > { %v4444_v34 = vpop.f32.mrb[11].mxu0 }
 0x18b   : > { %v4445_v36 = vadd.f32 %v4444_v34, %v4443_v31  ;;  %v1433_v38 = vadd.f32 %v4473_v33, %v1369_v32  ;;  %v1382_v1 = vadd.f32 %v4442_v30, %v5473_v20 }
 0x18d   : > { %v4474_v39 = vpop.f32.mrb[4].mxu1  ;;  %v1385_v2 = vadd.f32 %v4445_v36, %v5473_v20 }
 0x18e   : > { %v4475_v40 = vpop.f32.mrb[5].mxu1 }
 0x18f   : > { %v4446_v41 = vpop.f32.mrb[12].mxu0  ;;  %v4476_v45 = vadd.f32 %v4475_v40, %v4474_v39  ;;  %v4477_v46 = vpop.f32.mrb[6].mxu1 }
 0x190   : > { %v4447_v47 = vpop.f32.mrb[13].mxu0  ;;  %v4478_v48 = vpop.f32.mrb[7].mxu1 }
 0x191   : > { %v4448_v49 = vadd.f32 %v4447_v47, %v4446_v41  ;;  %v4449_v50 = vpop.f32.mrb[14].mxu0  ;;  %v4479_v52 = vadd.f32 %v4478_v48, %v4477_v46  ;;  %v1438_v54 = vadd.f32 %v4476_v45, %v1374_v43  ;;  %v1754_v45 = vld [vmem:[#allocation2 + $0x10] sm:$0xf] }
 0x192   : > { %v4450_v53 = vpop.f32.mrb[15].mxu0 }
 0x193   : > { %v1441_v57 = vadd.f32 %v4479_v52, %v1377_v51  ;;  %v1390_v31 = vadd.f32 %v4448_v49, %v5473_v20  ;;  %v1757_v52 = vld [vmem:[#allocation2 + $0x14] sm:$0x1] }
 0x195   : > { %v4480_v44 = vpop.f32.mrb[8].mxu1 }
 0x196   : > { %v4481_v0 = vpop.f32.mrb[9].mxu1 }
 0x197   : > { %v4647_v58 = vpop.f32.mrb[16].mxu0  ;;  %v4482_v60 = vadd.f32 %v4481_v0, %v4480_v44  ;;  %v4483_v61 = vpop.f32.mrb[10].mxu1  ;;  %v1742_v44 = vld [vmem:[#allocation2] sm:$0xf] }
 0x198   : > { %v1502_v11 = vadd.f32 %v4647_v58, %v1438_v54  ;;  %v1493_v62 = vpop.f32.mrb[17].mxu0  ;;  %v4484_v3 = vpop.f32.mrb[11].mxu1 }
 0x199   : > { %v1494_v4 = vadd.f32 %v1493_v62, %v1430_v35  ;;  %v4648_v5 = vpop.f32.mrb[18].mxu0  ;;  %v4485_v8 = vadd.f32 %v4484_v3, %v4483_v61  ;;  %v1446_v16 = vadd.f32 %v4482_v60, %v1382_v1 }
 0x19a   : > { %vm1525_vm5 = vcmp.ge.f32.partialorder %v1502_v11, 0.0  ;;  %v1532_v10 = vmul.f32 0.1, %v1502_v11  ;;  %v1505_v9 = vadd.f32 %v4648_v5, %v1441_v57  ;;  %v1496_v12 = vpop.f32.mrb[19].mxu0  ;;  %v1763_v5 = vld [vmem:[#allocation2 + $0x1c] sm:$0x1] }
 0x19b   : > { %vm1523_vm9 = vcmp.ge.f32.partialorder %v1494_v4, 0.0  ;;  %v1530_v13 = vmul.f32 0.1, %v1494_v4  ;;  %v1497_v15 = vadd.f32 %v1496_v12, %v1433_v38  ;;  %v5506_v21 = vadd.f32 %v4485_v8, %v1385_v2 }
 0x19c   : > { %v1539_v17 = vsel %vm1525_vm5, %v1502_v11, %v1532_v10  ;;  %vm1526_vm8 = vcmp.ge.f32.partialorder %v1505_v9, 0.0  ;;  %v1533_v18 = vmul.f32 0.1, %v1505_v9  ;;  %vm5528_vm5 = vmand %vm6320_vm1, %vm6319_vm0  ;;  %v1745_v11 = vld [vmem:[#allocation2 + $0x4] sm:$0x1] }
 0x19d   : > { %v1590_v22 = vsel %vm1569_vm6, %v1539_v17, 0.0  ;;  %v1537_v24 = vsel %vm1523_vm9, %v1494_v4, %v1530_v13  ;;  %vm1524_vm11 = vcmp.ge.f32.partialorder %v1497_v15, 0.0  ;;  %v1531_v25 = vmul.f32 0.1, %v1497_v15  ;;  %v4486_v27 = vpop.f32.mrb[12].mxu1  ;;  %vm5540_vm9 = vmand %vm1557_vm3, %vm1564_vm15 }
 0x19e   : > { %v4402_v26 = vpack.c.bf16 %v1590_v22, %v1590_v22  ;;  %v1588_v28 = vsel %vm5495_vm4, %v1537_v24, 0.0  ;;  %v1540_v29 = vsel %vm1526_vm8, %v1505_v9, %v1533_v18  ;;  %v4487_v33 = vpop.f32.mrb[13].mxu1  ;;  %vm1558_vm4 = vcmp.ge.s32.totalorder %v5489_v6, 0  ;;  %v1760_v4 = vld [vmem:[#allocation2 + $0x18] sm:$0xf]  ;;  %vm1573_vm3 = vmand %vm1559_vm12, %vm1566_vm13 }
 0x19f   : > { %v4400_v32 = vpack.c.bf16 %v1588_v28, %v1588_v28  ;;  %v1591_v34 = vsel %vm5502_vm10, %v1540_v29, 0.0  ;;  %v1538_v35 = vsel %vm1524_vm11, %v1497_v15, %v1531_v25  ;;  %v4651_v36 = vpop.f32.mrb[20].mxu0  ;;  %v4488_v40 = vadd.f32 %v4487_v33, %v4486_v27  ;;  %v4489_v42 = vpop.f32.mrb[14].mxu1  ;;  %v1748_v22 = vld [vmem:[#allocation2 + $0x8] sm:$0xf]  ;;  %vm6329_vm0 = vmmov %vm6320_vm1 }
 0x1a0   : > { %v1687_v38 = vshrl.u32 %v4402_v26, 16  ;;  %v1690_v39 = vshll.u32 %v4402_v26, 16  ;;  %v4403_v41 = vpack.c.bf16 %v1591_v34, %v1591_v34  ;;  %v1509_v43 = vpop.f32.mrb[21].mxu0  ;;  %v1589_v48 = vsel %vm5514_vm14, %v1538_v35, 0.0  ;;  %v4490_v20 = vpop.f32.mrb[15].mxu1 }
 0x1a1   : > { %v1671_v46 = vshrl.u32 %v4400_v32, 16  ;;  %v1674_v47 = vshll.u32 %v4400_v32, 16  ;;  %v1510_v49 = vadd.f32 %v1509_v43, %v1446_v16  ;;  %v4652_v50 = vpop.f32.mrb[22].mxu0  ;;  %vm1565_vm8 = vcmp.lt.s32.totalorder %v5489_v6, 8  ;;  %v1751_v24 = vld [vmem:[#allocation2 + $0xc] sm:$0x1] }
 0x1a2   : > { %v1689_v51 = vrot.slane %v1687_v38, 7  ;;  %v1695_v53 = vshrl.u32 %v4403_v41, 16  ;;  %v1698_v54 = vshll.u32 %v4403_v41, 16  ;;  %v4401_v55 = vpack.c.bf16 %v1589_v48, %v1589_v48  ;;  %v1512_v23 = vpop.f32.mrb[23].mxu0  ;;  %vm1572_vm12 = vmand %vm1558_vm4, %vm1565_vm8  ;;  %v4855_v41 = vld [vmem:[%s6288_s3 + $0x80] sm:$0xff]  }
 0x1a3   : > { %v1673_v57 = vrot.slane %v1671_v46, 7  ;;  %v1454_v0 = vadd.f32 %v4488_v40, %v1390_v31  ;;  %vm1527_vm6 = vcmp.ge.f32.partialorder %v1510_v49, 0.0  ;;  %v1534_v58 = vmul.f32 0.1, %v1510_v49  ;;  %v4854_v40 = vld [vmem:[%s6288_s3 + $0xc0] sm:$0xff]   ;;  %vm6327_vm4 = vmmov %vm6320_vm1 }
 0x1a4   : > { %v1692_v60 = vor.u32 %v1690_v39, %v1689_v51  ;;  %v1693_v61 = vrot.slane %v1689_v51, 4  ;;  %v1697_v62 = vrot.slane %v1695_v53, 7  ;;  %v1679_v1 = vshrl.u32 %v4401_v55, 16  ;;  %v4853_v39 = vld [vmem:[%s6288_s3 + $0x18] sm:$0xff]   ;;  %v1769_v48 = vld [vmem:[#allocation2 + $0x24] sm:$0x1]  ;;  %4534 = vmatprep.subr.bf16.mxu0 %v4854_v40  ;;  %vm6328_vm8 = vmmov %vm6320_vm1 }
 0x1a5   : > { %v1676_v2 = vor.u32 %v1674_v47, %v1673_v57  ;;  %v1677_v3 = vrot.slane %v1673_v57, 4  ;;  %v1682_v8 = vshll.u32 %v4401_v55, 16  ;;  %v1518_v10 = vadd.f32 %v4651_v36, %v1454_v0  ;;  %v1766_v47 = vld [vmem:[#allocation2 + $0x20] sm:$0xf]  ;;  %4535 = vmatpush3.bf16.msra.mxu0 %v4855_v41  ;;  %v1778_v53 = vld [vmem:[#allocation2 + $0x30] sm:$0xf]  ;;  %vm6330_vm1 = vmmov %vm6329_vm0 }
 0x1a6   : > { %v1755_v9 = vsel %vm5528_vm5, %v1692_v60, %v1754_v45  ;;  %v1758_v12 = vsel %vm5415_vm7, %v1693_v61, %v1757_v52  ;;  %v1700_v13 = vor.u32 %v1698_v54, %v1697_v62  ;;  %v1701_v14 = vrot.slane %v1697_v62, 4  ;;  %v1781_v54 = vld [vmem:[#allocation2 + $0x34] sm:$0x1]  ;;  %v4858_v41 = vld [vmem:[%s6288_s3 + $0xc8] sm:$0xff]  }
 0x1a7   : > { %1756 = vst [vmem:[#allocation2 + $0x10] sm:$0xf] %v1755_v9  ;;  %1759 = vst [vmem:[#allocation2 + $0x14] sm:$0x1] %v1758_v12  ;;  %v1743_v16 = vsel %vm5528_vm5, %v1676_v2, %v1742_v44  ;;  %v1746_v17 = vsel %vm5415_vm7, %v1677_v3, %v1745_v11  ;;  %v1681_v18 = vrot.slane %v1679_v1, 7  ;;  %vm1529_vm10 = vcmp.ge.f32.partialorder %v1518_v10, 0.0  ;;  %4536 = vmatprep.subr.bf16.mxu0 %v4858_v41 }
 0x1a8   : > { %1744 = vst [vmem:[#allocation2] sm:$0xf] %v1743_v16  ;;  %1747 = vst [vmem:[#allocation2 + $0x4] sm:$0x1] %v1746_v17  ;;  %v1761_v19 = vsel %vm5528_vm5, %v1700_v13, %v1760_v4  ;;  %v1764_v59 = vsel %vm5415_vm7, %v1701_v14, %v1763_v5  ;;  %v1536_v25 = vmul.f32 0.1, %v1518_v10  ;;  %v1541_v26 = vsel %vm1527_vm6, %v1510_v49, %v1534_v58 }
 0x1a9   : > { %1762 = vst [vmem:[#allocation2 + $0x18] sm:$0xf] %v1761_v19  ;;  %1765 = vst [vmem:[#allocation2 + $0x1c] sm:$0x1] %v1764_v59  ;;  %v1684_v27 = vor.u32 %v1682_v8, %v1681_v18  ;;  %v1685_v28 = vrot.slane %v1681_v18, 4  ;;  %v1592_v29 = vsel %vm5540_vm9, %v1541_v26, 0.0  ;;  %v1513_v30 = vadd.f32 %v1512_v23, %v5506_v21 }
 0x1aa   : > { %v1543_v31 = vsel %vm1529_vm10, %v1518_v10, %v1536_v25  ;;  %v4404_v32 = vpack.c.bf16 %v1592_v29, %v1592_v29  ;;  %v4852_v21 = vld [vmem:[%s6288_s3 + $0x58] sm:$0xff]   ;;  %v1772_v1 = vld [vmem:[#allocation2 + $0x28] sm:$0xf]  ;;  %v4856_v5 = vld [vmem:[%s6288_s3 + $0x60] sm:$0xff]   ;;  %vm1879_vm13 = vcmask 1042432   ;;  %vm1880_vm14 = vcmask 1046532  }
 0x1ab   : > { %v1749_v33 = vsel %vm5528_vm5, %v1684_v27, %v1748_v22  ;;  %v1752_v63 = vsel %vm5415_vm7, %v1685_v28, %v1751_v24  ;;  %v1594_v34 = vsel %vm1573_vm3, %v1543_v31, 0.0  ;;  %vm1528_vm11 = vcmp.ge.f32.partialorder %v1513_v30, 0.0  ;;  %4506 = vmatprep.subr.bf16.mxu1 %v4852_v21  ;;  %v1775_v9 = vld [vmem:[#allocation2 + $0x2c] sm:$0x1]  ;;  %v4857_v24 = vld [vmem:[%s6288_s3 + $0x20] sm:$0xff]   ;;  %vm5675_vm15 = vmor %vm1879_vm13, %vm1880_vm14 }
 0x1ac   : > { %1750 = vst [vmem:[#allocation2 + $0x8] sm:$0xf] %v1749_v33  ;;  %1753 = vst [vmem:[#allocation2 + $0xc] sm:$0x1] %v1752_v63  ;;  %v4406_v35 = vpack.c.bf16 %v1594_v34, %v1594_v34  ;;  %v1703_v36 = vshrl.u32 %v4404_v32, 16  ;;  %v1706_v6 = vshll.u32 %v4404_v32, 16  ;;  %4507 = vmatpush3.bf16.msra.mxu1 %v4853_v39 }
 0x1ad   : > { %v1535_v38 = vmul.f32 0.1, %v1513_v30  ;;  %4508 = vmatprep.subr.bf16.mxu1 %v4856_v5  ;;  %vm6331_vm6 = vmmov %vm6329_vm0  ;;  %vm6332_vm9 = vcmask 523264  }
 0x1ae   : > { %v1719_v42 = vshrl.u32 %v4406_v35, 16  ;;  %v1705_v43 = vrot.slane %v1703_v36, 7  ;;  %v1722_v46 = vshll.u32 %v4406_v35, 16  ;;  %v5589_v61 = vld [vmem:[#allocation2 + $0x10] sm:$0xf]  ;;  %vm6333_vm10 = vmmov %vm6332_vm9 }
 0x1af   : > { %v1542_v45 = vsel %vm1528_vm11, %v1513_v30, %v1535_v38  ;;  %v5585_v0 = vld [vmem:[#allocation2] sm:$0xf]  ;;  %v5599_v4 = vld [vmem:[#allocation2 + $0x4] sm:$0x1]  ;;  %v5611_v17 = vld [vmem:[#allocation2 + $0x10] sm:$0xf] }
 0x1b0   : > { %v1593_v20 = vsel %vm1572_vm12, %v1542_v45, 0.0  ;;  %v1721_v49 = vrot.slane %v1719_v42, 7  ;;  %v1708_v50 = vor.u32 %v1706_v6, %v1705_v43  ;;  %v1709_v51 = vrot.slane %v1705_v43, 4  ;;  %v5621_v30 = vld [vmem:[#allocation2 + $0x18] sm:$0xf]  ;;  %4509 = vmatpush3.bf16.msra.mxu1 %v4857_v24  ;;  %vm6334_vm3 = vmmov %vm6332_vm9 }
 0x1b1   : > { %v4405_v52 = vpack.c.bf16 %v1593_v20, %v1593_v20  ;;  %v1795_v12 = vshrl.u32 %v5585_v0, 16  ;;  %v1798_v13 = vshll.u32 %v5585_v0, 16  ;;  %v1804_v22 = vshll.u32 %v5599_v4, 16  ;;  %v5624_v32 = vld [vmem:[#allocation2 + $0x18] sm:$0xf]  ;;  %vm6335_vm11 = vmmov %vm6334_vm3 }
 0x1b2   : > { %v1724_v55 = vor.u32 %v1722_v46, %v1721_v49  ;;  %v1725_v23 = vrot.slane %v1721_v49, 4  ;;  %v1767_v57 = vsel %vm5528_vm5, %v1708_v50, %v1766_v47  ;;  %v1770_v44 = vsel %vm5415_vm7, %v1709_v51, %v1769_v48  ;;  %v5629_v36 = vld [vmem:[#allocation2 + $0x14] sm:$0x1]  ;;  %v5637_v46 = vld [vmem:[#allocation2 + $0x10] sm:$0xf]  ;;  %vm6336_vm12 = vmmov %vm6334_vm3 }
 0x1b3   : > { %1768 = vst [vmem:[#allocation2 + $0x20] sm:$0xf] %v1767_v57  ;;  %1771 = vst [vmem:[#allocation2 + $0x24] sm:$0x1] %v1770_v44  ;;  %v1711_v58 = vshrl.u32 %v4405_v52, 16  ;;  %v1714_v10 = vshll.u32 %v4405_v52, 16 }
 0x1b4   : > { %v5587_v60 = vld [vmem:[#allocation2 + $0x8] sm:$0xf]  ;;  %v1779_v11 = vsel %vm5528_vm5, %v1724_v55, %v1778_v53  ;;  %v1782_v62 = vsel %vm5415_vm7, %v1725_v23, %v1781_v54  ;;  %v5607_v14 = vld [vmem:[#allocation2 + $0xc] sm:$0x1]  ;;  %v1797_v59 = vrot.slane %v1795_v12, 4  ;;  %v1800_v25 = vrot.slane %v1798_v13, 5  ;;  %vm6337_vm13 = vmmov %vm6334_vm3 }
 0x1b5   : > { %v4206_v2 = vcombine.low %v5587_v60, %v5589_v61  ;;  %v5597_v3 = vld [vmem:[#allocation2 + $0x8] sm:$0xf]  ;;  %1780 = vst [vmem:[#allocation2 + $0x30] sm:$0xf] %v1779_v11  ;;  %1783 = vst [vmem:[#allocation2 + $0x34] sm:$0x1] %v1782_v62 }
 0x1b6   : > { %v1713_v8 = vrot.slane %v1711_v58, 7  ;;  %v1809_v15 = vshrl.u32 %v5597_v3, 16  ;;  %v1812_v16 = vshll.u32 %v5597_v3, 16  ;;  %v1818_v31 = vshll.u32 %v5607_v14, 16  ;;  %v5640_v47 = vld [vmem:[#allocation2 + $0x1c] sm:$0x1]  ;;  %vm6338_vm14 = vmmov %vm6334_vm3 }
 0x1b7   : > { %2219 = vrot.lane.b32.xlu1 %v4206_v2, %s5047_s19  ;;  %v1823_v33 = vshrl.u32 %v5611_v17, 16  ;;  %v1801_v34 = vor.u32 %v1800_v25, %v1797_v59  ;;  %v1826_v38 = vshll.u32 %v5611_v17, 16  ;;  %v1806_v39 = vrot.slane %v1804_v22, 5  ;;  %v5649_v53 = vld [vmem:[#allocation2 + $0x18] sm:$0xf]  ;;  %v4859_v54 = vld [vmem:[%s6288_s3 + $0x88] sm:$0xff]  }
 0x1b8   : > { %v1716_v18 = vor.u32 %v1714_v10, %v1713_v8  ;;  %v1717_v19 = vrot.slane %v1713_v8, 4  ;;  %v1811_v26 = vrot.slane %v1809_v15, 4  ;;  %v1814_v27 = vrot.slane %v1812_v16, 5  ;;  %v2024_v57 = vld [vmem:[#allocation2 + $0x14] sm:$0x1]  ;;  %v4860_v58 = vld [vmem:[%s6288_s3 + $0x68] sm:$0xff]   ;;  %4537 = vmatpush3.bf16.msra.mxu0 %v4859_v54 }
 0x1b9   : > { %v1820_v40 = vrot.slane %v1818_v31, 5  ;;  %v1802_v42 = vrot.slane %v1801_v34, 4  ;;  %v1825_v6 = vrot.slane %v1823_v33, 4  ;;  %v1828_v45 = vrot.slane %v1826_v38, 5  ;;  %v2025_v2 = vld [vmem:[#allocation2 + $0x1c] sm:$0x1]  ;;  %4510 = vmatprep.subr.bf16.mxu1 %v4860_v58 }
 0x1ba   : > { %v1773_v28 = vsel %vm5528_vm5, %v1716_v18, %v1772_v1  ;;  %v1776_v29 = vsel %vm5415_vm7, %v1717_v19, %v1775_v9  ;;  %v5627_v63 = vld [vmem:[#allocation2 + $0x20] sm:$0xf]  ;;  %v1815_v35 = vor.u32 %v1814_v27, %v1811_v26  ;;  %v1832_v48 = vshll.u32 %v5629_v36, 16  ;;  %v2099_v18 = vld [vmem:[#allocation2 + $0x10] sm:$0xe]  ;;  %v4861_v25 = vld [vmem:[%s6288_s3 + $0x28] sm:$0xff]  }
 0x1bb   : > { %1774 = vst [vmem:[#allocation2 + $0x28] sm:$0xf] %v1773_v28  ;;  %1777 = vst [vmem:[#allocation2 + $0x2c] sm:$0x1] %v1776_v29  ;;  %v4207_v21 = vcombine.low %v5621_v30, %v5627_v63  ;;  %v1837_v20 = vshrl.u32 %v5624_v32, 16  ;;  %v1807_v49 = vsel %vm5232_vm2, %v1802_v42, %v1806_v39  ;;  %v1829_v51 = vor.u32 %v1828_v45, %v1825_v6 }
 0x1bc   : > { %v1816_v43 = vrot.slane %v1815_v35, 4  ;;  %v1840_v52 = vshll.u32 %v5624_v32, 16  ;;  %v2030_v44 = vshrl.u32 %v5637_v46, 16  ;;  %v1846_v1 = vshll.u32 %v5640_v47, 16  ;;  %v2100_v24 = vld [vmem:[#allocation2 + $0x18] sm:$0xe]  ;;  %4511 = vmatpush3.bf16.msra.mxu1 %v4861_v25 }
 0x1bd   : > { %2221 = vrot.lane.b32.xlu1 %v4207_v21, %s5047_s19  ;;  %v1839_v23 = vrot.slane %v1837_v20, 4  ;;  %v1830_v11 = vrot.slane %v1829_v51, 4  ;;  %v2033_v5 = vshll.u32 %v5637_v46, 16  ;;  %v2044_v9 = vshrl.u32 %v5649_v53, 16  ;;  %v5679_v33 = vld [vmem:[#allocation2 + $0x20] sm:$0xf] }
 0x1be   : > { %v1821_v50 = vsel %vm5232_vm2, %v1816_v43, %v1820_v40  ;;  %v1842_v62 = vrot.slane %v1840_v52, 5  ;;  %v2032_v10 = vrot.slane %v2030_v44, 4  ;;  %v2047_v12 = vshll.u32 %v5649_v53, 16  ;;  %v5681_v39 = vld [vmem:[#allocation2 + $0x24] sm:$0x1]  ;;  %v4862_v40 = vld [vmem:[%s6288_s3 + $0xd0] sm:$0xff]  }
 0x1bf   : > { %v4195_v55 = vcombine.low %v1807_v49, %v1821_v50  ;;  %v1834_v15 = vrot.slane %v1832_v48, 5  ;;  %v2039_v16 = vshll.u32 %v2024_v57, 16  ;;  %v2035_v59 = vrot.slane %v2033_v5, 5  ;;  %v5686_v45 = vld [vmem:[#allocation2 + $0x20] sm:$0xf]  ;;  %4538 = vmatprep.subr.bf16.mxu0 %v4862_v40 }
 0x1c0   : > { %v1843_v19 = vor.u32 %v1842_v62, %v1839_v23  ;;  %v2046_v22 = vrot.slane %v2044_v9, 4  ;;  %v1848_v27 = vrot.slane %v1846_v1, 5  ;;  %v2049_v29 = vrot.slane %v2047_v12, 5  ;;  %v2026_v23 = vld [vmem:[#allocation2 + $0x24] sm:$0x1] }
 0x1c1   : > { %2160 = vrot.lane.b32.xlu0 %v4195_v55, %s5047_s19  ;;  %v1835_v26 = vsel %vm5232_vm2, %v1830_v11, %v1834_v15  ;;  %v2053_v31 = vshll.u32 %v2025_v2, 16  ;;  %v2036_v35 = vor.u32 %v2035_v59, %v2032_v10  ;;  %v4187_v38 = vrot.slane %v2099_v18, 9  ;;  %v4864_v15 = vld [vmem:[%s6288_s3 + $0x70] sm:$0xff]  }
 0x1c2   : > { %v5661_v8 = vld [vmem:[#allocation2 + $0x28] sm:$0xf]  ;;  %v1844_v34 = vrot.slane %v1843_v19, 4  ;;  %v2116_v21 = vrot.slane %v2024_v57, 5  ;;  %v2041_v41 = vrot.slane %v2039_v16, 5  ;;  %v2050_v42 = vor.u32 %v2049_v29, %v2046_v22  ;;  %v4863_v57 = vld [vmem:[%s6288_s3 + $0x90] sm:$0xff]   ;;  %4512 = vmatprep.subr.bf16.mxu1 %v4864_v15 }
 0x1c3   : > { %v4208_v13 = vcombine.low %v5661_v8, %v5661_v8  ;;  %v2055_v43 = vrot.slane %v2053_v31, 5  ;;  %v4188_v6 = vrot.slane %v2100_v24, 9  ;;  %v2037_v20 = vrot.slane %v2036_v35, 4  ;;  %v5703_v62 = vld [vmem:[#allocation2 + $0x28] sm:$0xf]  ;;  %4539 = vmatpush3.bf16.msra.mxu0 %v4863_v57  ;;  %v4865_v24 = vld [vmem:[%s6288_s3 + $0x30] sm:$0xff]  }
 0x1c4   : > { %v1849_v48 = vsel %vm5232_vm2, %v1844_v34, %v1848_v27  ;;  %v2117_v49 = vsel %vm5675_vm15, %v4187_v38, %v2116_v21  ;;  %v2120_v50 = vrot.slane %v2025_v2, 5  ;;  %v2051_v52 = vrot.slane %v2050_v42, 4  ;;  %v2101_v2 = vld [vmem:[#allocation2 + $0x20] sm:$0xe]  ;;  %v2027_v12 = vld [vmem:[#allocation2 + $0x2c] sm:$0x1]  ;;  %4513 = vmatpush3.bf16.msra.mxu1 %v4865_v24 }
 0x1c5   : > { %2223 = vrot.lane.b32.xlu1 %v4208_v13, %s5047_s19  ;;  %v4196_v51 = vcombine.low %v1835_v26, %v1849_v48  ;;  %2370 = vst.msk [vmem:[#allocation3 + $0x10] sm:$0xf] %vm6327_vm4, %v2117_v49  ;;  %v1851_v54 = vshrl.u32 %v5679_v33, 16  ;;  %v1854_v55 = vshll.u32 %v5679_v33, 16  ;;  %v2042_v44 = vsel %vm5232_vm2, %v2037_v20, %v2041_v41  ;;  %v2102_v22 = vld [vmem:[#allocation2 + $0x28] sm:$0xe]  ;;  %vm6339_vm4 = vmmov %vm6334_vm3 }
 0x1c6   : > { %v2121_v58 = vsel %vm5675_vm15, %v4188_v6, %v2120_v50  ;;  %v1860_v11 = vshll.u32 %v5681_v39, 16  ;;  %v2058_v1 = vshrl.u32 %v5686_v45, 16  ;;  %v2056_v5 = vsel %vm5232_vm2, %v2051_v52, %v2055_v43  ;;  %v5720_v31 = vld [vmem:[#allocation2 + $0xc] sm:$0x1]  ;;  %v1983_v34 = vld [vmem:[#allocation2 + $0x8] sm:$0xe] }
 0x1c7   : > { %2162 = vrot.lane.b32.xlu0 %v4196_v51, %s5047_s19  ;;  %2371 = vst.msk [vmem:[#allocation3 + $0x24] sm:$0xf] %vm6328_vm8, %v2121_v58  ;;  %v1853_v10 = vrot.slane %v1851_v54, 4  ;;  %v1856_v9 = vrot.slane %v1854_v55, 5  ;;  %v2061_v13 = vshll.u32 %v5686_v45, 16  ;;  %v1970_v16 = vshrl.u32 %v5661_v8, 16  ;;  %vm6340_vm8 = vmmov %vm6334_vm3 }
 0x1c8   : > { %v4228_v18 = vcombine.low %v2042_v44, %v2056_v5  ;;  %v2060_v19 = vrot.slane %v2058_v1, 4  ;;  %v2067_v59 = vshll.u32 %v2026_v23, 16  ;;  %v2072_v27 = vshrl.u32 %v5703_v62, 16  ;;  %v4866_v35 = vld [vmem:[%s6288_s3 + $0xd8] sm:$0xff]   ;;  %v5726_v42 = vld [vmem:[#allocation2 + $0x14] sm:$0x1] }
 0x1c9   : > { %v1857_v25 = vor.u32 %v1856_v9, %v1853_v10  ;;  %v2063_v26 = vrot.slane %v2061_v13, 5  ;;  %v2075_v29 = vshll.u32 %v5703_v62, 16  ;;  %v1862_v38 = vrot.slane %v1860_v11, 5  ;;  %v1984_v43 = vld [vmem:[#allocation2 + $0x10] sm:$0xe]  ;;  %4540 = vmatprep.subr.bf16.mxu0 %v4866_v35  ;;  %v4867_v51 = vld [vmem:[%s6288_s3 + $0x98] sm:$0xff]  }
 0x1ca   : > { %2332 = vrot.lane.b32.xlu1 %v4228_v18, %s5047_s19  ;;  %v2081_v21 = vshll.u32 %v2027_v12, 16  ;;  %v4189_v40 = vrot.slane %v2101_v2, 9  ;;  %v2124_v41 = vrot.slane %v2026_v23, 5  ;;  %v2074_v20 = vrot.slane %v2072_v27, 4  ;;  %v5728_v50 = vld [vmem:[#allocation2 + $0x30] sm:$0xf]  ;;  %4541 = vmatpush3.bf16.msra.mxu0 %v4867_v51 }
 0x1cb   : > { %v1858_v6 = vrot.slane %v1857_v25, 4  ;;  %v2064_v48 = vor.u32 %v2063_v26, %v2060_v19  ;;  %v2077_v49 = vrot.slane %v2075_v29, 5  ;;  %v2069_v52 = vrot.slane %v2067_v59, 5  ;;  %v5735_v57 = vld [vmem:[#allocation2 + $0x34] sm:$0x1]  ;;  %v4868_v44 = vld [vmem:[%s6288_s3 + $0x78] sm:$0xff]  }
 0x1cc   : > { %v2125_v54 = vsel %vm5675_vm15, %v4189_v40, %v2124_v41  ;;  %v4190_v55 = vrot.slane %v2102_v22, 9  ;;  %v2128_v23 = vrot.slane %v2027_v12, 5  ;;  %v4182_v2 = vrot.slane %v1983_v34, 9  ;;  %v2103_v5 = vld [vmem:[#allocation2 + $0x30] sm:$0xe]  ;;  %v4869_v10 = vld [vmem:[%s6288_s3 + $0x38] sm:$0xff]   ;;  %4514 = vmatprep.subr.bf16.mxu1 %v4868_v44 }
 0x1cd   : > { %v1863_v58 = vsel %vm5232_vm2, %v1858_v6, %v1862_v38  ;;  %v2065_v11 = vrot.slane %v2064_v48, 4  ;;  %v2078_v1 = vor.u32 %v2077_v49, %v2074_v20  ;;  %2372 = vst.msk [vmem:[#allocation3 + $0x38] sm:$0xf] %vm6329_vm0, %v2125_v54  ;;  %v4870_v9 = vld [vmem:[%s6288_s3 + $0xe0] sm:$0xff]   ;;  %v2000_v15 = vrot.slane %v5720_v31, 5  ;;  %4515 = vmatpush3.bf16.msra.mxu1 %v4869_v10  ;;  %v4875_v49 = vld [vmem:[%s6288_s3 + $0xe8] sm:$0xff]   ;;  %vm6341_vm0 = vmmov %vm6334_vm3 }
 0x1ce   : > { %v4197_v12 = vcombine.low %v1863_v58, %v1863_v58  ;;  %v2129_v13 = vsel %vm5675_vm15, %v4190_v55, %v2128_v23  ;;  %v4183_v18 = vrot.slane %v1984_v43, 9  ;;  %v5752_v19 = vld [vmem:[#allocation2 + $0x1c] sm:$0x1]  ;;  %v4871_v59 = vld [vmem:[%s6288_s3 + $0xa0] sm:$0xff]   ;;  %v2083_v24 = vrot.slane %v2081_v21, 5  ;;  %4542 = vmatprep.subr.bf16.mxu0 %v4870_v9  ;;  %v4877_v51 = vld [vmem:[%s6288_s3 + $0xa8] sm:$0xff]  }
 0x1cf   : > { %v2079_v22 = vrot.slane %v2078_v1, 4  ;;  %2373 = vst.msk [vmem:[#allocation3 + $0x4c] sm:$0xf] %vm6330_vm1, %v2129_v13  ;;  %v2004_v25 = vrot.slane %v5726_v42, 5  ;;  %v2086_v26 = vshrl.u32 %v5728_v50, 16  ;;  %v2070_v29 = vsel %vm5232_vm2, %v2065_v11, %v2069_v52  ;;  %4543 = vmatpush3.bf16.msra.mxu0 %v4871_v59  ;;  %v4880_v58 = vld [vmem:[%s6288_s3 + $0xf0] sm:$0xff]   ;;  %vm6342_vm1 = vmmov %vm6341_vm0 }
 0x1d0   : > { %v5760_v27 = vld [vmem:[#allocation2 + $0x24] sm:$0x1]  ;;  %2164 = vrot.lane.b32.xlu0 %v4197_v12, %s5047_s19  ;;  %v2001_v34 = vsel %vm5675_vm15, %v4182_v2, %v2000_v15  ;;  %v2089_v35 = vshll.u32 %v5728_v50, 16  ;;  %v4191_v38 = vrot.slane %v2103_v5, 9  ;;  %v1985_v21 = vld [vmem:[#allocation2 + $0x18] sm:$0xe]  ;;  %4544 = vmatprep.subr.bf16.mxu0 %v4875_v49 }
 0x1d1   : > { %v1986_v40 = vld [vmem:[#allocation2 + $0x20] sm:$0xe]  ;;  %v2084_v41 = vsel %vm5232_vm2, %v2079_v22, %v2083_v24  ;;  %v2005_v43 = vsel %vm5675_vm15, %v4183_v18, %v2004_v25  ;;  %v2088_v6 = vrot.slane %v2086_v26, 4  ;;  %v2132_v48 = vrot.slane %v5735_v57, 5  ;;  %v1987_v20 = vld [vmem:[#allocation2 + $0x28] sm:$0xe] }
 0x1d2   : > { %v4229_v52 = vcombine.low %v2070_v29, %v2084_v41  ;;  %v4217_v54 = vcombine.low %v2001_v34, %v2005_v43  ;;  %v2091_v55 = vrot.slane %v2089_v35, 5  ;;  %v2095_v23 = vshll.u32 %v5735_v57, 16  ;;  %v1912_v44 = vld [vmem:[#allocation2 + $0x2c] sm:$0x1]  ;;  %v4881_v15 = vld [vmem:[%s6288_s3 + $0xb0] sm:$0xff]   ;;  %v4884_v25 = vld [vmem:[%s6288_s3 + $0xf8] sm:$0xff]  }
 0x1d3   : > { %v2133_v11 = vsel %vm5675_vm15, %v4191_v38, %v2132_v48  ;;  %v4184_v1 = vrot.slane %v1985_v21, 9  ;;  %v2008_v2 = vrot.slane %v5752_v19, 5  ;;  %v4185_v5 = vrot.slane %v1986_v40, 9  ;;  %4545 = vmatpush3.bf16.msra.mxu0 %v4877_v51  ;;  %v4886_v40 = vld [vmem:[%s6288_s3 + $0xb8] sm:$0xff]   ;;  %v1865_v49 = vld [vmem:[#allocation2 + $0x8] sm:$0xe] }
 0x1d4   : > { %v1973_v10 = vshll.u32 %v5661_v8, 16  ;;  %2334 = vrot.lane.b32.xlu1 %v4229_v52, %s5047_s19  ;;  %2273 = vrot.lane.b32.xlu0 %v4217_v54, %s5047_s19  ;;  %v2092_v57 = vor.u32 %v2091_v55, %v2088_v6  ;;  %2374 = vst.msk [vmem:[#allocation3 + $0x60] sm:$0xf] %vm6331_vm6, %v2133_v11  ;;  %v2012_v9 = vrot.slane %v5760_v27, 5  ;;  %v4186_v12 = vrot.slane %v1987_v20, 9  ;;  %vm6343_vm6 = vmmov %vm6341_vm0 }
 0x1d5   : > { %v2016_v13 = vrot.slane %v1912_v44, 5  ;;  %v2097_v59 = vrot.slane %v2095_v23, 5  ;;  %v2009_v22 = vsel %vm5675_vm15, %v4184_v1, %v2008_v2  ;;  %4546 = vmatprep.subr.bf16.mxu0 %v4880_v58  ;;  %v1972_v29 = vrot.slane %v1970_v16, 4  ;;  %v1864_v51 = vld [vmem:[#allocation2] sm:$0xe] }
 0x1d6   : > { %v2093_v18 = vrot.slane %v2092_v57, 4  ;;  %v2013_v24 = vsel %vm5675_vm15, %v4185_v5, %v2012_v9  ;;  %v1975_v34 = vrot.slane %v1973_v10, 5  ;;  %v1979_v41 = vshll.u32 %v1912_v44, 16  ;;  %v1867_v58 = vld [vmem:[#allocation2 + $0x18] sm:$0xe] }
 0x1d7   : > { %v4218_v26 = vcombine.low %v2009_v22, %v2013_v24  ;;  %v2017_v38 = vsel %vm5675_vm15, %v4186_v12, %v2016_v13  ;;  %4547 = vmatpush3.bf16.msra.mxu0 %v4881_v15  ;;  %v5048_v43 = vmov 0.0   ;;  %v1888_v52 = vrot.slane %v5607_v14, 5  ;;  %v1866_v1 = vld [vmem:[#allocation2 + $0x10] sm:$0xe] }
 0x1d8   : > { %v2098_v35 = vsel %vm5232_vm2, %v2093_v18, %v2097_v59  ;;  %4548 = vmatprep.subr.bf16.mxu0 %v4884_v25  ;;  %v4219_v8 = vcombine.low %v2017_v38, %v2017_v38  ;;  %v1976_v16 = vor.u32 %v1975_v34, %v1972_v29  ;;  %4653 = vmatprep.subr.bf16.mxu1 %v5048_v43  ;;  %v1981_v48 = vrot.slane %v1979_v41, 5  ;;  %v1868_v18 = vld [vmem:[#allocation2 + $0x20] sm:$0xe] }
 0x1d9   : > { %v4230_v21 = vcombine.low %v2098_v35, %v2098_v35  ;;  %2275 = vrot.lane.b32.xlu0 %v4218_v26, %s5047_s19  ;;  %v4178_v54 = vrot.slane %v1865_v49, 9  ;;  %v4177_v55 = vrot.slane %v1864_v51, 9  ;;  %v1884_v23 = vrot.slane %v5599_v4, 5 }
 0x1da   : > { %v1977_v6 = vrot.slane %v1976_v16, 4  ;;  %v4180_v5 = vrot.slane %v1867_v58, 9  ;;  %v1896_v10 = vrot.slane %v5640_v47, 5  ;;  %v4179_v14 = vrot.slane %v1866_v1, 9 }
 0x1db   : > { %2336 = vrot.lane.b32.xlu1 %v4230_v21, %s5047_s19  ;;  %4549 = vmatpush3.bf16.msra.mxu0 %v4886_v40  ;;  %v1889_v44 = vsel %vm5675_vm15, %v4178_v54, %v1888_v52  ;;  %v1885_v11 = vsel %vm5675_vm15, %v4177_v55, %v1884_v23  ;;  %v1892_v12 = vrot.slane %v5629_v36, 5  ;;  %v4181_v24 = vrot.slane %v1868_v18, 9 }
 0x1dc   : > { %v5816_v20 = vsel %vm5232_vm2, %v1977_v6, %v1981_v48  ;;  %v4203_v2 = vcombine.low %v1885_v11, %v1889_v44  ;;  %v1897_v15 = vsel %vm5675_vm15, %v4180_v5, %v1896_v10  ;;  %v1900_v47 = vrot.slane %v5681_v39, 5  ;;  %v4876_v10 = vld [vmem:[%s6288_s3 + $0x100] sm:$0xff]  }
 0x1dd   : > { %2277 = vrot.lane.b32.xlu0 %v4219_v8, %s5047_s19  ;;  %v1893_v59 = vsel %vm5675_vm15, %v4179_v14, %v1892_v12  ;;  %v4192_v34 = vcombine.low %v5585_v0, %v5597_v3  ;;  %v1914_v21 = vshrl.u32 %v5587_v60, 16  ;;  %v1917_v39 = vshll.u32 %v5587_v60, 16 }
 0x1de   : > { %v4204_v22 = vcombine.low %v1893_v59, %v1897_v15  ;;  %v1901_v35 = vsel %vm5675_vm15, %v4181_v24, %v1900_v47  ;;  %v1928_v48 = vshrl.u32 %v5589_v61, 16  ;;  %v1931_v0 = vshll.u32 %v5589_v61, 16 }
 0x1df   : > { %v4205_v41 = vcombine.low %v1901_v35, %v1901_v35  ;;  %v1916_v51 = vrot.slane %v1914_v21, 4  ;;  %v1919_v52 = vrot.slane %v1917_v39, 5  ;;  %v1956_v54 = vshrl.u32 %v5627_v63, 16  ;;  %v4890_v39 = vld [vmem:[%s6288_s3 + $0x110] sm:$0xff]  }
 0x1e0   : > { %v1959_v55 = vshll.u32 %v5627_v63, 16  ;;  %v1930_v60 = vrot.slane %v1928_v48, 4  ;;  %v1933_v23 = vrot.slane %v1931_v0, 5  ;;  %v4193_v44 = vcombine.low %v5611_v17, %v5624_v32 }
 0x1e1   : > { %v1942_v58 = vshrl.u32 %v5621_v30, 16  ;;  %v1945_v61 = vshll.u32 %v5621_v30, 16  ;;  %v1958_v1 = vrot.slane %v1956_v54, 4  ;;  %v1920_v5 = vor.u32 %v1919_v52, %v1916_v51 }
 0x1e2   : > { %v1961_v63 = vrot.slane %v1959_v55, 5  ;;  %v4225_v14 = vcombine.low %v5637_v46, %v5649_v53  ;;  %v1923_v12 = vshll.u32 %v5720_v31, 16  ;;  %v1934_v30 = vor.u32 %v1933_v23, %v1930_v60  ;;  %v4882_v53 = vld [vmem:[%s6288_s3 + $0x108] sm:$0xff]   ;;  %v4894_v23 = vld [vmem:[%s6288_s3 + $0x118] sm:$0xff]  }
 0x1e3   : > { %v1947_v15 = vrot.slane %v1945_v61, 5  ;;  %v1921_v24 = vrot.slane %v1920_v5, 4  ;;  %v1937_v47 = vshll.u32 %v5726_v42, 16  ;;  %v1951_v21 = vshll.u32 %v5752_v19, 16 }
 0x1e4   : > { %v1962_v46 = vor.u32 %v1961_v63, %v1958_v1  ;;  %v1925_v31 = vrot.slane %v1923_v12, 5 }
 0x1e5   : > { %v1939_v35 = vrot.slane %v1937_v47, 5  ;;  %v1953_v52 = vrot.slane %v1951_v21, 5  ;;  %v4913_v21 = vld [vmem:[%s6290_s5 + $0x18] sm:$0xff]  }
 0x229   : > { %v2220_v57 = vpop.permute.xlu1 %2219 }
 0x22a   : > { %v2227_v9 = vsel %vm6332_vm9, %v4203_v2, %v2220_v57  ;;  %vm5049_vm9 = vmmov 0  }
 0x22b   : > { %v4209_v13 = vcombine.low %v2227_v9, %v2227_v9  ;;  %v4210_v4 = vcombine.high %v2227_v9, %v2227_v9 }
 0x22d   : > { %2252 = vst [vmem:[#allocation3 + $0x4] sm:$0xf] %v4209_v13  ;;  %2253 = vst [vmem:[#allocation3 + $0x18] sm:$0xf] %v4210_v4  ;;  %v1944_v4 = vrot.slane %v1942_v58, 4 }
 0x22f   : > { %v2222_v25 = vpop.permute.xlu1 %2221 }
 0x230   : > { %v2230_v26 = vsel %vm6333_vm10, %v4204_v22, %v2222_v25  ;;  %v1935_v25 = vrot.slane %v1934_v30, 4  ;;  %vm6344_vm10 = vmmov %vm6341_vm0 }
 0x231   : > { %v4211_v29 = vcombine.low %v2230_v26, %v2230_v26  ;;  %v4212_v36 = vcombine.high %v2230_v26, %v2230_v26  ;;  %v4194_v26 = vcombine.low %v5679_v33, %v5679_v33 }
 0x232   : > { %v1940_v33 = vsel %vm5232_vm2, %v1935_v25, %v1939_v35  ;;  %v4905_v25 = vld [vmem:[%s6290_s5 + $0x48] sm:$0xff]   ;;  %v4909_v35 = vld [vmem:[%s6290_s5 + $0x10] sm:$0xff]  }
 0x233   : > { %2254 = vst [vmem:[#allocation3 + $0x2c] sm:$0xf] %v4211_v29  ;;  %2255 = vst [vmem:[#allocation3 + $0x40] sm:$0xf] %v4212_v36  ;;  %v2161_v38 = vpop.permute.xlu0 %2160  ;;  %v1948_v29 = vor.u32 %v1947_v15, %v1944_v4  ;;  %v1965_v36 = vshll.u32 %v5760_v27, 16 }
 0x234   : > { %v2168_v40 = vsel %vm6334_vm3, %v4192_v34, %v2161_v38  ;;  %v4872_v17 = vld [vmem:[#allocation3 + $0x4] ss:$20 sps:$4 sm:$0xff]   ;;  %v1926_v34 = vsel %vm5232_vm2, %v1921_v24, %v1925_v31  ;;  %vm6345_vm3 = vmmov %vm6341_vm0  ;;  %v4904_v31 = vld [vmem:[%s6290_s5] sm:$0xff]  }
 0x235   : > { %v4198_v8 = vcombine.low %v2168_v40, %v2168_v40  ;;  %v4199_v16 = vcombine.high %v2168_v40, %v2168_v40  ;;  %2793 = vmatprep.mubr.bf16.mxu1 %v4872_v17  ;;  %v1963_v40 = vrot.slane %v1962_v46, 4  ;;  %v1967_v48 = vrot.slane %v1965_v36, 5  ;;  %v4897_v15 = vld [vmem:[#allocation3 + $0x10] ss:$20 sps:$4 sm:$0xff]   ;;  %v4899_v24 = vld [vmem:[#allocation3 + $0x38] ss:$20 sps:$4 sm:$0xff]  }
 0x236   : > { %v4900_v46 = vld [vmem:[#allocation3 + $0x60] ss:$0 sps:$4 sm:$0xff]   ;;  %v4912_v36 = vld [vmem:[%s6290_s5 + $0xc8] sm:$0xff]  }
 0x237   : > { %v2224_v6 = vpop.permute.xlu1 %2223  ;;  %2193 = vst [vmem:[#allocation3] sm:$0xf] %v4198_v8  ;;  %2194 = vst [vmem:[#allocation3 + $0x14] sm:$0xf] %v4199_v16  ;;  %v4226_v16 = vcombine.low %v5686_v45, %v5703_v62  ;;  %v1968_v54 = vsel %vm5232_vm2, %v1963_v40, %v1967_v48 }
 0x238   : > { %v2233_v3 = vsel %vm6335_vm11, %v4205_v41, %v2224_v6  ;;  %v4214_v41 = vcombine.low %v1926_v34, %v1940_v33  ;;  %v1949_v6 = vrot.slane %v1948_v29, 4  ;;  %vm6346_vm11 = vmmov %vm6341_vm0  ;;  %v4906_v29 = vld [vmem:[%s6290_s5 + $0x8] sm:$0xff]  }
 0x239   : > { %v4213_v49 = vcombine.low %v2233_v3, %v2233_v3  ;;  %v2163_v11 = vpop.permute.xlu0 %2162  ;;  %v4914_v34 = vld [vmem:[%s6290_s5 + $0x88] sm:$0xff]  }
 0x23a   : > { %v2171_v2 = vsel %vm6336_vm12, %v4193_v44, %v2163_v11  ;;  %v4878_v27 = vld [vmem:[#allocation3 + $0x2c] ss:$20 sps:$4 sm:$0xff]   ;;  %v1954_v44 = vsel %vm5232_vm2, %v1949_v6, %v1953_v52  ;;  %v4227_v11 = vcombine.low %v5728_v50, %v5728_v50  ;;  %v5943_v52 = vld [vmem:[%s6289_s4] ss:$0 sm:$0xff] }
 0x23b   : > { %2256 = vst [vmem:[#allocation3 + $0x54] sm:$0xf] %v4213_v49  ;;  %v4200_v57 = vcombine.low %v2171_v2, %v2171_v2  ;;  %v4201_v9 = vcombine.high %v2171_v2, %v2171_v2  ;;  %v4215_v58 = vcombine.low %v1954_v44, %v1968_v54 }
 0x23c   : > { %v2333_v32 = vpop.permute.xlu1 %2332 }
 0x23d   : > { %2195 = vst [vmem:[#allocation3 + $0x28] sm:$0xf] %v4200_v57  ;;  %2196 = vst [vmem:[#allocation3 + $0x3c] sm:$0xf] %v4201_v9  ;;  %v2340_v18 = vsel %vm6337_vm13, %v4225_v14, %v2333_v32  ;;  %v4216_v9 = vcombine.low %v5816_v20, %v5816_v20 }
 0x23e   : > { %v4874_v13 = vld [vmem:[#allocation3] ss:$20 sps:$4 sm:$0xff]   ;;  %v4231_v59 = vcombine.low %v2340_v18, %v2340_v18  ;;  %v4232_v22 = vcombine.high %v2340_v18, %v2340_v18 }
 0x23f   : > { %2794 = vmatmul.mubr.bf16.vlgmr.msra.gmra.mrb[16].mxu1 %v4874_v13 }
 0x240   : > { %4654 = vmatpush3.bf16.msra.mxu1 %v4876_v10  ;;  %2365 = vst [vmem:[#allocation3 + $0xc] sm:$0xf] %v4231_v59  ;;  %2366 = vst [vmem:[#allocation3 + $0x20] sm:$0xf] %v4232_v22  ;;  %2801 = vmatprep.mubr.bf16.mxu1 %v4878_v27 }
 0x241   : > { %4655 = vmatprep.subr.bf16.mxu1 %v5048_v43 }
 0x242   : > { %v2165_v42 = vpop.permute.xlu0 %2164 }
 0x243   : > { %v2174_v38 = vsel %vm6338_vm14, %v4194_v26, %v2165_v42  ;;  %v4910_v26 = vld [vmem:[%s6290_s5 + $0x80] sm:$0xff]   ;;  %v4907_v42 = vld [vmem:[%s6290_s5 + $0x50] sm:$0xff]  }
 0x244   : > { %4656 = vmatpush3.bf16.msra.mxu1 %v4882_v53  ;;  %v4202_v8 = vcombine.low %v2174_v38, %v2174_v38  ;;  %v4883_v19 = vld [vmem:[#allocation3 + $0x28] ss:$20 sps:$4 sm:$0xff]   ;;  %v4911_v38 = vld [vmem:[%s6290_s5 + $0x58] sm:$0xff]  }
 0x245   : > { %4657 = vmatprep.subr.bf16.mxu1 %v5048_v43  ;;  %v4903_v53 = vld [vmem:[%s6290_s5 + $0x40] sm:$0xff]  }
 0x246   : > { %2197 = vst [vmem:[#allocation3 + $0x50] sm:$0xf] %v4202_v8  ;;  %v2335_v0 = vpop.permute.xlu1 %2334  ;;  %v2274_v3 = vpop.permute.xlu0 %2273 }
 0x247   : > { %v2343_v49 = vsel %vm6339_vm4, %v4226_v16, %v2335_v0  ;;  %v2281_v51 = vsel %vm6340_vm8, %v4214_v41, %v2274_v3  ;;  %2802 = vmatmul.mubr.bf16.gmra.mrb[20].mxu1 %v4883_v19  ;;  %v4887_v13 = vld [vmem:[#allocation3 + $0xc] ss:$20 sps:$4 sm:$0xff]  }
 0x248   : > { %v4233_v55 = vcombine.low %v2343_v49, %v2343_v49  ;;  %v4234_v60 = vcombine.high %v2343_v49, %v2343_v49  ;;  %v4220_v45 = vcombine.low %v2281_v51, %v2281_v51  ;;  %v4221_v62 = vcombine.high %v2281_v51, %v2281_v51  ;;  %4658 = vmatpush3.bf16.msra.mxu1 %v4890_v39 }
 0x249   : > { %4659 = vmatprep.subr.bf16.mxu1 %v5048_v43  ;;  %2849 = vmatprep.mubr.bf16.mxu0 %v4887_v13 }
 0x24a   : > { %2367 = vst [vmem:[#allocation3 + $0x34] sm:$0xf] %v4233_v55  ;;  %2368 = vst [vmem:[#allocation3 + $0x48] sm:$0xf] %v4234_v60 }
 0x24b   : > { %2306 = vst [vmem:[#allocation3 + $0x8] sm:$0xf] %v4220_v45  ;;  %2307 = vst [vmem:[#allocation3 + $0x1c] sm:$0xf] %v4221_v62  ;;  %v2276_v61 = vpop.permute.xlu0 %2275  ;;  %v2945_v62 = vstv %s4291_s27  ;;  %s295_s27 = scalar_lea.vmem [#allocation4], %s4685_s12 }
 0x24c   : > { %v2284_v1 = vsel %vm6341_vm0, %v4215_v58, %v2276_v61  ;;  %4660 = vmatpush3.bf16.msra.mxu1 %v4894_v23  ;;  %vm2950_vm12 = vcmp.ge.s32.totalorder %v2945_v62, 0  ;;  %vm2955_vm13 = vcmp.lt.s32.totalorder %v2945_v62, 8  ;;  %s3954_s22 = sshll.u32 %s295_s27, 4  ;;  %s6224_s22 = int_to_ptr.vmem [resolvable:$true] %s3954_s22 }
 0x24d   : > { %v2337_v2 = vpop.permute.xlu1 %2336  ;;  %v4222_v5 = vcombine.low %v2284_v1, %v2284_v1  ;;  %v4223_v10 = vcombine.high %v2284_v1, %v2284_v1  ;;  %v2387_v63 = vld [vmem:[#allocation3 + $0x50] sm:$0xff]  ;;  %4575 = vmatprep.subr.bf16.mxu1 %v4903_v53  ;;  %v2946_v1 = vadd.s32 1, %v2945_v62  ;;  %vm2960_vm0 = vmand %vm2950_vm12, %vm2955_vm13  ;;  %s4951_s20 = scalar_lea.vmem %s6224_s22, 384  ;;  %p4958_p4 = scmp.lt.s32.totalorder %s6224_s22, %s4956_s17 }
 0x24e   : > { %v2346_v57 = vsel %vm6342_vm1, %v4227_v11, %v2337_v2  ;;  %v4248_v14 = vcombine.high %v2387_v63, %v2387_v63  ;;  %v4247_v12 = vcombine.low %v2387_v63, %v2387_v63  ;;  %p4952_p0 = scmp.ne.s32.totalorder %s6224_s22, %s4951_s20  ;;  %p4959_p5 = scmp.lt.s32.totalorder %s4957_s23, %s4951_s20 }
 0x24f   : > { %v4235_v17 = vcombine.low %v2346_v57, %v2346_v57  ;;  %2308 = vst [vmem:[#allocation3 + $0x30] sm:$0xf] %v4222_v5  ;;  %2309 = vst [vmem:[#allocation3 + $0x44] sm:$0xf] %v4223_v10  ;;  %v2278_v32 = vpop.permute.xlu0 %2277  ;;  %vm2951_vm14 = vcmp.ge.s32.totalorder %v2946_v1, 0  ;;  %vm2956_vm4 = vcmp.lt.s32.totalorder %v2946_v1, 8 }
 0x250   : > { %v2287_v50 = vsel %vm6343_vm6, %v4216_v9, %v2278_v32  ;;  %2809 = vmatprep.mubr.bf16.mxu1 %v4248_v14  ;;  %vm2961_vm6 = vmand %vm2951_vm14, %vm2956_vm4  ;;  %v4916_v1 = vld [vmem:[%s6290_s5 + $0xd0] sm:$0xff]   ;;  %p4953_p1 = pnand %p4952_p0, %p5144_p3  ;;  %p4960_p6 = por %p4959_p5, %p4958_p4 }
 0x251   : > { %2369 = vst [vmem:[#allocation3 + $0x5c] sm:$0xf] %v4235_v17  ;;  %v4224_v30 = vcombine.low %v2287_v50, %v2287_v50  ;;  %2810 = vmatmul.mubr.bf16.gmra.mrb[24].mxu1 %v4247_v12  ;;  %v4891_v20 = vld [vmem:[#allocation3 + $0x34] ss:$20 sps:$4 sm:$0xff]  }
 0x252   : > { %v4889_v4 = vld [vmem:[#allocation3 + $0x8] ss:$20 sps:$4 sm:$0xff]   ;;  %4661 = vmatprep.mubr.msk.bf16.mxu1 %vm5049_vm9, %v5048_v43  ;;  %p4954_p2 = pneg %p4953_p1 }
 0x253   : > { %2310 = vst [vmem:[#allocation3 + $0x58] sm:$0xf] %v4224_v30  ;;  %2850 = vmatmul.mubr.bf16.vlgmr.msra.gmra.mrb[24].mxu0 %v4889_v4 }
 0x254   : > { %2857 = vmatprep.mubr.bf16.mxu0 %v4891_v20  ;;  %v2947_v20 = vadd.s32 2, %v2945_v62  ;;  %p4961_p7 = pnand %p4960_p6, %p4954_p2 }
 0x256   : > { %v4895_v18 = vld [vmem:[#allocation3 + $0x30] ss:$20 sps:$4 sm:$0xff]  }
 0x259   : > { %4662 = vmatmul.mubr.msk.bf16.vlgmr.msra.gmra.mrb[28].mxu1 %vm6344_vm10, %v4897_v15  ;;  %vm2957_vm10 = vcmp.lt.s32.totalorder %v2947_v20, 8 }
 0x25a   : > { %v2388_v59 = vld [vmem:[#allocation3 + $0x58] sm:$0xff]  ;;  %4665 = vmatprep.mubr.msk.bf16.mxu1 %vm5049_vm9, %v5048_v43  ;;  %4576 = vmatpush3.bf16.msra.mxu1 %v4904_v31 }
 0x25b   : > { %v4250_v22 = vcombine.high %v2388_v59, %v2388_v59  ;;  %2858 = vmatmul.mubr.bf16.gmra.mrb[28].mxu0 %v4895_v18  ;;  %v4249_v47 = vcombine.low %v2388_v59, %v2388_v59  ;;  %4577 = vmatprep.subr.bf16.mxu1 %v4905_v25 }
 0x25d   : > { %2865 = vmatprep.mubr.bf16.mxu0 %v4250_v22 }
 0x25e   : > { %4578 = vmatpush3.bf16.msra.mxu1 %v4906_v29 }
 0x25f   : > { %4579 = vmatprep.subr.bf16.mxu1 %v4907_v42  ;;  %v5953_v42 = vadd.s32 4, %v2945_v62 }
 0x261   : > { %4666 = vmatmul.mubr.msk.bf16.gmra.mrb[32].mxu1 %vm6345_vm3, %v4899_v24  ;;  %vm2954_vm13 = vcmp.ge.s32.totalorder %v5953_v42, 0 }
 0x262   : > { %4669 = vmatprep.mubr.msk.bf16.mxu1 %vm5049_vm9, %v5048_v43  ;;  %v4908_v43 = vld [vmem:[%s6290_s5 + $0xc0] sm:$0xff]   ;;  %4580 = vmatpush3.bf16.msra.mxu1 %v4909_v35  ;;  %vm2952_vm9 = vcmp.ge.s32.totalorder %v2947_v20, 0 }
 0x263   : > { %2866 = vmatmul.mubr.bf16.gmra.mrb[32].mxu0 %v4249_v47  ;;  %4603 = vmatprep.subr.bf16.mxu0 %v4908_v43  ;;  %vm5958_vm14 = vmand %vm2952_vm9, %vm2957_vm10  ;;  %vm6354_vm10 = vcmask 523264  }
 0x264   : > { %4604 = vmatpush3.bf16.msra.mxu0 %v4910_v26  ;;  %4581 = vmatprep.subr.bf16.mxu1 %v4911_v38 }
 0x265   : > { %4605 = vmatprep.subr.bf16.mxu0 %v4912_v36 }
 0x266   : > { %4582 = vmatpush3.bf16.msra.mxu1 %v4913_v21 }
 0x268   : > { %4606 = vmatpush3.bf16.msra.mxu0 %v4914_v34 }
 0x269   : > { %4670 = vmatmul.mubr.msk.bf16.gmra.mrb[36].mxu1 %vm6346_vm11, %v4900_v46  ;;  %v2948_v46 = vadd.s32 3, %v2945_v62  ;;  %4607 = vmatprep.subr.bf16.mxu0 %v4916_v1 }
 0x26b   : > { %vm2953_vm3 = vcmp.ge.s32.totalorder %v2948_v46, 0  ;;  %vm2958_vm11 = vcmp.lt.s32.totalorder %v2948_v46, 8 }
 0x312   : > { %v4516_v40 = vpop.f32.mrb[16].mxu1 }
 0x313   : > { %v4517_v39 = vpop.f32.mrb[17].mxu1 }
 0x314   : > { %v4518_v8 = vadd.f32 %v4517_v39, %v4516_v40  ;;  %v4519_v33 = vpop.f32.mrb[18].mxu1 }
 0x315   : > { %v4520_v27 = vpop.f32.mrb[19].mxu1 }
 0x316   : > { %v4521_v16 = vadd.f32 %v4520_v27, %v4519_v33  ;;  %v2796_v44 = vadd.f32 %v4518_v8, %v5943_v52 }
 0x318   : > { %v2799_v2 = vadd.f32 %v4521_v16, %v5943_v52 }
 0x31a   : > { %v4522_v41 = vpop.f32.mrb[20].mxu1 }
 0x31b   : > { %v4523_v6 = vpop.f32.mrb[21].mxu1 }
 0x31c   : > { %v4524_v48 = vadd.f32 %v4523_v6, %v4522_v41  ;;  %v4525_v19 = vpop.f32.mrb[22].mxu1 }
 0x31d   : > { %v4526_v0 = vpop.f32.mrb[23].mxu1 }
 0x31e   : > { %v4527_v3 = vadd.f32 %v4526_v0, %v4525_v19  ;;  %v2804_v13 = vadd.f32 %v4524_v48, %v5943_v52 }
 0x320   : > { %v2807_v26 = vadd.f32 %v4527_v3, %v5943_v52 }
 0x324   : > { %v4528_v49 = vpop.f32.mrb[24].mxu1 }
 0x325   : > { %v4529_v51 = vpop.f32.mrb[25].mxu1 }
 0x326   : > { %v5945_v54 = vadd.f32 %v4529_v51, %v4528_v49  ;;  %v4531_v55 = vpop.f32.mrb[26].mxu1  ;;  %v4550_v60 = vpop.f32.mrb[24].mxu0  ;;  %v3050_v51 = vld [vmem:[#allocation2] sm:$0xf] }
 0x327   : > { %v4532_v45 = vpop.f32.mrb[27].mxu1  ;;  %v4551_v23 = vpop.f32.mrb[25].mxu0 }
 0x328   : > { %v4552_v58 = vadd.f32 %v4551_v23, %v4550_v60  ;;  %v4553_v61 = vpop.f32.mrb[26].mxu0  ;;  %v2812_v23 = vadd.f32 %v5945_v54, %v5943_v52  ;;  %v3056_v54 = vld [vmem:[#allocation2 + $0x8] sm:$0xf] }
 0x329   : > { %v4554_v11 = vpop.f32.mrb[27].mxu0 }
 0x32a   : > { %v4555_v5 = vadd.f32 %v4554_v11, %v4553_v61  ;;  %v2852_v10 = vadd.f32 %v4552_v58, %v2796_v44  ;;  %v3053_v44 = vld [vmem:[#allocation2 + $0x4] sm:$0x1] }
 0x32c   : > { %v2907_v63 = vpop.f32.mrb[28].mxu1  ;;  %v2855_v14 = vadd.f32 %v4555_v5, %v2799_v2 }
 0x32d   : > { %v2908_v57 = vadd.f32 %v2907_v63, %v2852_v10  ;;  %v4663_v9 = vpop.f32.mrb[29].mxu1  ;;  %v3059_v63 = vld [vmem:[#allocation2 + $0xc] sm:$0x1] }
 0x32e   : > { %v2910_v17 = vpop.f32.mrb[30].mxu1  ;;  %v4556_v32 = vpop.f32.mrb[28].mxu0 }
 0x32f   : > { %vm2929_vm8 = vcmp.ge.f32.partialorder %v2908_v57, 0.0  ;;  %v2934_v12 = vmul.f32 0.1, %v2908_v57  ;;  %v2911_v50 = vadd.f32 %v2910_v17, %v2855_v14  ;;  %v4664_v30 = vpop.f32.mrb[31].mxu1  ;;  %v4557_v4 = vpop.f32.mrb[29].mxu0 }
 0x330   : > { %v4558_v15 = vadd.f32 %v4557_v4, %v4556_v32  ;;  %v4559_v18 = vpop.f32.mrb[30].mxu0 }
 0x331   : > { %v2939_v59 = vsel %vm2929_vm8, %v2908_v57, %v2934_v12  ;;  %vm2930_vm1 = vcmp.ge.f32.partialorder %v2911_v50, 0.0  ;;  %v2935_v22 = vmul.f32 0.1, %v2911_v50  ;;  %v4560_v24 = vpop.f32.mrb[31].mxu0  ;;  %vm5967_vm8 = vmand %vm2953_vm3, %vm2958_vm11 }
 0x332   : > { %v2975_v47 = vsel %vm2960_vm0, %v2939_v59, 0.0  ;;  %v4561_v53 = vadd.f32 %v4560_v24, %v4559_v18  ;;  %v2860_v43 = vadd.f32 %v4558_v15, %v2804_v13  ;;  %vm2959_vm0 = vcmp.lt.s32.totalorder %v5953_v42, 8  ;;  %vm6355_vm3 = vmmov %vm6354_vm10 }
 0x333   : > { %v4407_v31 = vpack.c.bf16 %v2975_v47, %v2975_v47  ;;  %v2940_v25 = vsel %vm2930_vm1, %v2911_v50, %v2935_v22 }
 0x334   : > { %v2976_v29 = vsel %vm2961_vm6, %v2940_v25, 0.0  ;;  %v2915_v36 = vpop.f32.mrb[32].mxu1  ;;  %v2863_v40 = vadd.f32 %v4561_v53, %v2807_v26  ;;  %vm2964_vm6 = vmand %vm2954_vm13, %vm2959_vm0  ;;  %v3062_v53 = vld [vmem:[#allocation2 + $0x10] sm:$0xf]  ;;  %vm3934_vm0 = vcmask 785408  }
 0x335   : > { %v3001_v34 = vshrl.u32 %v4407_v31, 16  ;;  %v4408_v35 = vpack.c.bf16 %v2976_v29, %v2976_v29  ;;  %v2916_v38 = vadd.f32 %v2915_v36, %v2860_v43  ;;  %v4667_v21 = vpop.f32.mrb[33].mxu1  ;;  %v3004_v33 = vshll.u32 %v4407_v31, 16  ;;  %v3065_v36 = vld [vmem:[#allocation2 + $0x14] sm:$0x1] }
 0x336   : > { %v2918_v39 = vpop.f32.mrb[34].mxu1  ;;  %v4562_v16 = vpop.f32.mrb[32].mxu0 }
 0x337   : > { %v3003_v8 = vrot.slane %v3001_v34, 7  ;;  %v3009_v27 = vshrl.u32 %v4408_v35, 16  ;;  %vm2931_vm12 = vcmp.ge.f32.partialorder %v2916_v38, 0.0  ;;  %v4668_v41 = vpop.f32.mrb[35].mxu1  ;;  %v3012_v6 = vshll.u32 %v4408_v35, 16  ;;  %v4563_v48 = vpop.f32.mrb[33].mxu0 }
 0x338   : > { %v2936_v19 = vmul.f32 0.1, %v2916_v38  ;;  %v2919_v0 = vadd.f32 %v2918_v39, %v2863_v40  ;;  %v4564_v60 = vadd.f32 %v4563_v48, %v4562_v16  ;;  %v4565_v45 = vpop.f32.mrb[34].mxu0  ;;  %v3068_v40 = vld [vmem:[#allocation2 + $0x18] sm:$0xf] }
 0x339   : > { %v3006_v3 = vor.u32 %v3004_v33, %v3003_v8  ;;  %v3007_v49 = vrot.slane %v3003_v8, 4  ;;  %v3011_v55 = vrot.slane %v3009_v27, 7  ;;  %v4566_v58 = vpop.f32.mrb[35].mxu0  ;;  %v3071_v39 = vld [vmem:[#allocation2 + $0x1c] sm:$0x1] }
 0x33a   : > { %v2941_v61 = vsel %vm2931_vm12, %v2916_v38, %v2936_v19  ;;  %vm2932_vm4 = vcmp.ge.f32.partialorder %v2919_v0, 0.0  ;;  %v2937_v11 = vmul.f32 0.1, %v2919_v0  ;;  %v2868_v14 = vadd.f32 %v4564_v60, %v2812_v23 }
 0x33b   : > { %v3051_v2 = vsel %vm5528_vm5, %v3006_v3, %v3050_v51  ;;  %v3054_v5 = vsel %vm5415_vm7, %v3007_v49, %v3053_v44  ;;  %v3014_v10 = vor.u32 %v3012_v6, %v3011_v55  ;;  %v3015_v52 = vrot.slane %v3011_v55, 4 }
 0x33c   : > { %3052 = vst [vmem:[#allocation2] sm:$0xf] %v3051_v2  ;;  %3055 = vst [vmem:[#allocation2 + $0x4] sm:$0x1] %v3054_v5  ;;  %v2977_v57 = vsel %vm5958_vm14, %v2941_v61, 0.0  ;;  %v2942_v9 = vsel %vm2932_vm4, %v2919_v0, %v2937_v11  ;;  %v2923_v17 = vpop.f32.mrb[36].mxu1 }
 0x33d   : > { %v3057_v32 = vsel %vm5528_vm5, %v3014_v10, %v3056_v54  ;;  %v3060_v12 = vsel %vm5415_vm7, %v3015_v52, %v3059_v63  ;;  %v4409_v50 = vpack.c.bf16 %v2977_v57, %v2977_v57  ;;  %v2978_v30 = vsel %vm5967_vm8, %v2942_v9, 0.0  ;;  %v4671_v13 = vpop.f32.mrb[37].mxu1  ;;  %v4915_v11 = vld [vmem:[%s6290_s5 + $0x60] sm:$0xff]   ;;  %v4918_v57 = vld [vmem:[%s6290_s5 + $0x90] sm:$0xff]  }
 0x33e   : > { %3058 = vst [vmem:[#allocation2 + $0x8] sm:$0xf] %v3057_v32  ;;  %3061 = vst [vmem:[#allocation2 + $0xc] sm:$0x1] %v3060_v12  ;;  %v4410_v4 = vpack.c.bf16 %v2978_v30, %v2978_v30  ;;  %v2924_v20 = vadd.f32 %v2923_v17, %v2868_v14  ;;  %v2926_v15 = vpop.f32.mrb[38].mxu1  ;;  %v4917_v63 = vld [vmem:[%s6290_s5 + $0x20] sm:$0xff]   ;;  %4583 = vmatprep.subr.bf16.mxu1 %v4915_v11  ;;  %4608 = vmatpush3.bf16.msra.mxu0 %v4918_v57 }
 0x33f   : > { %v3017_v18 = vshrl.u32 %v4409_v50, 16  ;;  %v4672_v59 = vpop.f32.mrb[39].mxu1  ;;  %v3020_v46 = vshll.u32 %v4409_v50, 16  ;;  %v3074_v2 = vld [vmem:[#allocation2 + $0x20] sm:$0xf]  ;;  %v4919_v12 = vld [vmem:[%s6290_s5 + $0x68] sm:$0xff]   ;;  %4584 = vmatpush3.bf16.msra.mxu1 %v4917_v63 }
 0x340   : > { %v3025_v22 = vshrl.u32 %v4410_v4, 16  ;;  %vm2933_vm1 = vcmp.ge.f32.partialorder %v2924_v20, 0.0  ;;  %v2938_v24 = vmul.f32 0.1, %v2924_v20  ;;  %v3028_v25 = vshll.u32 %v4410_v4, 16  ;;  %v4920_v50 = vld [vmem:[%s6290_s5 + $0xd8] sm:$0xff]   ;;  %4585 = vmatprep.subr.bf16.mxu1 %v4919_v12 }
 0x341   : > { %v3019_v47 = vrot.slane %v3017_v18, 7  ;;  %v3077_v30 = vld [vmem:[#allocation2 + $0x24] sm:$0x1]  ;;  %v4921_v18 = vld [vmem:[%s6290_s5 + $0x28] sm:$0xff]   ;;  %v4922_v59 = vld [vmem:[%s6290_s5 + $0x98] sm:$0xff]   ;;  %4609 = vmatprep.subr.bf16.mxu0 %v4920_v50 }
 0x342   : > { %v3027_v31 = vrot.slane %v3025_v22, 7  ;;  %v2943_v43 = vsel %vm2933_vm1, %v2924_v20, %v2938_v24  ;;  %4610 = vmatpush3.bf16.msra.mxu0 %v4922_v59 }
 0x343   : > { %v3022_v26 = vor.u32 %v3020_v46, %v3019_v47  ;;  %v3023_v29 = vrot.slane %v3019_v47, 4  ;;  %v2979_v34 = vsel %vm2964_vm6, %v2943_v43, 0.0  ;;  %v5988_v35 = vld [vmem:[#allocation2] sm:$0xf]  ;;  %v5999_v6 = vld [vmem:[#allocation2 + $0x4] sm:$0x1]  ;;  %4586 = vmatpush3.bf16.msra.mxu1 %v4921_v18 }
 0x344   : > { %v3030_v38 = vor.u32 %v3028_v25, %v3027_v31  ;;  %v3031_v21 = vrot.slane %v3027_v31, 4  ;;  %v4411_v8 = vpack.c.bf16 %v2979_v34, %v2979_v34  ;;  %v3087_v42 = vshrl.u32 %v5988_v35, 16 }
 0x345   : > { %v3063_v33 = vsel %vm5528_vm5, %v3022_v26, %v3062_v53  ;;  %v3066_v27 = vsel %vm5415_vm7, %v3023_v29, %v3065_v36  ;;  %v5995_v16 = vld [vmem:[#allocation2 + $0x8] sm:$0xf]  ;;  %v6005_v49 = vld [vmem:[#allocation2 + $0xc] sm:$0x1]  ;;  %v3090_v45 = vshll.u32 %v5988_v35, 16  ;;  %v3096_v44 = vshll.u32 %v5999_v6, 16 }
 0x346   : > { %v5997_v41 = vld [vmem:[#allocation2 + $0x8] sm:$0xf]  ;;  %3067 = vst [vmem:[#allocation2 + $0x14] sm:$0x1] %v3066_v27  ;;  %3064 = vst [vmem:[#allocation2 + $0x10] sm:$0xf] %v3063_v33  ;;  %v3069_v48 = vsel %vm5528_vm5, %v3030_v38, %v3068_v40  ;;  %v3072_v19 = vsel %vm5415_vm7, %v3031_v21, %v3071_v39 }
 0x347   : > { %v3033_v0 = vshrl.u32 %v4411_v8, 16  ;;  %v3036_v3 = vshll.u32 %v4411_v8, 16  ;;  %3070 = vst [vmem:[#allocation2 + $0x18] sm:$0xf] %v3069_v48  ;;  %3073 = vst [vmem:[#allocation2 + $0x1c] sm:$0x1] %v3072_v19  ;;  %v4306_v56 = vcombine.low %v5988_v35, %v5997_v41 }
 0x348   : > { %v3156_v51 = vshrl.u32 %v5995_v16, 16  ;;  %v3159_v55 = vshll.u32 %v5995_v16, 16  ;;  %v3089_v60 = vrot.slane %v3087_v42, 4  ;;  %v6010_v62 = vld [vmem:[#allocation2 + $0xc] sm:$0x1]  ;;  %v3101_v58 = vshrl.u32 %v5997_v41, 16 }
 0x349   : > { %v3035_v23 = vrot.slane %v3033_v0, 7  ;;  %v3104_v61 = vshll.u32 %v5997_v41, 16  ;;  %v3092_v52 = vrot.slane %v3090_v45, 5  ;;  %v3110_v54 = vshll.u32 %v6005_v49, 16  ;;  %v3197_v32 = vld [vmem:[#allocation2 + $0x8] sm:$0xe] }
 0x34a   : > { %v3158_v5 = vrot.slane %v3156_v51, 4  ;;  %v3161_v10 = vrot.slane %v3159_v55, 5  ;;  %v3103_v17 = vrot.slane %v3101_v58, 4  ;;  %v3098_v20 = vrot.slane %v3096_v44, 5  ;;  %v4923_v21 = vld [vmem:[%s6290_s5 + $0x70] sm:$0xff]   ;;  %v4924_v27 = vld [vmem:[%s6290_s5 + $0xe0] sm:$0xff]  }
 0x34b   : > { %v3038_v9 = vor.u32 %v3036_v3, %v3035_v23  ;;  %v3039_v14 = vrot.slane %v3035_v23, 4  ;;  %v3093_v4 = vor.u32 %v3092_v52, %v3089_v60  ;;  %v3106_v15 = vrot.slane %v3104_v61, 5  ;;  %4587 = vmatprep.subr.bf16.mxu1 %v4923_v21  ;;  %4611 = vmatprep.subr.bf16.mxu0 %v4924_v27 }
 0x34c   : > { %v3162_v13 = vor.u32 %v3161_v10, %v3158_v5  ;;  %v3112_v47 = vrot.slane %v3110_v54, 5  ;;  %v3165_v46 = vshll.u32 %v6010_v62, 16  ;;  %v4300_v26 = vrot.slane %v3197_v32, 9  ;;  %v4925_v10 = vld [vmem:[%s6290_s5 + $0x30] sm:$0xff]  }
 0x34d   : > { %v3075_v22 = vsel %vm5528_vm5, %v3038_v9, %v3074_v2  ;;  %v3078_v24 = vsel %vm5415_vm7, %v3039_v14, %v3077_v30  ;;  %v3150_v53 = vld [vmem:[#allocation2 + $0x10] sm:$0xf]  ;;  %v3094_v31 = vrot.slane %v3093_v4, 4  ;;  %v3107_v25 = vor.u32 %v3106_v15, %v3103_v17  ;;  %v6045_v43 = vld [vmem:[#allocation2 + $0x14] sm:$0x1]  ;;  %v4926_v14 = vld [vmem:[%s6290_s5 + $0xa0] sm:$0xff]   ;;  %4588 = vmatpush3.bf16.msra.mxu1 %v4925_v10 }
 0x34e   : > { %3076 = vst [vmem:[#allocation2 + $0x20] sm:$0xf] %v3075_v22  ;;  %3079 = vst [vmem:[#allocation2 + $0x24] sm:$0x1] %v3078_v24  ;;  %v6049_v29 = vrot.slane %v3162_v13, 4  ;;  %v4315_v37 = vcombine.low %v5995_v16, %v3150_v53  ;;  %v3170_v36 = vshrl.u32 %v3150_v53, 16  ;;  %4612 = vmatpush3.bf16.msra.mxu0 %v4926_v14 }
 0x34f   : > { %v3173_v34 = vshll.u32 %v3150_v53, 16  ;;  %v3198_v38 = vld [vmem:[#allocation2 + $0x10] sm:$0xe]  ;;  %v3099_v40 = vsel %vm5232_vm2, %v3094_v31, %v3098_v20  ;;  %v3108_v39 = vrot.slane %v3107_v25, 4  ;;  %v3208_v8 = vrot.slane %v6010_v62, 5 }
 0x350   : > { %v4301_v42 = vrot.slane %v3198_v38, 9  ;;  %v6058_v33 = vld [vmem:[#allocation2 + $0x10] sm:$0xf]  ;;  %3340 = vrot.lane.b32.xlu1 %v4315_v37, %s5047_s19  ;;  %v3172_v16 = vrot.slane %v3170_v36, 4  ;;  %v3212_v19 = vrot.slane %v6045_v43, 5  ;;  %v3179_v52 = vshll.u32 %v6045_v43, 16 }
 0x351   : > { %v3175_v48 = vrot.slane %v3173_v34, 5  ;;  %v6065_v0 = vld [vmem:[#allocation2 + $0x18] sm:$0xf]  ;;  %v3225_v3 = vshrl.u32 %v6058_v33, 16  ;;  %v3113_v51 = vsel %vm5232_vm2, %v3108_v39, %v3112_v47  ;;  %v3209_v55 = vsel %vm5675_vm15, %v4300_v26, %v3208_v8  ;;  %v3221_v60 = vld [vmem:[#allocation2 + $0x14] sm:$0x1] }
 0x352   : > { %v3222_v45 = vld [vmem:[#allocation2 + $0x1c] sm:$0x1]  ;;  %v3228_v23 = vshll.u32 %v6058_v33, 16  ;;  %v3239_v44 = vshrl.u32 %v6065_v0, 16  ;;  %v4308_v61 = vcombine.low %v3099_v40, %v3113_v51  ;;  %v3213_v11 = vsel %vm5675_vm15, %v4301_v42, %v3212_v19  ;;  %v3266_v2 = vld [vmem:[#allocation2 + $0x10] sm:$0xe] }
 0x353   : > { %v3176_v58 = vor.u32 %v3175_v48, %v3172_v16  ;;  %v3227_v1 = vrot.slane %v3225_v3, 4  ;;  %v3267_v5 = vld [vmem:[#allocation2 + $0x18] sm:$0xe]  ;;  %v4322_v54 = vcombine.low %v3209_v55, %v3213_v11  ;;  %v3234_v57 = vshll.u32 %v3221_v60, 16  ;;  %v6080_v9 = vld [vmem:[#allocation2 + $0x10] sm:$0xf] }
 0x354   : > { %v3230_v63 = vrot.slane %v3228_v23, 5  ;;  %3303 = vrot.lane.b32.xlu0 %v4308_v61, %s5047_s19  ;;  %v3241_v32 = vrot.slane %v3239_v44, 4  ;;  %v3242_v12 = vshll.u32 %v6065_v0, 16  ;;  %v4303_v50 = vrot.slane %v3266_v2, 9  ;;  %v6089_v30 = vld [vmem:[#allocation2 + $0x14] sm:$0x1] }
 0x355   : > { %v6085_v17 = vrot.slane %v3176_v58, 4  ;;  %v3248_v4 = vshll.u32 %v3222_v45, 16  ;;  %v3277_v20 = vrot.slane %v3221_v60, 5  ;;  %v4304_v15 = vrot.slane %v3267_v5, 9  ;;  %v6091_v18 = vld [vmem:[#allocation2 + $0x18] sm:$0xf] }
 0x356   : > { %v3231_v13 = vor.u32 %v3230_v63, %v3227_v1  ;;  %v3236_v59 = vrot.slane %v3234_v57, 5  ;;  %v3244_v22 = vrot.slane %v3242_v12, 5  ;;  %v3281_v24 = vrot.slane %v3222_v45, 5  ;;  %v6098_v37 = vld [vmem:[#allocation2 + $0x1c] sm:$0x1]  ;;  %v4928_v45 = vld [vmem:[%s6290_s5 + $0xe8] sm:$0xff]  }
 0x357   : > { %v3115_v47 = vshrl.u32 %v6080_v9, 16  ;;  %v3278_v31 = vsel %vm5675_vm15, %v4303_v50, %v3277_v20  ;;  %v3118_v25 = vshll.u32 %v6080_v9, 16  ;;  %v3124_v26 = vshll.u32 %v6089_v30, 16  ;;  %v3199_v40 = vld [vmem:[#allocation2 + $0x18] sm:$0xe]  ;;  %v4930_v44 = vld [vmem:[%s6290_s5 + $0xa8] sm:$0xff]   ;;  %4613 = vmatprep.subr.bf16.mxu0 %v4928_v45 }
 0x358   : > { %v3232_v53 = vrot.slane %v3231_v13, 4  ;;  %3374 = vrot.lane.b32.xlu0 %v4322_v54, %s5047_s19  ;;  %v3245_v36 = vor.u32 %v3244_v22, %v3241_v32  ;;  %v3282_v34 = vsel %vm5675_vm15, %v4304_v15, %v3281_v24  ;;  %vm6351_vm7 = vcmask 519168   ;;  %v6105_v39 = vld [vmem:[#allocation2 + $0x20] sm:$0xf]  ;;  %v3223_v16 = vld [vmem:[#allocation2 + $0x24] sm:$0x1]  ;;  %4614 = vmatpush3.bf16.msra.mxu0 %v4930_v44 }
 0x359   : > { %3435 = vst.msk [vmem:[#allocation3 + $0x10] sm:$0xf] %vm6351_vm7, %v3278_v31  ;;  %v3117_v38 = vrot.slane %v3115_v47, 4  ;;  %v3184_v21 = vshrl.u32 %v6091_v18, 16  ;;  %v3250_v8 = vrot.slane %v3248_v4, 5  ;;  %vm6352_vm5 = vmmov %vm6351_vm7  ;;  %v3120_v42 = vrot.slane %v3118_v25, 5 }
 0x35a   : > { %3436 = vst.msk [vmem:[#allocation3 + $0x24] sm:$0xf] %vm6352_vm5, %v3282_v34  ;;  %v3187_v27 = vshll.u32 %v6091_v18, 16  ;;  %v4927_v48 = vld [vmem:[%s6290_s5 + $0x78] sm:$0xff]   ;;  %v3237_v19 = vsel %vm5232_vm2, %v3232_v53, %v3236_v59  ;;  %v3246_v3 = vrot.slane %v3245_v36, 4  ;;  %v3126_v51 = vrot.slane %v3124_v26, 5  ;;  %vm6353_vm9 = vmmov %vm6352_vm5 }
 0x35b   : > { %v6114_v55 = vrot.slane %v3184_v21, 4  ;;  %v3128_v60 = vld [vmem:[#allocation2] sm:$0xe]  ;;  %v4929_v23 = vld [vmem:[%s6290_s5 + $0x38] sm:$0xff]   ;;  %v3121_v58 = vor.u32 %v3120_v42, %v3117_v38  ;;  %v4302_v11 = vrot.slane %v3199_v40, 9  ;;  %v3216_v1 = vrot.slane %v6098_v37, 5  ;;  %4589 = vmatprep.subr.bf16.mxu1 %v4927_v48 }
 0x35c   : > { %v3189_v61 = vrot.slane %v3187_v27, 5  ;;  %v3129_v2 = vld [vmem:[#allocation2 + $0x8] sm:$0xe]  ;;  %v3251_v5 = vsel %vm5232_vm2, %v3246_v3, %v3250_v8  ;;  %v4316_v10 = vcombine.low %v6091_v18, %v6091_v18  ;;  %v3253_v54 = vshrl.u32 %v6105_v39, 16  ;;  %v3268_v57 = vld [vmem:[#allocation2 + $0x20] sm:$0xe]  ;;  %4590 = vmatpush3.bf16.msra.mxu1 %v4929_v23 }
 0x35d   : > { %v3256_v63 = vshll.u32 %v6105_v39, 16  ;;  %v4934_v14 = vld [vmem:[%s6290_s5 + $0xf0] sm:$0xff]   ;;  %v4329_v32 = vcombine.low %v3237_v19, %v3251_v5  ;;  %v3122_v12 = vrot.slane %v3121_v58, 4  ;;  %v3193_v50 = vshll.u32 %v6098_v37, 16  ;;  %v6142_v20 = vld [vmem:[%s6290_s5 + $0x100] sm:$0xff]   ;;  %v4937_v24 = vld [vmem:[%s6290_s5 + $0xf8] sm:$0xff]  }
 0x35e   : > { %v3262_v13 = vshll.u32 %v3223_v16, 16  ;;  %v4935_v4 = vld [vmem:[%s6290_s5 + $0xb0] sm:$0xff]   ;;  %v3190_v15 = vor.u32 %v3189_v61, %v6114_v55  ;;  %v3217_v18 = vsel %vm5675_vm15, %v4302_v11, %v3216_v1  ;;  %v3255_v59 = vrot.slane %v3253_v54, 4  ;;  %4615 = vmatprep.subr.bf16.mxu0 %v4934_v14  ;;  %4673 = vmatprep.subr.bf16.mxu1 %v6142_v20  ;;  %v4938_v42 = vld [vmem:[%s6290_s5 + $0xb8] sm:$0xff]  }
 0x35f   : > { %v3258_v22 = vrot.slane %v3256_v63, 5  ;;  %3411 = vrot.lane.b32.xlu1 %v4329_v32, %s5047_s19  ;;  %v3127_v47 = vsel %vm5232_vm2, %v3122_v12, %v3126_v51  ;;  %v4305_v53 = vrot.slane %v3268_v57, 9  ;;  %v3285_v31 = vrot.slane %v3223_v16, 5  ;;  %4616 = vmatpush3.bf16.msra.mxu0 %v4935_v4  ;;  %v3130_v7 = vld [vmem:[#allocation2 + $0x10] sm:$0xe] }
 0x360   : > { %v4297_v25 = vrot.slane %v3128_v60, 9  ;;  %v4309_v26 = vcombine.low %v3127_v47, %v3127_v47  ;;  %v3139_v36 = vrot.slane %v5999_v6, 5  ;;  %v4298_v34 = vrot.slane %v3129_v2, 9  ;;  %4617 = vmatprep.subr.bf16.mxu0 %v4937_v24 }
 0x361   : > { %v3259_v37 = vor.u32 %v3258_v22, %v3255_v59  ;;  %v3286_v38 = vsel %vm5675_vm15, %v4305_v53, %v3285_v31  ;;  %v3143_v21 = vrot.slane %v6005_v49, 5  ;;  %v3167_v40 = vrot.slane %v3165_v46, 5  ;;  %v4944_v22 = vld [vmem:[%s6290_s5 + $0x110] sm:$0xff]  }
 0x362   : > { %v3181_v8 = vrot.slane %v3179_v52, 5  ;;  %3305 = vrot.lane.b32.xlu0 %v4309_v26, %s5047_s19  ;;  %v3264_v27 = vrot.slane %v3262_v13, 5  ;;  %3437 = vst.msk [vmem:[#allocation3 + $0x38] sm:$0xf] %vm6353_vm9, %v3286_v38  ;;  %v4327_v49 = vcombine.low %v6058_v33, %v6065_v0  ;;  %v3140_v62 = vsel %vm5675_vm15, %v4297_v25, %v3139_v36 }
 0x363   : > { %v3260_v6 = vrot.slane %v3259_v37, 4  ;;  %3342 = vrot.lane.b32.xlu1 %v4316_v10, %s5047_s19  ;;  %v3144_v46 = vsel %vm5675_vm15, %v4298_v34, %v3143_v21  ;;  %v3168_v43 = vsel %vm5232_vm2, %v6049_v29, %v3167_v40  ;;  %v4323_v16 = vcombine.low %v3217_v18, %v3217_v18  ;;  %4618 = vmatpush3.bf16.msra.mxu0 %v4938_v42  ;;  %v4948_v37 = vld [vmem:[%s6290_s5 + $0x118] sm:$0xff]  }
 0x364   : > { %v3182_v52 = vsel %vm5232_vm2, %v6085_v17, %v3181_v8  ;;  %v4313_v0 = vcombine.low %v3140_v62, %v3144_v46  ;;  %v3191_v3 = vrot.slane %v3190_v15, 4  ;;  %v3195_v51 = vrot.slane %v3193_v50, 5  ;;  %v4946_v40 = vld [vmem:[#allocation3 + $0x10] ss:$20 sps:$4 sm:$0xff]  }
 0x365   : > { %v3265_v33 = vsel %vm5232_vm2, %v3260_v6, %v3264_v27  ;;  %v4320_v48 = vcombine.low %v3168_v43, %v3182_v52  ;;  %v3147_v10 = vrot.slane %v6089_v30, 5  ;;  %v4299_v54 = vrot.slane %v3130_v7, 9  ;;  %v4942_v30 = vld [vmem:[%s6290_s5 + $0x108] sm:$0xff]  }
 0x366   : > { %v4330_v19 = vcombine.low %v3265_v33, %v3265_v33  ;;  %3376 = vrot.lane.b32.xlu0 %v4323_v16, %s5047_s19  ;;  %v3196_v29 = vsel %vm5232_vm2, %v3191_v3, %v3195_v51  ;;  %vm6356_vm2 = vmmov %vm6355_vm3  ;;  %v4307_v12 = vcombine.low %v6080_v9, %v6080_v9  ;;  %v4328_v47 = vcombine.low %v6105_v39, %v6105_v39  ;;  %v4334_v33 = vld [vmem:[%s6291_s6] ss:$0 sm:$0xff] }
 0x367   : > { %v3148_v35 = vsel %vm5675_vm15, %v4299_v54, %v3147_v10  ;;  %vm6357_vm11 = vmmov %vm6356_vm2  ;;  %v4321_v9 = vcombine.low %v3196_v29, %v3196_v29 }
 0x368   : > { %3413 = vrot.lane.b32.xlu1 %v4330_v19, %s5047_s19  ;;  %v4314_v13 = vcombine.low %v3148_v35, %v3148_v35  ;;  %vm6358_vm12 = vmmov %vm6356_vm2  ;;  %s6229_s19 = scalar_lea.hbm %s6292_s7, %s4383_s9 }
 0x369   : > { %vm6359_vm15 = vmmov %vm6356_vm2  ;;  %v4950_v27 = vld [vmem:[#allocation3 + $0x38] ss:$0 sps:$4 sm:$0xff]  }
 0x36a   : > { %vm6360_vm13 = vmmov %vm6356_vm2 }
 0x36b   : > { %vm6361_vm14 = vmmov %vm6356_vm2 }
 0x36c   : > { %vm6362_vm4 = vmmov %vm6356_vm2 }
 0x36d   : > { %vm6363_vm8 = vmmov %vm6356_vm2 }
 0x3c2   : > { %v3341_v55 = vpop.permute.xlu1 %3340 }
 0x3c3   : > { %v3346_v17 = vsel %vm6354_vm10, %v4313_v0, %v3341_v55 }
 0x3c4   : > { %v4317_v60 = vcombine.low %v3346_v17, %v3346_v17  ;;  %v4318_v45 = vcombine.high %v3346_v17, %v3346_v17 }
 0x3c6   : > { %3361 = vst [vmem:[#allocation3 + $0x4] sm:$0xf] %v4317_v60  ;;  %3362 = vst [vmem:[#allocation3 + $0x18] sm:$0xf] %v4318_v45  ;;  %v3304_v23 = vpop.permute.xlu0 %3303 }
 0x3c7   : > { %v3309_v44 = vsel %vm6355_vm3, %v4306_v56, %v3304_v23 }
 0x3c8   : > { %v4310_v58 = vcombine.low %v3309_v44, %v3309_v44  ;;  %v4311_v61 = vcombine.high %v3309_v44, %v3309_v44 }
 0x3ca   : > { %3324 = vst [vmem:[#allocation3] sm:$0xf] %v4310_v58  ;;  %3325 = vst [vmem:[#allocation3 + $0x14] sm:$0xf] %v4311_v61  ;;  %v3375_v11 = vpop.permute.xlu0 %3374 }
 0x3cb   : > { %v3380_v1 = vsel %vm6356_vm2, %v4320_v48, %v3375_v11 }
 0x3cc   : > { %v4324_v2 = vcombine.low %v3380_v1, %v3380_v1  ;;  %v4325_v5 = vcombine.high %v3380_v1, %v3380_v1 }
 0x3cd   : > { %v4933_v57 = vld [vmem:[#allocation3 + $0x4] ss:$20 sps:$4 sm:$0xff]  }
 0x3ce   : > { %3395 = vst [vmem:[#allocation3 + $0x8] sm:$0xf] %v4324_v2  ;;  %3396 = vst [vmem:[#allocation3 + $0x1c] sm:$0xf] %v4325_v5  ;;  %3822 = vmatprep.mubr.bf16.mxu1 %v4933_v57 }
 0x3d1   : > { %v3412_v63 = vpop.permute.xlu1 %3411  ;;  %v4931_v41 = vld [vmem:[#allocation3] ss:$20 sps:$4 sm:$0xff]  }
 0x3d2   : > { %v3417_v56 = vsel %vm6357_vm11, %v4327_v49, %v3412_v63  ;;  %3823 = vmatmul.mubr.bf16.vlgmr.msra.gmra.mrb[40].mxu1 %v4931_v41 }
 0x3d3   : > { %v4331_v14 = vcombine.low %v3417_v56, %v3417_v56  ;;  %v4332_v32 = vcombine.high %v3417_v56, %v3417_v56  ;;  %4674 = vmatpush3.bf16.msra.mxu1 %v6142_v20 }
 0x3d4   : > { %v3306_v50 = vpop.permute.xlu0 %3305  ;;  %4675 = vmatprep.subr.bf16.mxu1 %v4942_v30 }
 0x3d5   : > { %3432 = vst [vmem:[#allocation3 + $0xc] sm:$0xf] %v4331_v14  ;;  %3433 = vst [vmem:[#allocation3 + $0x20] sm:$0xf] %v4332_v32  ;;  %v3312_v28 = vsel %vm6358_vm12, %v4307_v12, %v3306_v50  ;;  %v3343_v4 = vpop.permute.xlu1 %3342  ;;  %v4939_v36 = vld [vmem:[#allocation3 + $0x8] ss:$20 sps:$4 sm:$0xff]  }
 0x3d6   : > { %v4312_v15 = vcombine.low %v3312_v28, %v3312_v28  ;;  %v3349_v18 = vsel %vm6359_vm15, %v4314_v13, %v3343_v4 }
 0x3d7   : > { %v4319_v59 = vcombine.low %v3349_v18, %v3349_v18  ;;  %4676 = vmatpush3.bf16.msra.mxu1 %v4942_v30 }
 0x3d8   : > { %3326 = vst [vmem:[#allocation3 + $0x28] sm:$0xf] %v4312_v15  ;;  %v3377_v24 = vpop.permute.xlu0 %3376  ;;  %4677 = vmatprep.subr.bf16.mxu1 %v4944_v22 }
 0x3d9   : > { %3363 = vst [vmem:[#allocation3 + $0x2c] sm:$0xf] %v4319_v59  ;;  %v3383_v53 = vsel %vm6360_vm13, %v4321_v9, %v3377_v24 }
 0x3da   : > { %v3414_v31 = vpop.permute.xlu1 %3413  ;;  %v4326_v25 = vcombine.low %v3383_v53, %v3383_v53 }
 0x3db   : > { %v3420_v26 = vsel %vm6361_vm14, %v4328_v47, %v3414_v31  ;;  %4678 = vmatpush3.bf16.msra.mxu1 %v4944_v22 }
 0x3dc   : > { %v4333_v20 = vcombine.low %v3420_v26, %v3420_v26  ;;  %3397 = vst [vmem:[#allocation3 + $0x30] sm:$0xf] %v4326_v25  ;;  %v4941_v34 = vld [vmem:[#allocation3 + $0xc] ss:$20 sps:$4 sm:$0xff]   ;;  %4679 = vmatprep.subr.bf16.mxu1 %v4948_v37 }
 0x3dd   : > { %3870 = vmatprep.mubr.bf16.mxu0 %v4941_v34 }
 0x3de   : > { %3434 = vst [vmem:[#allocation3 + $0x34] sm:$0xf] %v4333_v20  ;;  %3871 = vmatmul.mubr.bf16.vlgmr.msra.gmra.mrb[36].mxu0 %v4939_v36 }
 0x3df   : > { %4680 = vmatpush3.bf16.msra.mxu1 %v4948_v37 }
 0x3e0   : > { %v3444_v39 = vld [vmem:[#allocation3 + $0x28] sm:$0xff] }
 0x3e1   : > { %v4341_v38 = vcombine.high %v3444_v39, %v3444_v39  ;;  %v4340_v21 = vcombine.low %v3444_v39, %v3444_v39 }
 0x3e3   : > { %3830 = vmatprep.mubr.bf16.mxu1 %v4341_v38 }
 0x3e4   : > { %3831 = vmatmul.mubr.bf16.gmra.mrb[44].mxu1 %v4340_v21 }
 0x3e5   : > { %v3445_v8 = vld [vmem:[#allocation3 + $0x30] sm:$0xff]  ;;  %4681 = vmatprep.mubr.msk.bf16.mxu1 %vm6362_vm4, %v4946_v40 }
 0x3e6   : > { %v4343_v42 = vcombine.high %v3445_v8, %v3445_v8  ;;  %v4342_v6 = vcombine.low %v3445_v8, %v3445_v8 }
 0x3e8   : > { %3878 = vmatprep.mubr.bf16.mxu0 %v4343_v42 }
 0x3e9   : > { %3879 = vmatmul.mubr.bf16.gmra.mrb[40].mxu0 %v4342_v6 }
 0x3ec   : > { %4682 = vmatmul.mubr.msk.bf16.vlgmr.msra.gmra.mrb[48].mxu1 %vm6363_vm8, %v4950_v27 }
 0x4a5   : > { %v4591_v49 = vpop.f32.mrb[40].mxu1 }
 0x4a6   : > { %v4592_v62 = vpop.f32.mrb[41].mxu1 }
 0x4a7   : > { %v4593_v46 = vadd.f32 %v4592_v62, %v4591_v49  ;;  %v4594_v43 = vpop.f32.mrb[42].mxu1 }
 0x4a8   : > { %v4595_v52 = vpop.f32.mrb[43].mxu1 }
 0x4a9   : > { %v4596_v16 = vadd.f32 %v4595_v52, %v4594_v43  ;;  %v3825_v19 = vadd.f32 %v4593_v46, %v4334_v33 }
 0x4ab   : > { %v3828_v55 = vadd.f32 %v4596_v16, %v4334_v33 }
 0x4b1   : > { %v4619_v0 = vpop.f32.mrb[36].mxu0 }
 0x4b2   : > { %v4620_v48 = vpop.f32.mrb[37].mxu0 }
 0x4b3   : > { %v4621_v3 = vadd.f32 %v4620_v48, %v4619_v0  ;;  %v4622_v51 = vpop.f32.mrb[38].mxu0 }
 0x4b4   : > { %v4623_v29 = vpop.f32.mrb[39].mxu0 }
 0x4b5   : > { %v4624_v17 = vadd.f32 %v4623_v29, %v4622_v51  ;;  %v3873_v45 = vadd.f32 %v4621_v3, %v3825_v19 }
 0x4b7   : > { %v4597_v60 = vpop.f32.mrb[44].mxu1  ;;  %v3876_v61 = vadd.f32 %v4624_v17, %v3828_v55 }
 0x4b8   : > { %v4598_v23 = vpop.f32.mrb[45].mxu1 }
 0x4b9   : > { %v4599_v44 = vadd.f32 %v4598_v23, %v4597_v60  ;;  %v4600_v58 = vpop.f32.mrb[46].mxu1 }
 0x4ba   : > { %v4601_v11 = vpop.f32.mrb[47].mxu1 }
 0x4bb   : > { %v3833_v2 = vadd.f32 %v4599_v44, %v4334_v33 }
 0x4bc   : > { %v4625_v7 = vpop.f32.mrb[40].mxu0 }
 0x4bd   : > { %v4626_v1 = vpop.f32.mrb[41].mxu0 }
 0x4be   : > { %v4627_v5 = vadd.f32 %v4626_v1, %v4625_v7  ;;  %v4628_v10 = vpop.f32.mrb[42].mxu0 }
 0x4bf   : > { %v4629_v54 = vpop.f32.mrb[43].mxu0  ;;  %v4683_v35 = vpop.f32.mrb[48].mxu1 }
 0x4c0   : > { %v3881_v63 = vadd.f32 %v4627_v5, %v3833_v2  ;;  %v3920_v41 = vpop.f32.mrb[49].mxu1 }
 0x4c1   : > { %v3921_v57 = vadd.f32 %v3920_v41, %v3873_v45  ;;  %v4684_v14 = vpop.f32.mrb[50].mxu1 }
 0x4c2   : > { %v3929_v56 = vadd.f32 %v4683_v35, %v3881_v63  ;;  %v3923_v32 = vpop.f32.mrb[51].mxu1 }
 0x4c3   : > { %3935 = vst.msk [vmem:[%s295_s27] sm:$0xff] %vm3934_vm0, %v3921_v57  ;;  %v3924_v12 = vadd.f32 %v3923_v32, %v3876_v61 }
 0x4c4   : > { %3937 = vst.msk [vmem:[%s295_s27 + $0x10] sm:$0xff] %vm3934_vm0, %v3929_v56 }
 0x4c5   : > { %3936 = vst.msk [vmem:[%s295_s27 + $0x8] sm:$0xff] %vm3934_vm0, %v3924_v12 }
 0x4c6   : > { %4964 = shalt.err (!%p4961_p7)
}
 0x4c7   : > { %s4965_s29 = scalar_lea.hbm %s6229_s19, 384  ;;  %s4969_s12 = scalar_lea.hbm %s6292_s7, 2304 }
 0x4c8   : > { %p4966_p9 = scmp.ne.s32.totalorder %s6229_s19, %s4965_s29  ;;  %p4970_p12 = scmp.lt.u32.totalorder %s6229_s19, %s6292_s7 }
 0x4c9   : > { %p4971_p13 = scmp.lt.u32.totalorder %s4969_s12, %s4965_s29  ;;  %p4973_p1 = scmp.lt.u32.totalorder %s4965_s29, %s6229_s19 }
 0x4ca   : > { %p4967_p10 = pnand %p4966_p9, %p5144_p3 }
 0x4cb   : > { %p4972_p0 = por %p4971_p13, %p4970_p12 }
 0x4cc   : > { %p4968_p11 = pneg %p4967_p10 }
 0x4cd   : > { %p4974_p2 = por %p4973_p1, %p4972_p0 }
 0x4cf   : > { %p4975_p4 = pnand %p4974_p2, %p4968_p11 }
 0x4d1   : > { %4978 = shalt.err (!%p4975_p4)
}
 0x4d2   : > { %s5051_s27 = smov 128   ;;  %s5052_s9 = smov 8  }
 0x4d3   : > { %4688 = dma.vmem_to_hbm [thread:$0]  (%p5144_p3), %s6224_s22, 384, %s6229_s19, %s6233_s10, %s5051_s27, %s5051_s27, %s5052_s9  }
 0x4d4 PF: > { %p4694_p5 = scmp.ge.s32.totalorder %s5045_s8, 2  ;;  %s3969_s28 = sand.u32 1, %s5017_s24  }
 0x4d5   : > { %s3970_s18 = scalar_lea.sflag [#allocation5], %s3969_s28 }
 0x4d6   : > { %p4691_p6 = pnand %p4694_p5, %p5153_p8 }
 0x4d8   : > { %5012 = dma.done.wait (!%p4691_p6), %s3970_s18, 384  }
 0x4d9   : > { %5014 = vsyncadd (!%p4691_p6), %s3970_s18, 4294966912  ;;  %s20_s8 = sadd.s32 1, %s5045_s8   ;;  %s6364_s20 = sld [smem:[#allocation11_spill]] }
 0x4da   : > { %p17_p7 = scmp.ge.s32.totalorder %s20_s8, 8   ;;  %s6365_s27 = sld [smem:[#allocation7_spill]] }
 0x4db   : > { %s6366_s28 = sld [smem:[#allocation8_spill]]  ;;  %s6367_s29 = sld [smem:[#allocation9_spill]] }
 0x4dc   : > { %s6368_s30 = sld [smem:[#allocation10_spill]]  ;;  %s6369_s24 = smov %s5021_s25 }
 0x4dd   : > { %s6370_s25 = smov %s5025_s26  ;;  %19 = sbr.rel (!%p17_p7) target bundleno = 5 (0x5), region = 86 }
 0x4df   : > { %s6371_s26 = smov %s6364_s20 }
 0x4e4   :  { %3975 = vsyncpa [#allocation5], 1 }
 0x4e5   :  { %3977 = vsyncpa [#allocation5 + $0x1], 1 }

</bundles_post_ra>
